<compile_context>
chip_gen: v7x
topology: tpu7x:2x2x1
jax: 0.10.0
libtpu: 0.0.40
codegen_flags: <defaults>
</compile_context>

<pallas_src>
import jax
import jax.numpy as jnp
from jax.experimental import pallas as pl
from jax.experimental.pallas import tpu as pltpu

_VMEM = pl.BlockSpec(memory_space=pltpu.MemorySpace.VMEM)


# -----------------------------------------------------------------------------
# Single fused Pallas kernel: conv1 -> conv2 -> reduction -> LSTM -> classifier
# -----------------------------------------------------------------------------
def _fused_kernel(xps_ref, w1_ref, b1_ref, w2_ref, b2_ref,
                  redw_ref, redb_ref, embx_ref, wih_ref, whh_ref, lstmb_ref,
                  w1a_ref, w1b_ref, b1c_ref, w2c_ref, b2c_ref, w3c_ref, b3c_ref,
                  out_ref, pad_ref):
    f32 = jnp.float32
    _, batch, hp, _, cin = xps_ref.shape      # xps: (4 parities, B, 9, 9, Cin)
    ho = hp - 1                               # conv1 output spatial (stride 2)
    c1 = w1_ref.shape[2]
    c2 = w2_ref.shape[2]
    sel = ho // 2                             # conv2 stride-2 output spatial
    n_emb = redw_ref.shape[2]
    hidden = whh_ref.shape[0]
    t_len = embx_ref.shape[0] // batch
    rows = batch * ho * ho

    # ---- conv1: 3x3 stride-2 pad-1 (+ReLU) as 9 accumulating MXU dots --------
    # Parity-split input makes every stride-2 tap a contiguous VMEM slice.
    acc1 = jnp.zeros((rows, c1), f32)
    for dh in range(3):
        for dw in range(3):
            p = (dh % 2) * 2 + (dw % 2)
            orr, occ = dh // 2, dw // 2
            slab = xps_ref[p, :, orr:orr + ho, occ:occ + ho, :]   # (B, ho, ho, Cin)
            acc1 = acc1 + jnp.dot(slab.reshape(rows, cin),
                                  w1_ref[dh * 3 + dw],
                                  preferred_element_type=f32)
    y1 = jnp.maximum(acc1 + b1_ref[...], 0.0)                     # (B*ho*ho, C1)

    # ---- conv2: 3x3 "same" stride-1 on padded conv1 output (+ReLU) -----------
    # Stride-2 samples are selected below; all slices stay contiguous.
    pad_ref[...] = jnp.zeros_like(pad_ref)                        # zero border
    pad_ref[:, 1:ho + 1, 1:ho + 1, :] = y1.reshape(batch, ho, ho, c1)
    acc2 = jnp.zeros((rows, c2), f32)
    for dh in range(3):
        for dw in range(3):
            slab = pad_ref[:, dh:dh + ho, dw:dw + ho, :]          # (B, ho, ho, C1)
            acc2 = acc2 + jnp.dot(slab.reshape(rows, c1),
                                  w2_ref[dh * 3 + dw],
                                  preferred_element_type=f32)
    y2 = jnp.maximum(acc2 + b2_ref[...], 0.0).reshape(batch, ho, ho, c2)

    # ---- reduction = Flatten + Linear over the stride-2 positions ------------
    red = jnp.zeros((batch, n_emb), f32)
    for i in range(sel):
        for j in range(sel):
            feat = y2[:, 2 * i, 2 * j, :]                         # (B, C2)
            red = red + jnp.dot(feat, redw_ref[i * sel + j],
                                preferred_element_type=f32)
    reduced = red + redb_ref[...]                                 # (B, image_embedding)

    # ---- LSTM (batch_first); input projection hoisted out of the recurrence --
    gx = jnp.dot(embx_ref[...], wih_ref[...],
                 preferred_element_type=f32) + lstmb_ref[...]     # (T*B, 4H)
    h = jnp.zeros((batch, hidden), f32)
    c = jnp.zeros((batch, hidden), f32)
    for t in range(t_len):                                        # short, unrolled
        gates = gx[t * batch:(t + 1) * batch, :] + jnp.dot(
            h, whh_ref[...], preferred_element_type=f32)          # (B, 4H)
        sig = jax.nn.sigmoid(gates)                               # whole-tile EUP
        tah = jnp.tanh(gates)
        # PyTorch LSTM gate order: input, forget, cell(g), output
        i_g = sig[:, 0 * hidden:1 * hidden]
        f_g = sig[:, 1 * hidden:2 * hidden]
        g_g = tah[:, 2 * hidden:3 * hidden]
        o_g = sig[:, 3 * hidden:4 * hidden]
        c = f_g * c + i_g * g_g
        h = o_g * jnp.tanh(c)

    # ---- torch.cat((reduced, hidden), dim=1) + CoordinateClassifier ----------
    # concat @ [[w1a],[w1b]]  ==  reduced @ w1a + hidden @ w1b
    z = jnp.maximum(jnp.dot(reduced, w1a_ref[...], preferred_element_type=f32)
                    + jnp.dot(h, w1b_ref[...], preferred_element_type=f32)
                    + b1c_ref[...], 0.0)
    z = jnp.maximum(jnp.dot(z, w2c_ref[...], preferred_element_type=f32)
                    + b2c_ref[...], 0.0)
    out_ref[...] = (jnp.dot(z, w3c_ref[...], preferred_element_type=f32)
                    + b3c_ref[...])


# -----------------------------------------------------------------------------
# Wrapper: layout plumbing only (tiny tensors); all compute is in the kernel.
# -----------------------------------------------------------------------------
def dale_attribute_coordinate_predictor(params, image_nchw, attribute_tensor):
    b, cin, hh, _ = image_nchw.shape
    c1 = params["conv1_b"].shape[1]
    c2 = params["conv2_b"].shape[1]
    n_emb = params["red_w"].shape[1]
    ho = hh // 2

    # NCHW -> NHWC, pad by 1, split by (row, col) parity so every stride-2 conv
    # tap becomes a contiguous in-kernel slice (~1.3x input bytes, not 9x im2col).
    x = jnp.transpose(image_nchw, (0, 2, 3, 1)).astype(jnp.float32)
    xpad = jnp.pad(x, ((0, 0), (1, 1), (1, 1), (0, 0)))
    xps = jnp.stack([xpad[:, pr::2, pc::2, :]
                     for pr in (0, 1) for pc in (0, 1)], axis=0)  # (4, B, 9, 9, Cin)

    # Tap-major weight views (pure reshapes of the stored parameters).
    w1_taps = params["conv1_w"].reshape(9, cin, c1)
    w2_taps = params["conv2_w"].reshape(9, c1, c2)
    redw = params["red_w"].reshape(-1, c2, n_emb)                 # (sel*sel, C2, E_img)

    # Embedding lookup (gather) + time-major flatten for the hoisted projection.
    t_len = attribute_tensor.shape[1]
    embedded = jnp.take(params["emb"], attribute_tensor, axis=0)           # (B, T, E)
    embx = jnp.transpose(embedded, (1, 0, 2)).reshape(t_len * b, -1)       # (T*B, E)

    return pl.pallas_call(
        _fused_kernel,
        out_shape=jax.ShapeDtypeStruct((b, 2), jnp.float32),
        in_specs=[_VMEM] * 18,
        out_specs=_VMEM,
        scratch_shapes=[pltpu.VMEM((b, ho + 2, ho + 2, c1), jnp.float32)],
    )(xps, w1_taps, params["conv1_b"], w2_taps, params["conv2_b"],
      redw, params["red_b"], embx, params["lstm_wih"], params["lstm_whh"],
      params["lstm_b"], params["w1a"], params["w1b"], params["b1"],
      params["w2"], params["b2"], params["w3"], params["b3"])


# -----------------------------------------------------------------------------
# Deterministic parameter construction
# -----------------------------------------------------------------------------
def init_params(key, *, in_channels, conv_channels, image_size, image_embedding,
                vocab_size, encoder_embedding, encoder_out, classifier_hidden):
    ks = jax.random.split(key, 12)

    def uniform(k, shape, fan_in):
        s = 1.0 / jnp.sqrt(jnp.float32(fan_in))
        return jax.random.uniform(k, shape, jnp.float32, -s, s)

    c1, c2 = conv_channels
    p = {}
    p["conv1_w"] = uniform(ks[0], (3 * 3 * in_channels, c1), 3 * 3 * in_channels)
    p["conv1_b"] = uniform(ks[1], (1, c1), 3 * 3 * in_channels)
    p["conv2_w"] = uniform(ks[2], (3 * 3 * c1, c2), 3 * 3 * c1)
    p["conv2_b"] = uniform(ks[3], (1, c2), 3 * 3 * c1)

    flat = c2 * (image_size // 4) ** 2
    p["red_w"] = uniform(ks[4], (flat, image_embedding), flat)
    p["red_b"] = uniform(ks[5], (1, image_embedding), flat)

    p["emb"] = jax.random.normal(ks[6], (vocab_size, encoder_embedding), jnp.float32)

    h = encoder_out
    p["lstm_wih"] = uniform(ks[7], (encoder_embedding, 4 * h), h)
    p["lstm_whh"] = uniform(ks[8], (h, 4 * h), h)
    p["lstm_b"] = uniform(ks[9], (1, 4 * h), h)          # b_ih + b_hh combined

    concat = image_embedding + h
    kk = jax.random.split(ks[10], 6)
    p["w1a"] = uniform(kk[0], (image_embedding, classifier_hidden), concat)
    p["w1b"] = uniform(kk[1], (h, classifier_hidden), concat)
    p["b1"] = uniform(kk[2], (1, classifier_hidden), concat)
    p["w2"] = uniform(kk[3], (classifier_hidden, classifier_hidden), classifier_hidden)
    p["b2"] = uniform(kk[4], (1, classifier_hidden), classifier_hidden)
    kk2 = jax.random.split(ks[11], 2)
    p["w3"] = uniform(kk2[0], (classifier_hidden, 2), classifier_hidden)
    p["b3"] = uniform(kk2[1], (1, 2), classifier_hidden)
    return p


if __name__ == "__main__":
    B, C, HW = 2, 4, 16          # batch, image channels, spatial
    T = 3                        # attributes: shape, size, color
    VOCAB = 16                   # encoder_vocab_size
    ENC_EMB = 16                 # encoder_embedding
    ENC_OUT = 32                 # encoder_out (LSTM hidden)
    IMG_EMB = 32                 # image_embedding
    CLS_HID = 64                 # coordinate classifier hidden dim

    key = jax.random.PRNGKey(0)
    k_img, k_attr, k_param = jax.random.split(key, 3)

    image = jax.random.normal(k_img, (B, C, HW, HW), jnp.float32)          # NCHW
    attribute_tensor = jax.random.randint(k_attr, (B, T), 0, VOCAB, jnp.int32)

    params = init_params(
        k_param,
        in_channels=C, conv_channels=(8, 16), image_size=HW,
        image_embedding=IMG_EMB, vocab_size=VOCAB,
        encoder_embedding=ENC_EMB, encoder_out=ENC_OUT,
        classifier_hidden=CLS_HID,
    )

    predict = jax.jit(dale_attribute_coordinate_predictor)
    coords = jax.block_until_ready(predict(params, image, attribute_tensor))
    assert coords.shape == (B, 2) and coords.dtype == jnp.float32
    print("KERNEL_OK")
</pallas_src>

<mosaic_0001>
module attributes {stable_mosaic.version = 11 : i64} {
  func.func @_fused_kernel(%arg0: memref<4x2x9x9x4xf32, #tpu.memory_space<vmem>>, %arg1: memref<9x4x8xf32, #tpu.memory_space<vmem>>, %arg2: memref<1x8xf32, #tpu.memory_space<vmem>>, %arg3: memref<9x8x16xf32, #tpu.memory_space<vmem>>, %arg4: memref<1x16xf32, #tpu.memory_space<vmem>>, %arg5: memref<16x16x32xf32, #tpu.memory_space<vmem>>, %arg6: memref<1x32xf32, #tpu.memory_space<vmem>>, %arg7: memref<6x16xf32, #tpu.memory_space<vmem>>, %arg8: memref<16x128xf32, #tpu.memory_space<vmem>>, %arg9: memref<32x128xf32, #tpu.memory_space<vmem>>, %arg10: memref<1x128xf32, #tpu.memory_space<vmem>>, %arg11: memref<32x64xf32, #tpu.memory_space<vmem>>, %arg12: memref<32x64xf32, #tpu.memory_space<vmem>>, %arg13: memref<1x64xf32, #tpu.memory_space<vmem>>, %arg14: memref<64x64xf32, #tpu.memory_space<vmem>>, %arg15: memref<1x64xf32, #tpu.memory_space<vmem>>, %arg16: memref<64x2xf32, #tpu.memory_space<vmem>>, %arg17: memref<1x2xf32, #tpu.memory_space<vmem>>, %arg18: memref<2x2xf32, #tpu.memory_space<vmem>>, %arg19: memref<2x10x10x8xf32, #tpu.memory_space<vmem>>) attributes {dimension_semantics = [], scalar_prefetch = 0 : i64, scratch_operands = 1 : i64, tpu.core_type = #tpu.core_type<tc>} {
    %cst = arith.constant 0.000000e+00 : f32
    %0 = vector.broadcast %cst : f32 to vector<128x8xf32>
    %c0 = arith.constant 0 : index
    %c0_0 = arith.constant 0 : index
    %c0_1 = arith.constant 0 : index
    %c0_2 = arith.constant 0 : index
    %c0_3 = arith.constant 0 : index
    %1 = vector.load %arg0[%c0, %c0_0, %c0_1, %c0_2, %c0_3] : memref<4x2x9x9x4xf32, #tpu.memory_space<vmem>>, vector<1x2x8x8x4xf32>
    %2 = vector.shape_cast %1 : vector<1x2x8x8x4xf32> to vector<2x8x8x4xf32>
    %3 = vector.shape_cast %2 : vector<2x8x8x4xf32> to vector<128x4xf32>
    %c0_4 = arith.constant 0 : index
    %c0_5 = arith.constant 0 : index
    %c0_6 = arith.constant 0 : index
    %4 = vector.load %arg1[%c0_4, %c0_5, %c0_6] : memref<9x4x8xf32, #tpu.memory_space<vmem>>, vector<1x4x8xf32>
    %5 = vector.shape_cast %4 : vector<1x4x8xf32> to vector<4x8xf32>
    %cst_7 = arith.constant dense<0.000000e+00> : vector<128x8xf32>
    %6 = tpu.matmul %3, %5, %cst_7 {dimension_numbers = #tpu.dot_dimension_numbers<[1], [0], [0], [1], [0, 0, 1, 1], [], []>} : vector<128x4xf32>, vector<4x8xf32>, vector<128x8xf32> -> vector<128x8xf32>
    %7 = arith.addf %0, %6 : vector<128x8xf32>
    %c1 = arith.constant 1 : index
    %c0_8 = arith.constant 0 : index
    %c0_9 = arith.constant 0 : index
    %c0_10 = arith.constant 0 : index
    %c0_11 = arith.constant 0 : index
    %8 = vector.load %arg0[%c1, %c0_8, %c0_9, %c0_10, %c0_11] : memref<4x2x9x9x4xf32, #tpu.memory_space<vmem>>, vector<1x2x8x8x4xf32>
    %9 = vector.shape_cast %8 : vector<1x2x8x8x4xf32> to vector<2x8x8x4xf32>
    %10 = vector.shape_cast %9 : vector<2x8x8x4xf32> to vector<128x4xf32>
    %c1_12 = arith.constant 1 : index
    %c0_13 = arith.constant 0 : index
    %c0_14 = arith.constant 0 : index
    %11 = vector.load %arg1[%c1_12, %c0_13, %c0_14] : memref<9x4x8xf32, #tpu.memory_space<vmem>>, vector<1x4x8xf32>
    %12 = vector.shape_cast %11 : vector<1x4x8xf32> to vector<4x8xf32>
    %cst_15 = arith.constant dense<0.000000e+00> : vector<128x8xf32>
    %13 = tpu.matmul %10, %12, %cst_15 {dimension_numbers = #tpu.dot_dimension_numbers<[1], [0], [0], [1], [0, 0, 1, 1], [], []>} : vector<128x4xf32>, vector<4x8xf32>, vector<128x8xf32> -> vector<128x8xf32>
    %14 = arith.addf %7, %13 : vector<128x8xf32>
    %c0_16 = arith.constant 0 : index
    %c0_17 = arith.constant 0 : index
    %c0_18 = arith.constant 0 : index
    %c1_19 = arith.constant 1 : index
    %c0_20 = arith.constant 0 : index
    %15 = vector.load %arg0[%c0_16, %c0_17, %c0_18, %c1_19, %c0_20] : memref<4x2x9x9x4xf32, #tpu.memory_space<vmem>>, vector<1x2x8x8x4xf32>
    %16 = vector.shape_cast %15 : vector<1x2x8x8x4xf32> to vector<2x8x8x4xf32>
    %17 = vector.shape_cast %16 : vector<2x8x8x4xf32> to vector<128x4xf32>
    %c2 = arith.constant 2 : index
    %c0_21 = arith.constant 0 : index
    %c0_22 = arith.constant 0 : index
    %18 = vector.load %arg1[%c2, %c0_21, %c0_22] : memref<9x4x8xf32, #tpu.memory_space<vmem>>, vector<1x4x8xf32>
    %19 = vector.shape_cast %18 : vector<1x4x8xf32> to vector<4x8xf32>
    %cst_23 = arith.constant dense<0.000000e+00> : vector<128x8xf32>
    %20 = tpu.matmul %17, %19, %cst_23 {dimension_numbers = #tpu.dot_dimension_numbers<[1], [0], [0], [1], [0, 0, 1, 1], [], []>} : vector<128x4xf32>, vector<4x8xf32>, vector<128x8xf32> -> vector<128x8xf32>
    %21 = arith.addf %14, %20 : vector<128x8xf32>
    %c2_24 = arith.constant 2 : index
    %c0_25 = arith.constant 0 : index
    %c0_26 = arith.constant 0 : index
    %c0_27 = arith.constant 0 : index
    %c0_28 = arith.constant 0 : index
    %22 = vector.load %arg0[%c2_24, %c0_25, %c0_26, %c0_27, %c0_28] : memref<4x2x9x9x4xf32, #tpu.memory_space<vmem>>, vector<1x2x8x8x4xf32>
    %23 = vector.shape_cast %22 : vector<1x2x8x8x4xf32> to vector<2x8x8x4xf32>
    %24 = vector.shape_cast %23 : vector<2x8x8x4xf32> to vector<128x4xf32>
    %c3 = arith.constant 3 : index
    %c0_29 = arith.constant 0 : index
    %c0_30 = arith.constant 0 : index
    %25 = vector.load %arg1[%c3, %c0_29, %c0_30] : memref<9x4x8xf32, #tpu.memory_space<vmem>>, vector<1x4x8xf32>
    %26 = vector.shape_cast %25 : vector<1x4x8xf32> to vector<4x8xf32>
    %cst_31 = arith.constant dense<0.000000e+00> : vector<128x8xf32>
    %27 = tpu.matmul %24, %26, %cst_31 {dimension_numbers = #tpu.dot_dimension_numbers<[1], [0], [0], [1], [0, 0, 1, 1], [], []>} : vector<128x4xf32>, vector<4x8xf32>, vector<128x8xf32> -> vector<128x8xf32>
    %28 = arith.addf %21, %27 : vector<128x8xf32>
    %c3_32 = arith.constant 3 : index
    %c0_33 = arith.constant 0 : index
    %c0_34 = arith.constant 0 : index
    %c0_35 = arith.constant 0 : index
    %c0_36 = arith.constant 0 : index
    %29 = vector.load %arg0[%c3_32, %c0_33, %c0_34, %c0_35, %c0_36] : memref<4x2x9x9x4xf32, #tpu.memory_space<vmem>>, vector<1x2x8x8x4xf32>
    %30 = vector.shape_cast %29 : vector<1x2x8x8x4xf32> to vector<2x8x8x4xf32>
    %31 = vector.shape_cast %30 : vector<2x8x8x4xf32> to vector<128x4xf32>
    %c4 = arith.constant 4 : index
    %c0_37 = arith.constant 0 : index
    %c0_38 = arith.constant 0 : index
    %32 = vector.load %arg1[%c4, %c0_37, %c0_38] : memref<9x4x8xf32, #tpu.memory_space<vmem>>, vector<1x4x8xf32>
    %33 = vector.shape_cast %32 : vector<1x4x8xf32> to vector<4x8xf32>
    %cst_39 = arith.constant dense<0.000000e+00> : vector<128x8xf32>
    %34 = tpu.matmul %31, %33, %cst_39 {dimension_numbers = #tpu.dot_dimension_numbers<[1], [0], [0], [1], [0, 0, 1, 1], [], []>} : vector<128x4xf32>, vector<4x8xf32>, vector<128x8xf32> -> vector<128x8xf32>
    %35 = arith.addf %28, %34 : vector<128x8xf32>
    %c2_40 = arith.constant 2 : index
    %c0_41 = arith.constant 0 : index
    %c0_42 = arith.constant 0 : index
    %c1_43 = arith.constant 1 : index
    %c0_44 = arith.constant 0 : index
    %36 = vector.load %arg0[%c2_40, %c0_41, %c0_42, %c1_43, %c0_44] : memref<4x2x9x9x4xf32, #tpu.memory_space<vmem>>, vector<1x2x8x8x4xf32>
    %37 = vector.shape_cast %36 : vector<1x2x8x8x4xf32> to vector<2x8x8x4xf32>
    %38 = vector.shape_cast %37 : vector<2x8x8x4xf32> to vector<128x4xf32>
    %c5 = arith.constant 5 : index
    %c0_45 = arith.constant 0 : index
    %c0_46 = arith.constant 0 : index
    %39 = vector.load %arg1[%c5, %c0_45, %c0_46] : memref<9x4x8xf32, #tpu.memory_space<vmem>>, vector<1x4x8xf32>
    %40 = vector.shape_cast %39 : vector<1x4x8xf32> to vector<4x8xf32>
    %cst_47 = arith.constant dense<0.000000e+00> : vector<128x8xf32>
    %41 = tpu.matmul %38, %40, %cst_47 {dimension_numbers = #tpu.dot_dimension_numbers<[1], [0], [0], [1], [0, 0, 1, 1], [], []>} : vector<128x4xf32>, vector<4x8xf32>, vector<128x8xf32> -> vector<128x8xf32>
    %42 = arith.addf %35, %41 : vector<128x8xf32>
    %c0_48 = arith.constant 0 : index
    %c0_49 = arith.constant 0 : index
    %c1_50 = arith.constant 1 : index
    %c0_51 = arith.constant 0 : index
    %c0_52 = arith.constant 0 : index
    %43 = vector.load %arg0[%c0_48, %c0_49, %c1_50, %c0_51, %c0_52] : memref<4x2x9x9x4xf32, #tpu.memory_space<vmem>>, vector<1x2x8x8x4xf32>
    %44 = vector.shape_cast %43 : vector<1x2x8x8x4xf32> to vector<2x8x8x4xf32>
    %45 = vector.shape_cast %44 : vector<2x8x8x4xf32> to vector<128x4xf32>
    %c6 = arith.constant 6 : index
    %c0_53 = arith.constant 0 : index
    %c0_54 = arith.constant 0 : index
    %46 = vector.load %arg1[%c6, %c0_53, %c0_54] : memref<9x4x8xf32, #tpu.memory_space<vmem>>, vector<1x4x8xf32>
    %47 = vector.shape_cast %46 : vector<1x4x8xf32> to vector<4x8xf32>
    %cst_55 = arith.constant dense<0.000000e+00> : vector<128x8xf32>
    %48 = tpu.matmul %45, %47, %cst_55 {dimension_numbers = #tpu.dot_dimension_numbers<[1], [0], [0], [1], [0, 0, 1, 1], [], []>} : vector<128x4xf32>, vector<4x8xf32>, vector<128x8xf32> -> vector<128x8xf32>
    %49 = arith.addf %42, %48 : vector<128x8xf32>
    %c1_56 = arith.constant 1 : index
    %c0_57 = arith.constant 0 : index
    %c1_58 = arith.constant 1 : index
    %c0_59 = arith.constant 0 : index
    %c0_60 = arith.constant 0 : index
    %50 = vector.load %arg0[%c1_56, %c0_57, %c1_58, %c0_59, %c0_60] : memref<4x2x9x9x4xf32, #tpu.memory_space<vmem>>, vector<1x2x8x8x4xf32>
    %51 = vector.shape_cast %50 : vector<1x2x8x8x4xf32> to vector<2x8x8x4xf32>
    %52 = vector.shape_cast %51 : vector<2x8x8x4xf32> to vector<128x4xf32>
    %c7 = arith.constant 7 : index
    %c0_61 = arith.constant 0 : index
    %c0_62 = arith.constant 0 : index
    %53 = vector.load %arg1[%c7, %c0_61, %c0_62] : memref<9x4x8xf32, #tpu.memory_space<vmem>>, vector<1x4x8xf32>
    %54 = vector.shape_cast %53 : vector<1x4x8xf32> to vector<4x8xf32>
    %cst_63 = arith.constant dense<0.000000e+00> : vector<128x8xf32>
    %55 = tpu.matmul %52, %54, %cst_63 {dimension_numbers = #tpu.dot_dimension_numbers<[1], [0], [0], [1], [0, 0, 1, 1], [], []>} : vector<128x4xf32>, vector<4x8xf32>, vector<128x8xf32> -> vector<128x8xf32>
    %56 = arith.addf %49, %55 : vector<128x8xf32>
    %c0_64 = arith.constant 0 : index
    %c0_65 = arith.constant 0 : index
    %c1_66 = arith.constant 1 : index
    %c1_67 = arith.constant 1 : index
    %c0_68 = arith.constant 0 : index
    %57 = vector.load %arg0[%c0_64, %c0_65, %c1_66, %c1_67, %c0_68] : memref<4x2x9x9x4xf32, #tpu.memory_space<vmem>>, vector<1x2x8x8x4xf32>
    %58 = vector.shape_cast %57 : vector<1x2x8x8x4xf32> to vector<2x8x8x4xf32>
    %59 = vector.shape_cast %58 : vector<2x8x8x4xf32> to vector<128x4xf32>
    %c8 = arith.constant 8 : index
    %c0_69 = arith.constant 0 : index
    %c0_70 = arith.constant 0 : index
    %60 = vector.load %arg1[%c8, %c0_69, %c0_70] : memref<9x4x8xf32, #tpu.memory_space<vmem>>, vector<1x4x8xf32>
    %61 = vector.shape_cast %60 : vector<1x4x8xf32> to vector<4x8xf32>
    %cst_71 = arith.constant dense<0.000000e+00> : vector<128x8xf32>
    %62 = tpu.matmul %59, %61, %cst_71 {dimension_numbers = #tpu.dot_dimension_numbers<[1], [0], [0], [1], [0, 0, 1, 1], [], []>} : vector<128x4xf32>, vector<4x8xf32>, vector<128x8xf32> -> vector<128x8xf32>
    %63 = arith.addf %56, %62 : vector<128x8xf32>
    %c0_72 = arith.constant 0 : index
    %c0_73 = arith.constant 0 : index
    %64 = vector.load %arg2[%c0_72, %c0_73] : memref<1x8xf32, #tpu.memory_space<vmem>>, vector<1x8xf32>
    %65 = vector.broadcast %64 : vector<1x8xf32> to vector<128x8xf32>
    %66 = arith.addf %63, %65 : vector<128x8xf32>
    %cst_74 = arith.constant 0.000000e+00 : f32
    %67 = vector.broadcast %cst_74 : f32 to vector<128x8xf32>
    %68 = arith.maximumf %66, %67 : vector<128x8xf32>
    %cst_75 = arith.constant 0.000000e+00 : f32
    %69 = vector.broadcast %cst_75 : f32 to vector<2x10x10x8xf32>
    %c0_76 = arith.constant 0 : index
    %c0_77 = arith.constant 0 : index
    %c0_78 = arith.constant 0 : index
    %c0_79 = arith.constant 0 : index
    %70 = vector.load %arg19[%c0_76, %c0_77, %c0_78, %c0_79] : memref<2x10x10x8xf32, #tpu.memory_space<vmem>>, vector<2x10x10x8xf32>
    tpu.vector_store %arg19[%c0_76, %c0_77, %c0_78, %c0_79], %69 {strides = array<i32>} : memref<2x10x10x8xf32, #tpu.memory_space<vmem>>, vector<2x10x10x8xf32>,
    %71 = vector.shape_cast %68 : vector<128x8xf32> to vector<2x8x8x8xf32>
    %c0_80 = arith.constant 0 : index
    %c1_81 = arith.constant 1 : index
    %c1_82 = arith.constant 1 : index
    %c0_83 = arith.constant 0 : index
    %72 = vector.load %arg19[%c0_80, %c1_81, %c1_82, %c0_83] : memref<2x10x10x8xf32, #tpu.memory_space<vmem>>, vector<2x8x8x8xf32>
    tpu.vector_store %arg19[%c0_80, %c1_81, %c1_82, %c0_83], %71 {strides = array<i32>} : memref<2x10x10x8xf32, #tpu.memory_space<vmem>>, vector<2x8x8x8xf32>,
    %cst_84 = arith.constant 0.000000e+00 : f32
    %73 = vector.broadcast %cst_84 : f32 to vector<128x16xf32>
    %c0_85 = arith.constant 0 : index
    %c0_86 = arith.constant 0 : index
    %c0_87 = arith.constant 0 : index
    %c0_88 = arith.constant 0 : index
    %74 = vector.load %arg19[%c0_85, %c0_86, %c0_87, %c0_88] : memref<2x10x10x8xf32, #tpu.memory_space<vmem>>, vector<2x8x8x8xf32>
    %75 = vector.shape_cast %74 : vector<2x8x8x8xf32> to vector<128x8xf32>
    %c0_89 = arith.constant 0 : index
    %c0_90 = arith.constant 0 : index
    %c0_91 = arith.constant 0 : index
    %76 = vector.load %arg3[%c0_89, %c0_90, %c0_91] : memref<9x8x16xf32, #tpu.memory_space<vmem>>, vector<1x8x16xf32>
    %77 = vector.shape_cast %76 : vector<1x8x16xf32> to vector<8x16xf32>
    %cst_92 = arith.constant dense<0.000000e+00> : vector<128x16xf32>
    %78 = tpu.matmul %75, %77, %cst_92 {dimension_numbers = #tpu.dot_dimension_numbers<[1], [0], [0], [1], [0, 0, 1, 1], [], []>} : vector<128x8xf32>, vector<8x16xf32>, vector<128x16xf32> -> vector<128x16xf32>
    %79 = arith.addf %73, %78 : vector<128x16xf32>
    %c0_93 = arith.constant 0 : index
    %c0_94 = arith.constant 0 : index
    %c1_95 = arith.constant 1 : index
    %c0_96 = arith.constant 0 : index
    %80 = vector.load %arg19[%c0_93, %c0_94, %c1_95, %c0_96] : memref<2x10x10x8xf32, #tpu.memory_space<vmem>>, vector<2x8x8x8xf32>
    %81 = vector.shape_cast %80 : vector<2x8x8x8xf32> to vector<128x8xf32>
    %c1_97 = arith.constant 1 : index
    %c0_98 = arith.constant 0 : index
    %c0_99 = arith.constant 0 : index
    %82 = vector.load %arg3[%c1_97, %c0_98, %c0_99] : memref<9x8x16xf32, #tpu.memory_space<vmem>>, vector<1x8x16xf32>
    %83 = vector.shape_cast %82 : vector<1x8x16xf32> to vector<8x16xf32>
    %cst_100 = arith.constant dense<0.000000e+00> : vector<128x16xf32>
    %84 = tpu.matmul %81, %83, %cst_100 {dimension_numbers = #tpu.dot_dimension_numbers<[1], [0], [0], [1], [0, 0, 1, 1], [], []>} : vector<128x8xf32>, vector<8x16xf32>, vector<128x16xf32> -> vector<128x16xf32>
    %85 = arith.addf %79, %84 : vector<128x16xf32>
    %c0_101 = arith.constant 0 : index
    %c0_102 = arith.constant 0 : index
    %c2_103 = arith.constant 2 : index
    %c0_104 = arith.constant 0 : index
    %86 = vector.load %arg19[%c0_101, %c0_102, %c2_103, %c0_104] : memref<2x10x10x8xf32, #tpu.memory_space<vmem>>, vector<2x8x8x8xf32>
    %87 = vector.shape_cast %86 : vector<2x8x8x8xf32> to vector<128x8xf32>
    %c2_105 = arith.constant 2 : index
    %c0_106 = arith.constant 0 : index
    %c0_107 = arith.constant 0 : index
    %88 = vector.load %arg3[%c2_105, %c0_106, %c0_107] : memref<9x8x16xf32, #tpu.memory_space<vmem>>, vector<1x8x16xf32>
    %89 = vector.shape_cast %88 : vector<1x8x16xf32> to vector<8x16xf32>
    %cst_108 = arith.constant dense<0.000000e+00> : vector<128x16xf32>
    %90 = tpu.matmul %87, %89, %cst_108 {dimension_numbers = #tpu.dot_dimension_numbers<[1], [0], [0], [1], [0, 0, 1, 1], [], []>} : vector<128x8xf32>, vector<8x16xf32>, vector<128x16xf32> -> vector<128x16xf32>
    %91 = arith.addf %85, %90 : vector<128x16xf32>
    %c0_109 = arith.constant 0 : index
    %c1_110 = arith.constant 1 : index
    %c0_111 = arith.constant 0 : index
    %c0_112 = arith.constant 0 : index
    %92 = vector.load %arg19[%c0_109, %c1_110, %c0_111, %c0_112] : memref<2x10x10x8xf32, #tpu.memory_space<vmem>>, vector<2x8x8x8xf32>
    %93 = vector.shape_cast %92 : vector<2x8x8x8xf32> to vector<128x8xf32>
    %c3_113 = arith.constant 3 : index
    %c0_114 = arith.constant 0 : index
    %c0_115 = arith.constant 0 : index
    %94 = vector.load %arg3[%c3_113, %c0_114, %c0_115] : memref<9x8x16xf32, #tpu.memory_space<vmem>>, vector<1x8x16xf32>
    %95 = vector.shape_cast %94 : vector<1x8x16xf32> to vector<8x16xf32>
    %cst_116 = arith.constant dense<0.000000e+00> : vector<128x16xf32>
    %96 = tpu.matmul %93, %95, %cst_116 {dimension_numbers = #tpu.dot_dimension_numbers<[1], [0], [0], [1], [0, 0, 1, 1], [], []>} : vector<128x8xf32>, vector<8x16xf32>, vector<128x16xf32> -> vector<128x16xf32>
    %97 = arith.addf %91, %96 : vector<128x16xf32>
    %c0_117 = arith.constant 0 : index
    %c1_118 = arith.constant 1 : index
    %c1_119 = arith.constant 1 : index
    %c0_120 = arith.constant 0 : index
    %98 = vector.load %arg19[%c0_117, %c1_118, %c1_119, %c0_120] : memref<2x10x10x8xf32, #tpu.memory_space<vmem>>, vector<2x8x8x8xf32>
    %99 = vector.shape_cast %98 : vector<2x8x8x8xf32> to vector<128x8xf32>
    %c4_121 = arith.constant 4 : index
    %c0_122 = arith.constant 0 : index
    %c0_123 = arith.constant 0 : index
    %100 = vector.load %arg3[%c4_121, %c0_122, %c0_123] : memref<9x8x16xf32, #tpu.memory_space<vmem>>, vector<1x8x16xf32>
    %101 = vector.shape_cast %100 : vector<1x8x16xf32> to vector<8x16xf32>
    %cst_124 = arith.constant dense<0.000000e+00> : vector<128x16xf32>
    %102 = tpu.matmul %99, %101, %cst_124 {dimension_numbers = #tpu.dot_dimension_numbers<[1], [0], [0], [1], [0, 0, 1, 1], [], []>} : vector<128x8xf32>, vector<8x16xf32>, vector<128x16xf32> -> vector<128x16xf32>
    %103 = arith.addf %97, %102 : vector<128x16xf32>
    %c0_125 = arith.constant 0 : index
    %c1_126 = arith.constant 1 : index
    %c2_127 = arith.constant 2 : index
    %c0_128 = arith.constant 0 : index
    %104 = vector.load %arg19[%c0_125, %c1_126, %c2_127, %c0_128] : memref<2x10x10x8xf32, #tpu.memory_space<vmem>>, vector<2x8x8x8xf32>
    %105 = vector.shape_cast %104 : vector<2x8x8x8xf32> to vector<128x8xf32>
    %c5_129 = arith.constant 5 : index
    %c0_130 = arith.constant 0 : index
    %c0_131 = arith.constant 0 : index
    %106 = vector.load %arg3[%c5_129, %c0_130, %c0_131] : memref<9x8x16xf32, #tpu.memory_space<vmem>>, vector<1x8x16xf32>
    %107 = vector.shape_cast %106 : vector<1x8x16xf32> to vector<8x16xf32>
    %cst_132 = arith.constant dense<0.000000e+00> : vector<128x16xf32>
    %108 = tpu.matmul %105, %107, %cst_132 {dimension_numbers = #tpu.dot_dimension_numbers<[1], [0], [0], [1], [0, 0, 1, 1], [], []>} : vector<128x8xf32>, vector<8x16xf32>, vector<128x16xf32> -> vector<128x16xf32>
    %109 = arith.addf %103, %108 : vector<128x16xf32>
    %c0_133 = arith.constant 0 : index
    %c2_134 = arith.constant 2 : index
    %c0_135 = arith.constant 0 : index
    %c0_136 = arith.constant 0 : index
    %110 = vector.load %arg19[%c0_133, %c2_134, %c0_135, %c0_136] : memref<2x10x10x8xf32, #tpu.memory_space<vmem>>, vector<2x8x8x8xf32>
    %111 = vector.shape_cast %110 : vector<2x8x8x8xf32> to vector<128x8xf32>
    %c6_137 = arith.constant 6 : index
    %c0_138 = arith.constant 0 : index
    %c0_139 = arith.constant 0 : index
    %112 = vector.load %arg3[%c6_137, %c0_138, %c0_139] : memref<9x8x16xf32, #tpu.memory_space<vmem>>, vector<1x8x16xf32>
    %113 = vector.shape_cast %112 : vector<1x8x16xf32> to vector<8x16xf32>
    %cst_140 = arith.constant dense<0.000000e+00> : vector<128x16xf32>
    %114 = tpu.matmul %111, %113, %cst_140 {dimension_numbers = #tpu.dot_dimension_numbers<[1], [0], [0], [1], [0, 0, 1, 1], [], []>} : vector<128x8xf32>, vector<8x16xf32>, vector<128x16xf32> -> vector<128x16xf32>
    %115 = arith.addf %109, %114 : vector<128x16xf32>
    %c0_141 = arith.constant 0 : index
    %c2_142 = arith.constant 2 : index
    %c1_143 = arith.constant 1 : index
    %c0_144 = arith.constant 0 : index
    %116 = vector.load %arg19[%c0_141, %c2_142, %c1_143, %c0_144] : memref<2x10x10x8xf32, #tpu.memory_space<vmem>>, vector<2x8x8x8xf32>
    %117 = vector.shape_cast %116 : vector<2x8x8x8xf32> to vector<128x8xf32>
    %c7_145 = arith.constant 7 : index
    %c0_146 = arith.constant 0 : index
    %c0_147 = arith.constant 0 : index
    %118 = vector.load %arg3[%c7_145, %c0_146, %c0_147] : memref<9x8x16xf32, #tpu.memory_space<vmem>>, vector<1x8x16xf32>
    %119 = vector.shape_cast %118 : vector<1x8x16xf32> to vector<8x16xf32>
    %cst_148 = arith.constant dense<0.000000e+00> : vector<128x16xf32>
    %120 = tpu.matmul %117, %119, %cst_148 {dimension_numbers = #tpu.dot_dimension_numbers<[1], [0], [0], [1], [0, 0, 1, 1], [], []>} : vector<128x8xf32>, vector<8x16xf32>, vector<128x16xf32> -> vector<128x16xf32>
    %121 = arith.addf %115, %120 : vector<128x16xf32>
    %c0_149 = arith.constant 0 : index
    %c2_150 = arith.constant 2 : index
    %c2_151 = arith.constant 2 : index
    %c0_152 = arith.constant 0 : index
    %122 = vector.load %arg19[%c0_149, %c2_150, %c2_151, %c0_152] : memref<2x10x10x8xf32, #tpu.memory_space<vmem>>, vector<2x8x8x8xf32>
    %123 = vector.shape_cast %122 : vector<2x8x8x8xf32> to vector<128x8xf32>
    %c8_153 = arith.constant 8 : index
    %c0_154 = arith.constant 0 : index
    %c0_155 = arith.constant 0 : index
    %124 = vector.load %arg3[%c8_153, %c0_154, %c0_155] : memref<9x8x16xf32, #tpu.memory_space<vmem>>, vector<1x8x16xf32>
    %125 = vector.shape_cast %124 : vector<1x8x16xf32> to vector<8x16xf32>
    %cst_156 = arith.constant dense<0.000000e+00> : vector<128x16xf32>
    %126 = tpu.matmul %123, %125, %cst_156 {dimension_numbers = #tpu.dot_dimension_numbers<[1], [0], [0], [1], [0, 0, 1, 1], [], []>} : vector<128x8xf32>, vector<8x16xf32>, vector<128x16xf32> -> vector<128x16xf32>
    %127 = arith.addf %121, %126 : vector<128x16xf32>
    %c0_157 = arith.constant 0 : index
    %c0_158 = arith.constant 0 : index
    %128 = vector.load %arg4[%c0_157, %c0_158] : memref<1x16xf32, #tpu.memory_space<vmem>>, vector<1x16xf32>
    %129 = vector.broadcast %128 : vector<1x16xf32> to vector<128x16xf32>
    %130 = arith.addf %127, %129 : vector<128x16xf32>
    %cst_159 = arith.constant 0.000000e+00 : f32
    %131 = vector.broadcast %cst_159 : f32 to vector<128x16xf32>
    %132 = arith.maximumf %130, %131 : vector<128x16xf32>
    %133 = vector.shape_cast %132 : vector<128x16xf32> to vector<2x8x8x16xf32>
    %cst_160 = arith.constant 0.000000e+00 : f32
    %134 = vector.broadcast %cst_160 : f32 to vector<2x32xf32>
    %135 = vector.extract_strided_slice %133 {offsets = [0, 0, 0, 0], sizes = [2, 1, 1, 16], strides = [1, 1, 1, 1]} : vector<2x8x8x16xf32> to vector<2x1x1x16xf32>
    %136 = vector.shape_cast %135 : vector<2x1x1x16xf32> to vector<2x16xf32>
    %c0_161 = arith.constant 0 : index
    %c0_162 = arith.constant 0 : index
    %c0_163 = arith.constant 0 : index
    %137 = vector.load %arg5[%c0_161, %c0_162, %c0_163] : memref<16x16x32xf32, #tpu.memory_space<vmem>>, vector<1x16x32xf32>
    %138 = vector.shape_cast %137 : vector<1x16x32xf32> to vector<16x32xf32>
    %cst_164 = arith.constant dense<0.000000e+00> : vector<2x32xf32>
    %139 = tpu.matmul %136, %138, %cst_164 {dimension_numbers = #tpu.dot_dimension_numbers<[1], [0], [0], [1], [0, 0, 1, 1], [], []>} : vector<2x16xf32>, vector<16x32xf32>, vector<2x32xf32> -> vector<2x32xf32>
    %140 = arith.addf %134, %139 : vector<2x32xf32>
    %141 = vector.extract_strided_slice %133 {offsets = [0, 0, 2, 0], sizes = [2, 1, 1, 16], strides = [1, 1, 1, 1]} : vector<2x8x8x16xf32> to vector<2x1x1x16xf32>
    %142 = vector.shape_cast %141 : vector<2x1x1x16xf32> to vector<2x16xf32>
    %c1_165 = arith.constant 1 : index
    %c0_166 = arith.constant 0 : index
    %c0_167 = arith.constant 0 : index
    %143 = vector.load %arg5[%c1_165, %c0_166, %c0_167] : memref<16x16x32xf32, #tpu.memory_space<vmem>>, vector<1x16x32xf32>
    %144 = vector.shape_cast %143 : vector<1x16x32xf32> to vector<16x32xf32>
    %cst_168 = arith.constant dense<0.000000e+00> : vector<2x32xf32>
    %145 = tpu.matmul %142, %144, %cst_168 {dimension_numbers = #tpu.dot_dimension_numbers<[1], [0], [0], [1], [0, 0, 1, 1], [], []>} : vector<2x16xf32>, vector<16x32xf32>, vector<2x32xf32> -> vector<2x32xf32>
    %146 = arith.addf %140, %145 : vector<2x32xf32>
    %147 = vector.extract_strided_slice %133 {offsets = [0, 0, 4, 0], sizes = [2, 1, 1, 16], strides = [1, 1, 1, 1]} : vector<2x8x8x16xf32> to vector<2x1x1x16xf32>
    %148 = vector.shape_cast %147 : vector<2x1x1x16xf32> to vector<2x16xf32>
    %c2_169 = arith.constant 2 : index
    %c0_170 = arith.constant 0 : index
    %c0_171 = arith.constant 0 : index
    %149 = vector.load %arg5[%c2_169, %c0_170, %c0_171] : memref<16x16x32xf32, #tpu.memory_space<vmem>>, vector<1x16x32xf32>
    %150 = vector.shape_cast %149 : vector<1x16x32xf32> to vector<16x32xf32>
    %cst_172 = arith.constant dense<0.000000e+00> : vector<2x32xf32>
    %151 = tpu.matmul %148, %150, %cst_172 {dimension_numbers = #tpu.dot_dimension_numbers<[1], [0], [0], [1], [0, 0, 1, 1], [], []>} : vector<2x16xf32>, vector<16x32xf32>, vector<2x32xf32> -> vector<2x32xf32>
    %152 = arith.addf %146, %151 : vector<2x32xf32>
    %153 = vector.extract_strided_slice %133 {offsets = [0, 0, 6, 0], sizes = [2, 1, 1, 16], strides = [1, 1, 1, 1]} : vector<2x8x8x16xf32> to vector<2x1x1x16xf32>
    %154 = vector.shape_cast %153 : vector<2x1x1x16xf32> to vector<2x16xf32>
    %c3_173 = arith.constant 3 : index
    %c0_174 = arith.constant 0 : index
    %c0_175 = arith.constant 0 : index
    %155 = vector.load %arg5[%c3_173, %c0_174, %c0_175] : memref<16x16x32xf32, #tpu.memory_space<vmem>>, vector<1x16x32xf32>
    %156 = vector.shape_cast %155 : vector<1x16x32xf32> to vector<16x32xf32>
    %cst_176 = arith.constant dense<0.000000e+00> : vector<2x32xf32>
    %157 = tpu.matmul %154, %156, %cst_176 {dimension_numbers = #tpu.dot_dimension_numbers<[1], [0], [0], [1], [0, 0, 1, 1], [], []>} : vector<2x16xf32>, vector<16x32xf32>, vector<2x32xf32> -> vector<2x32xf32>
    %158 = arith.addf %152, %157 : vector<2x32xf32>
    %159 = vector.extract_strided_slice %133 {offsets = [0, 2, 0, 0], sizes = [2, 1, 1, 16], strides = [1, 1, 1, 1]} : vector<2x8x8x16xf32> to vector<2x1x1x16xf32>
    %160 = vector.shape_cast %159 : vector<2x1x1x16xf32> to vector<2x16xf32>
    %c4_177 = arith.constant 4 : index
    %c0_178 = arith.constant 0 : index
    %c0_179 = arith.constant 0 : index
    %161 = vector.load %arg5[%c4_177, %c0_178, %c0_179] : memref<16x16x32xf32, #tpu.memory_space<vmem>>, vector<1x16x32xf32>
    %162 = vector.shape_cast %161 : vector<1x16x32xf32> to vector<16x32xf32>
    %cst_180 = arith.constant dense<0.000000e+00> : vector<2x32xf32>
    %163 = tpu.matmul %160, %162, %cst_180 {dimension_numbers = #tpu.dot_dimension_numbers<[1], [0], [0], [1], [0, 0, 1, 1], [], []>} : vector<2x16xf32>, vector<16x32xf32>, vector<2x32xf32> -> vector<2x32xf32>
    %164 = arith.addf %158, %163 : vector<2x32xf32>
    %165 = vector.extract_strided_slice %133 {offsets = [0, 2, 2, 0], sizes = [2, 1, 1, 16], strides = [1, 1, 1, 1]} : vector<2x8x8x16xf32> to vector<2x1x1x16xf32>
    %166 = vector.shape_cast %165 : vector<2x1x1x16xf32> to vector<2x16xf32>
    %c5_181 = arith.constant 5 : index
    %c0_182 = arith.constant 0 : index
    %c0_183 = arith.constant 0 : index
    %167 = vector.load %arg5[%c5_181, %c0_182, %c0_183] : memref<16x16x32xf32, #tpu.memory_space<vmem>>, vector<1x16x32xf32>
    %168 = vector.shape_cast %167 : vector<1x16x32xf32> to vector<16x32xf32>
    %cst_184 = arith.constant dense<0.000000e+00> : vector<2x32xf32>
    %169 = tpu.matmul %166, %168, %cst_184 {dimension_numbers = #tpu.dot_dimension_numbers<[1], [0], [0], [1], [0, 0, 1, 1], [], []>} : vector<2x16xf32>, vector<16x32xf32>, vector<2x32xf32> -> vector<2x32xf32>
    %170 = arith.addf %164, %169 : vector<2x32xf32>
    %171 = vector.extract_strided_slice %133 {offsets = [0, 2, 4, 0], sizes = [2, 1, 1, 16], strides = [1, 1, 1, 1]} : vector<2x8x8x16xf32> to vector<2x1x1x16xf32>
    %172 = vector.shape_cast %171 : vector<2x1x1x16xf32> to vector<2x16xf32>
    %c6_185 = arith.constant 6 : index
    %c0_186 = arith.constant 0 : index
    %c0_187 = arith.constant 0 : index
    %173 = vector.load %arg5[%c6_185, %c0_186, %c0_187] : memref<16x16x32xf32, #tpu.memory_space<vmem>>, vector<1x16x32xf32>
    %174 = vector.shape_cast %173 : vector<1x16x32xf32> to vector<16x32xf32>
    %cst_188 = arith.constant dense<0.000000e+00> : vector<2x32xf32>
    %175 = tpu.matmul %172, %174, %cst_188 {dimension_numbers = #tpu.dot_dimension_numbers<[1], [0], [0], [1], [0, 0, 1, 1], [], []>} : vector<2x16xf32>, vector<16x32xf32>, vector<2x32xf32> -> vector<2x32xf32>
    %176 = arith.addf %170, %175 : vector<2x32xf32>
    %177 = vector.extract_strided_slice %133 {offsets = [0, 2, 6, 0], sizes = [2, 1, 1, 16], strides = [1, 1, 1, 1]} : vector<2x8x8x16xf32> to vector<2x1x1x16xf32>
    %178 = vector.shape_cast %177 : vector<2x1x1x16xf32> to vector<2x16xf32>
    %c7_189 = arith.constant 7 : index
    %c0_190 = arith.constant 0 : index
    %c0_191 = arith.constant 0 : index
    %179 = vector.load %arg5[%c7_189, %c0_190, %c0_191] : memref<16x16x32xf32, #tpu.memory_space<vmem>>, vector<1x16x32xf32>
    %180 = vector.shape_cast %179 : vector<1x16x32xf32> to vector<16x32xf32>
    %cst_192 = arith.constant dense<0.000000e+00> : vector<2x32xf32>
    %181 = tpu.matmul %178, %180, %cst_192 {dimension_numbers = #tpu.dot_dimension_numbers<[1], [0], [0], [1], [0, 0, 1, 1], [], []>} : vector<2x16xf32>, vector<16x32xf32>, vector<2x32xf32> -> vector<2x32xf32>
    %182 = arith.addf %176, %181 : vector<2x32xf32>
    %183 = vector.extract_strided_slice %133 {offsets = [0, 4, 0, 0], sizes = [2, 1, 1, 16], strides = [1, 1, 1, 1]} : vector<2x8x8x16xf32> to vector<2x1x1x16xf32>
    %184 = vector.shape_cast %183 : vector<2x1x1x16xf32> to vector<2x16xf32>
    %c8_193 = arith.constant 8 : index
    %c0_194 = arith.constant 0 : index
    %c0_195 = arith.constant 0 : index
    %185 = vector.load %arg5[%c8_193, %c0_194, %c0_195] : memref<16x16x32xf32, #tpu.memory_space<vmem>>, vector<1x16x32xf32>
    %186 = vector.shape_cast %185 : vector<1x16x32xf32> to vector<16x32xf32>
    %cst_196 = arith.constant dense<0.000000e+00> : vector<2x32xf32>
    %187 = tpu.matmul %184, %186, %cst_196 {dimension_numbers = #tpu.dot_dimension_numbers<[1], [0], [0], [1], [0, 0, 1, 1], [], []>} : vector<2x16xf32>, vector<16x32xf32>, vector<2x32xf32> -> vector<2x32xf32>
    %188 = arith.addf %182, %187 : vector<2x32xf32>
    %189 = vector.extract_strided_slice %133 {offsets = [0, 4, 2, 0], sizes = [2, 1, 1, 16], strides = [1, 1, 1, 1]} : vector<2x8x8x16xf32> to vector<2x1x1x16xf32>
    %190 = vector.shape_cast %189 : vector<2x1x1x16xf32> to vector<2x16xf32>
    %c9 = arith.constant 9 : index
    %c0_197 = arith.constant 0 : index
    %c0_198 = arith.constant 0 : index
    %191 = vector.load %arg5[%c9, %c0_197, %c0_198] : memref<16x16x32xf32, #tpu.memory_space<vmem>>, vector<1x16x32xf32>
    %192 = vector.shape_cast %191 : vector<1x16x32xf32> to vector<16x32xf32>
    %cst_199 = arith.constant dense<0.000000e+00> : vector<2x32xf32>
    %193 = tpu.matmul %190, %192, %cst_199 {dimension_numbers = #tpu.dot_dimension_numbers<[1], [0], [0], [1], [0, 0, 1, 1], [], []>} : vector<2x16xf32>, vector<16x32xf32>, vector<2x32xf32> -> vector<2x32xf32>
    %194 = arith.addf %188, %193 : vector<2x32xf32>
    %195 = vector.extract_strided_slice %133 {offsets = [0, 4, 4, 0], sizes = [2, 1, 1, 16], strides = [1, 1, 1, 1]} : vector<2x8x8x16xf32> to vector<2x1x1x16xf32>
    %196 = vector.shape_cast %195 : vector<2x1x1x16xf32> to vector<2x16xf32>
    %c10 = arith.constant 10 : index
    %c0_200 = arith.constant 0 : index
    %c0_201 = arith.constant 0 : index
    %197 = vector.load %arg5[%c10, %c0_200, %c0_201] : memref<16x16x32xf32, #tpu.memory_space<vmem>>, vector<1x16x32xf32>
    %198 = vector.shape_cast %197 : vector<1x16x32xf32> to vector<16x32xf32>
    %cst_202 = arith.constant dense<0.000000e+00> : vector<2x32xf32>
    %199 = tpu.matmul %196, %198, %cst_202 {dimension_numbers = #tpu.dot_dimension_numbers<[1], [0], [0], [1], [0, 0, 1, 1], [], []>} : vector<2x16xf32>, vector<16x32xf32>, vector<2x32xf32> -> vector<2x32xf32>
    %200 = arith.addf %194, %199 : vector<2x32xf32>
    %201 = vector.extract_strided_slice %133 {offsets = [0, 4, 6, 0], sizes = [2, 1, 1, 16], strides = [1, 1, 1, 1]} : vector<2x8x8x16xf32> to vector<2x1x1x16xf32>
    %202 = vector.shape_cast %201 : vector<2x1x1x16xf32> to vector<2x16xf32>
    %c11 = arith.constant 11 : index
    %c0_203 = arith.constant 0 : index
    %c0_204 = arith.constant 0 : index
    %203 = vector.load %arg5[%c11, %c0_203, %c0_204] : memref<16x16x32xf32, #tpu.memory_space<vmem>>, vector<1x16x32xf32>
    %204 = vector.shape_cast %203 : vector<1x16x32xf32> to vector<16x32xf32>
    %cst_205 = arith.constant dense<0.000000e+00> : vector<2x32xf32>
    %205 = tpu.matmul %202, %204, %cst_205 {dimension_numbers = #tpu.dot_dimension_numbers<[1], [0], [0], [1], [0, 0, 1, 1], [], []>} : vector<2x16xf32>, vector<16x32xf32>, vector<2x32xf32> -> vector<2x32xf32>
    %206 = arith.addf %200, %205 : vector<2x32xf32>
    %207 = vector.extract_strided_slice %133 {offsets = [0, 6, 0, 0], sizes = [2, 1, 1, 16], strides = [1, 1, 1, 1]} : vector<2x8x8x16xf32> to vector<2x1x1x16xf32>
    %208 = vector.shape_cast %207 : vector<2x1x1x16xf32> to vector<2x16xf32>
    %c12 = arith.constant 12 : index
    %c0_206 = arith.constant 0 : index
    %c0_207 = arith.constant 0 : index
    %209 = vector.load %arg5[%c12, %c0_206, %c0_207] : memref<16x16x32xf32, #tpu.memory_space<vmem>>, vector<1x16x32xf32>
    %210 = vector.shape_cast %209 : vector<1x16x32xf32> to vector<16x32xf32>
    %cst_208 = arith.constant dense<0.000000e+00> : vector<2x32xf32>
    %211 = tpu.matmul %208, %210, %cst_208 {dimension_numbers = #tpu.dot_dimension_numbers<[1], [0], [0], [1], [0, 0, 1, 1], [], []>} : vector<2x16xf32>, vector<16x32xf32>, vector<2x32xf32> -> vector<2x32xf32>
    %212 = arith.addf %206, %211 : vector<2x32xf32>
    %213 = vector.extract_strided_slice %133 {offsets = [0, 6, 2, 0], sizes = [2, 1, 1, 16], strides = [1, 1, 1, 1]} : vector<2x8x8x16xf32> to vector<2x1x1x16xf32>
    %214 = vector.shape_cast %213 : vector<2x1x1x16xf32> to vector<2x16xf32>
    %c13 = arith.constant 13 : index
    %c0_209 = arith.constant 0 : index
    %c0_210 = arith.constant 0 : index
    %215 = vector.load %arg5[%c13, %c0_209, %c0_210] : memref<16x16x32xf32, #tpu.memory_space<vmem>>, vector<1x16x32xf32>
    %216 = vector.shape_cast %215 : vector<1x16x32xf32> to vector<16x32xf32>
    %cst_211 = arith.constant dense<0.000000e+00> : vector<2x32xf32>
    %217 = tpu.matmul %214, %216, %cst_211 {dimension_numbers = #tpu.dot_dimension_numbers<[1], [0], [0], [1], [0, 0, 1, 1], [], []>} : vector<2x16xf32>, vector<16x32xf32>, vector<2x32xf32> -> vector<2x32xf32>
    %218 = arith.addf %212, %217 : vector<2x32xf32>
    %219 = vector.extract_strided_slice %133 {offsets = [0, 6, 4, 0], sizes = [2, 1, 1, 16], strides = [1, 1, 1, 1]} : vector<2x8x8x16xf32> to vector<2x1x1x16xf32>
    %220 = vector.shape_cast %219 : vector<2x1x1x16xf32> to vector<2x16xf32>
    %c14 = arith.constant 14 : index
    %c0_212 = arith.constant 0 : index
    %c0_213 = arith.constant 0 : index
    %221 = vector.load %arg5[%c14, %c0_212, %c0_213] : memref<16x16x32xf32, #tpu.memory_space<vmem>>, vector<1x16x32xf32>
    %222 = vector.shape_cast %221 : vector<1x16x32xf32> to vector<16x32xf32>
    %cst_214 = arith.constant dense<0.000000e+00> : vector<2x32xf32>
    %223 = tpu.matmul %220, %222, %cst_214 {dimension_numbers = #tpu.dot_dimension_numbers<[1], [0], [0], [1], [0, 0, 1, 1], [], []>} : vector<2x16xf32>, vector<16x32xf32>, vector<2x32xf32> -> vector<2x32xf32>
    %224 = arith.addf %218, %223 : vector<2x32xf32>
    %225 = vector.extract_strided_slice %133 {offsets = [0, 6, 6, 0], sizes = [2, 1, 1, 16], strides = [1, 1, 1, 1]} : vector<2x8x8x16xf32> to vector<2x1x1x16xf32>
    %226 = vector.shape_cast %225 : vector<2x1x1x16xf32> to vector<2x16xf32>
    %c15 = arith.constant 15 : index
    %c0_215 = arith.constant 0 : index
    %c0_216 = arith.constant 0 : index
    %227 = vector.load %arg5[%c15, %c0_215, %c0_216] : memref<16x16x32xf32, #tpu.memory_space<vmem>>, vector<1x16x32xf32>
    %228 = vector.shape_cast %227 : vector<1x16x32xf32> to vector<16x32xf32>
    %cst_217 = arith.constant dense<0.000000e+00> : vector<2x32xf32>
    %229 = tpu.matmul %226, %228, %cst_217 {dimension_numbers = #tpu.dot_dimension_numbers<[1], [0], [0], [1], [0, 0, 1, 1], [], []>} : vector<2x16xf32>, vector<16x32xf32>, vector<2x32xf32> -> vector<2x32xf32>
    %230 = arith.addf %224, %229 : vector<2x32xf32>
    %c0_218 = arith.constant 0 : index
    %c0_219 = arith.constant 0 : index
    %231 = vector.load %arg6[%c0_218, %c0_219] : memref<1x32xf32, #tpu.memory_space<vmem>>, vector<1x32xf32>
    %232 = vector.broadcast %231 : vector<1x32xf32> to vector<2x32xf32>
    %233 = arith.addf %230, %232 : vector<2x32xf32>
    %c0_220 = arith.constant 0 : index
    %c0_221 = arith.constant 0 : index
    %234 = vector.load %arg7[%c0_220, %c0_221] : memref<6x16xf32, #tpu.memory_space<vmem>>, vector<6x16xf32>
    %c0_222 = arith.constant 0 : index
    %c0_223 = arith.constant 0 : index
    %235 = vector.load %arg8[%c0_222, %c0_223] : memref<16x128xf32, #tpu.memory_space<vmem>>, vector<16x128xf32>
    %cst_224 = arith.constant dense<0.000000e+00> : vector<6x128xf32>
    %236 = tpu.matmul %234, %235, %cst_224 {dimension_numbers = #tpu.dot_dimension_numbers<[1], [0], [0], [1], [0, 0, 1, 1], [], []>} : vector<6x16xf32>, vector<16x128xf32>, vector<6x128xf32> -> vector<6x128xf32>
    %c0_225 = arith.constant 0 : index
    %c0_226 = arith.constant 0 : index
    %237 = vector.load %arg10[%c0_225, %c0_226] : memref<1x128xf32, #tpu.memory_space<vmem>>, vector<1x128xf32>
    %238 = vector.broadcast %237 : vector<1x128xf32> to vector<6x128xf32>
    %239 = arith.addf %236, %238 : vector<6x128xf32>
    %cst_227 = arith.constant 0.000000e+00 : f32
    %240 = vector.broadcast %cst_227 : f32 to vector<2x32xf32>
    %cst_228 = arith.constant 0.000000e+00 : f32
    %241 = vector.broadcast %cst_228 : f32 to vector<2x32xf32>
    %242 = vector.extract_strided_slice %239 {offsets = [0, 0], sizes = [2, 128], strides = [1, 1]} : vector<6x128xf32> to vector<2x128xf32>
    %c0_229 = arith.constant 0 : index
    %c0_230 = arith.constant 0 : index
    %243 = vector.load %arg9[%c0_229, %c0_230] : memref<32x128xf32, #tpu.memory_space<vmem>>, vector<32x128xf32>
    %cst_231 = arith.constant dense<0.000000e+00> : vector<2x128xf32>
    %244 = tpu.matmul %240, %243, %cst_231 {dimension_numbers = #tpu.dot_dimension_numbers<[1], [0], [0], [1], [0, 0, 1, 1], [], []>} : vector<2x32xf32>, vector<32x128xf32>, vector<2x128xf32> -> vector<2x128xf32>
    %245 = arith.addf %242, %244 : vector<2x128xf32>
    %246 = arith.negf %245 : vector<2x128xf32>
    %247 = math.exp %246 : vector<2x128xf32>
    %cst_232 = arith.constant 1.000000e+00 : f32
    %248 = vector.broadcast %cst_232 : f32 to vector<2x128xf32>
    %249 = arith.addf %248, %247 : vector<2x128xf32>
    %250 = arith.divf %248, %249 : vector<2x128xf32>
    %251 = math.tanh %245 : vector<2x128xf32>
    %252 = vector.extract_strided_slice %250 {offsets = [0, 0], sizes = [2, 32], strides = [1, 1]} : vector<2x128xf32> to vector<2x32xf32>
    %253 = vector.extract_strided_slice %250 {offsets = [0, 32], sizes = [2, 32], strides = [1, 1]} : vector<2x128xf32> to vector<2x32xf32>
    %254 = vector.extract_strided_slice %251 {offsets = [0, 64], sizes = [2, 32], strides = [1, 1]} : vector<2x128xf32> to vector<2x32xf32>
    %255 = vector.extract_strided_slice %250 {offsets = [0, 96], sizes = [2, 32], strides = [1, 1]} : vector<2x128xf32> to vector<2x32xf32>
    %256 = arith.mulf %253, %241 : vector<2x32xf32>
    %257 = arith.mulf %252, %254 : vector<2x32xf32>
    %258 = arith.addf %256, %257 : vector<2x32xf32>
    %259 = math.tanh %258 : vector<2x32xf32>
    %260 = arith.mulf %255, %259 : vector<2x32xf32>
    %261 = vector.extract_strided_slice %239 {offsets = [2, 0], sizes = [2, 128], strides = [1, 1]} : vector<6x128xf32> to vector<2x128xf32>
    %c0_233 = arith.constant 0 : index
    %c0_234 = arith.constant 0 : index
    %262 = vector.load %arg9[%c0_233, %c0_234] : memref<32x128xf32, #tpu.memory_space<vmem>>, vector<32x128xf32>
    %cst_235 = arith.constant dense<0.000000e+00> : vector<2x128xf32>
    %263 = tpu.matmul %260, %262, %cst_235 {dimension_numbers = #tpu.dot_dimension_numbers<[1], [0], [0], [1], [0, 0, 1, 1], [], []>} : vector<2x32xf32>, vector<32x128xf32>, vector<2x128xf32> -> vector<2x128xf32>
    %264 = arith.addf %261, %263 : vector<2x128xf32>
    %265 = arith.negf %264 : vector<2x128xf32>
    %266 = math.exp %265 : vector<2x128xf32>
    %cst_236 = arith.constant 1.000000e+00 : f32
    %267 = vector.broadcast %cst_236 : f32 to vector<2x128xf32>
    %268 = arith.addf %267, %266 : vector<2x128xf32>
    %269 = arith.divf %267, %268 : vector<2x128xf32>
    %270 = math.tanh %264 : vector<2x128xf32>
    %271 = vector.extract_strided_slice %269 {offsets = [0, 0], sizes = [2, 32], strides = [1, 1]} : vector<2x128xf32> to vector<2x32xf32>
    %272 = vector.extract_strided_slice %269 {offsets = [0, 32], sizes = [2, 32], strides = [1, 1]} : vector<2x128xf32> to vector<2x32xf32>
    %273 = vector.extract_strided_slice %270 {offsets = [0, 64], sizes = [2, 32], strides = [1, 1]} : vector<2x128xf32> to vector<2x32xf32>
    %274 = vector.extract_strided_slice %269 {offsets = [0, 96], sizes = [2, 32], strides = [1, 1]} : vector<2x128xf32> to vector<2x32xf32>
    %275 = arith.mulf %272, %258 : vector<2x32xf32>
    %276 = arith.mulf %271, %273 : vector<2x32xf32>
    %277 = arith.addf %275, %276 : vector<2x32xf32>
    %278 = math.tanh %277 : vector<2x32xf32>
    %279 = arith.mulf %274, %278 : vector<2x32xf32>
    %280 = vector.extract_strided_slice %239 {offsets = [4, 0], sizes = [2, 128], strides = [1, 1]} : vector<6x128xf32> to vector<2x128xf32>
    %c0_237 = arith.constant 0 : index
    %c0_238 = arith.constant 0 : index
    %281 = vector.load %arg9[%c0_237, %c0_238] : memref<32x128xf32, #tpu.memory_space<vmem>>, vector<32x128xf32>
    %cst_239 = arith.constant dense<0.000000e+00> : vector<2x128xf32>
    %282 = tpu.matmul %279, %281, %cst_239 {dimension_numbers = #tpu.dot_dimension_numbers<[1], [0], [0], [1], [0, 0, 1, 1], [], []>} : vector<2x32xf32>, vector<32x128xf32>, vector<2x128xf32> -> vector<2x128xf32>
    %283 = arith.addf %280, %282 : vector<2x128xf32>
    %284 = arith.negf %283 : vector<2x128xf32>
    %285 = math.exp %284 : vector<2x128xf32>
    %cst_240 = arith.constant 1.000000e+00 : f32
    %286 = vector.broadcast %cst_240 : f32 to vector<2x128xf32>
    %287 = arith.addf %286, %285 : vector<2x128xf32>
    %288 = arith.divf %286, %287 : vector<2x128xf32>
    %289 = math.tanh %283 : vector<2x128xf32>
    %290 = vector.extract_strided_slice %288 {offsets = [0, 0], sizes = [2, 32], strides = [1, 1]} : vector<2x128xf32> to vector<2x32xf32>
    %291 = vector.extract_strided_slice %288 {offsets = [0, 32], sizes = [2, 32], strides = [1, 1]} : vector<2x128xf32> to vector<2x32xf32>
    %292 = vector.extract_strided_slice %289 {offsets = [0, 64], sizes = [2, 32], strides = [1, 1]} : vector<2x128xf32> to vector<2x32xf32>
    %293 = vector.extract_strided_slice %288 {offsets = [0, 96], sizes = [2, 32], strides = [1, 1]} : vector<2x128xf32> to vector<2x32xf32>
    %294 = arith.mulf %291, %277 : vector<2x32xf32>
    %295 = arith.mulf %290, %292 : vector<2x32xf32>
    %296 = arith.addf %294, %295 : vector<2x32xf32>
    %297 = math.tanh %296 : vector<2x32xf32>
    %298 = arith.mulf %293, %297 : vector<2x32xf32>
    %c0_241 = arith.constant 0 : index
    %c0_242 = arith.constant 0 : index
    %299 = vector.load %arg11[%c0_241, %c0_242] : memref<32x64xf32, #tpu.memory_space<vmem>>, vector<32x64xf32>
    %cst_243 = arith.constant dense<0.000000e+00> : vector<2x64xf32>
    %300 = tpu.matmul %233, %299, %cst_243 {dimension_numbers = #tpu.dot_dimension_numbers<[1], [0], [0], [1], [0, 0, 1, 1], [], []>} : vector<2x32xf32>, vector<32x64xf32>, vector<2x64xf32> -> vector<2x64xf32>
    %c0_244 = arith.constant 0 : index
    %c0_245 = arith.constant 0 : index
    %301 = vector.load %arg12[%c0_244, %c0_245] : memref<32x64xf32, #tpu.memory_space<vmem>>, vector<32x64xf32>
    %cst_246 = arith.constant dense<0.000000e+00> : vector<2x64xf32>
    %302 = tpu.matmul %298, %301, %cst_246 {dimension_numbers = #tpu.dot_dimension_numbers<[1], [0], [0], [1], [0, 0, 1, 1], [], []>} : vector<2x32xf32>, vector<32x64xf32>, vector<2x64xf32> -> vector<2x64xf32>
    %303 = arith.addf %300, %302 : vector<2x64xf32>
    %c0_247 = arith.constant 0 : index
    %c0_248 = arith.constant 0 : index
    %304 = vector.load %arg13[%c0_247, %c0_248] : memref<1x64xf32, #tpu.memory_space<vmem>>, vector<1x64xf32>
    %305 = vector.broadcast %304 : vector<1x64xf32> to vector<2x64xf32>
    %306 = arith.addf %303, %305 : vector<2x64xf32>
    %cst_249 = arith.constant 0.000000e+00 : f32
    %307 = vector.broadcast %cst_249 : f32 to vector<2x64xf32>
    %308 = arith.maximumf %306, %307 : vector<2x64xf32>
    %c0_250 = arith.constant 0 : index
    %c0_251 = arith.constant 0 : index
    %309 = vector.load %arg14[%c0_250, %c0_251] : memref<64x64xf32, #tpu.memory_space<vmem>>, vector<64x64xf32>
    %cst_252 = arith.constant dense<0.000000e+00> : vector<2x64xf32>
    %310 = tpu.matmul %308, %309, %cst_252 {dimension_numbers = #tpu.dot_dimension_numbers<[1], [0], [0], [1], [0, 0, 1, 1], [], []>} : vector<2x64xf32>, vector<64x64xf32>, vector<2x64xf32> -> vector<2x64xf32>
    %c0_253 = arith.constant 0 : index
    %c0_254 = arith.constant 0 : index
    %311 = vector.load %arg15[%c0_253, %c0_254] : memref<1x64xf32, #tpu.memory_space<vmem>>, vector<1x64xf32>
    %312 = vector.broadcast %311 : vector<1x64xf32> to vector<2x64xf32>
    %313 = arith.addf %310, %312 : vector<2x64xf32>
    %cst_255 = arith.constant 0.000000e+00 : f32
    %314 = vector.broadcast %cst_255 : f32 to vector<2x64xf32>
    %315 = arith.maximumf %313, %314 : vector<2x64xf32>
    %c0_256 = arith.constant 0 : index
    %c0_257 = arith.constant 0 : index
    %316 = vector.load %arg16[%c0_256, %c0_257] : memref<64x2xf32, #tpu.memory_space<vmem>>, vector<64x2xf32>
    %cst_258 = arith.constant dense<0.000000e+00> : vector<2x2xf32>
    %317 = tpu.matmul %315, %316, %cst_258 {dimension_numbers = #tpu.dot_dimension_numbers<[1], [0], [0], [1], [0, 0, 1, 1], [], []>} : vector<2x64xf32>, vector<64x2xf32>, vector<2x2xf32> -> vector<2x2xf32>
    %c0_259 = arith.constant 0 : index
    %c0_260 = arith.constant 0 : index
    %318 = vector.load %arg17[%c0_259, %c0_260] : memref<1x2xf32, #tpu.memory_space<vmem>>, vector<1x2xf32>
    %319 = vector.broadcast %318 : vector<1x2xf32> to vector<2x2xf32>
    %320 = arith.addf %317, %319 : vector<2x2xf32>
    %c0_261 = arith.constant 0 : index
    %c0_262 = arith.constant 0 : index
    %321 = vector.load %arg18[%c0_261, %c0_262] : memref<2x2xf32, #tpu.memory_space<vmem>>, vector<2x2xf32>
    tpu.vector_store %arg18[%c0_261, %c0_262], %320 {strides = array<i32>} : memref<2x2xf32, #tpu.memory_space<vmem>>, vector<2x2xf32>,
    return
  }
}

</mosaic_0001>

<bundles_post_ra>
// kernel: dale_attribute_coordinate_predictor.1
= control target key start
LH: loop header
LB: loop body
LE: loop exit
PB: predicated region body
PF: predicated region fallthrough
CT: control target
= control target key end

     0   :  { %s9685_s0 = inlined_call_operand.vmem [shape: f32[4,2,9,9,4], index: 0, kind: input, shape index: {}]   ;;  %s9686_s1 = inlined_call_operand.vmem [shape: f32[9,4,8], index: 1, kind: input, shape index: {}]   ;;  %s9687_s2 = inlined_call_operand.vmem [shape: f32[1,8], index: 2, kind: input, shape index: {}]   ;;  %s9688_s3 = inlined_call_operand.vmem [shape: f32[9,8,16], index: 3, kind: input, shape index: {}]   ;;  %s9689_s4 = inlined_call_operand.vmem [shape: f32[1,16], index: 4, kind: input, shape index: {}]   ;;  %s9690_s5 = inlined_call_operand.vmem [shape: f32[16,16,32], index: 5, kind: input, shape index: {}]   ;;  %s9691_s6 = inlined_call_operand.vmem [shape: f32[1,32], index: 6, kind: input, shape index: {}]   ;;  %s9692_s7 = inlined_call_operand.vmem [shape: f32[6,16], index: 7, kind: input, shape index: {}]   ;;  %s9693_s8 = inlined_call_operand.vmem [shape: f32[16,128], index: 8, kind: input, shape index: {}]   ;;  %s9694_s9 = inlined_call_operand.vmem [shape: f32[32,128], index: 9, kind: input, shape index: {}]   ;;  %s9695_s10 = inlined_call_operand.vmem [shape: f32[1,128], index: 10, kind: input, shape index: {}]   ;;  %s9696_s11 = inlined_call_operand.vmem [shape: f32[32,64], index: 11, kind: input, shape index: {}]   ;;  %s9697_s12 = inlined_call_operand.vmem [shape: f32[32,64], index: 12, kind: input, shape index: {}]   ;;  %s9698_s13 = inlined_call_operand.vmem [shape: f32[1,64], index: 13, kind: input, shape index: {}]   ;;  %s9699_s14 = inlined_call_operand.vmem [shape: f32[64,64], index: 14, kind: input, shape index: {}]   ;;  %s9700_s15 = inlined_call_operand.vmem [shape: f32[1,64], index: 15, kind: input, shape index: {}]   ;;  %s9701_s16 = inlined_call_operand.vmem [shape: f32[64,2], index: 16, kind: input, shape index: {}]   ;;  %s9702_s17 = inlined_call_operand.vmem [shape: f32[1,2], index: 17, kind: input, shape index: {}]   ;;  %s9703_s18 = inlined_call_operand.hbm [shape: f32[2,2], index: 18, kind: output, shape index: {}]  }
   0x1   :  { %9706 = sst [smem:[#allocation6_spill]] %s9685_s0 }
   0x2   :  { %9707 = sst [smem:[#allocation7_spill]] %s9686_s1 }
   0x3   :  { %9708 = sst [smem:[#allocation8_spill]] %s9687_s2 }
   0x4   :  { %s9709_s29 = sld [smem:[#allocation7_spill]]  ;;  %vm145_vm0 = vcmask 1043456   ;;  %s9710_s19 = sld [smem:[#allocation6_spill]]  ;;  %vm96_vm1 = vcmask 31744  }
   0xa   :  { %v6158_v0 = vld [vmem:[%s9709_s29 + $0x4] sm:$0xf]  ;;  %v8107_v2 = vld [vmem:[%s9710_s19 + $0x130] sm:$0xff]  ;;  %v76_v3 = vld [vmem:[%s9709_s29] sm:$0xf] }
   0xb   :  { %v6142_v1 = vld [vmem:[%s9710_s19 + $0x120] sm:$0xff]  ;;  %7030 = vmatprep.subr.msk.mxu0 %vm145_vm0, %v6158_v0  ;;  %v8129_v5 = vld [vmem:[%s9710_s19 + $0x150] sm:$0xff]  ;;  %v6193_v7 = vld [vmem:[%s9709_s29 + $0x8] sm:$0xf] }
   0xc   :  { %7032 = vmatprep.mubr.msk.f32.mxu0 %vm96_vm1, %v6142_v1  ;;  %v8117_v4 = vld [vmem:[%s9710_s19 + $0x140] sm:$0xff]  ;;  %7031 = vmatpush3.msk.msra.mxu0 %vm145_vm0, %v6158_v0  ;;  %v8147_v8 = vld [vmem:[%s9710_s19 + $0x170] sm:$0xff] }
   0xd   :  { %7033 = vmatmul.mubr.msk.f32.vlgmr.msra.gmra.mrb[0].mxu0 %vm96_vm1, %v8107_v2  ;;  %7056 = vmatprep.subr.msk.mxu0 %vm145_vm0, %v76_v3  ;;  %v8134_v6 = vld [vmem:[%s9710_s19 + $0x160] sm:$0xff]  ;;  %v8161_v10 = vld [vmem:[%s9710_s19 + $0x190] sm:$0xff] }
   0xe   :  { %7057 = vmatpush3.msk.msra.mxu0 %vm145_vm0, %v76_v3  ;;  %7035 = vmatprep.mubr.msk.f32.mxu0 %vm96_vm1, %v8117_v4  ;;  %v8152_v9 = vld [vmem:[%s9710_s19 + $0x180] sm:$0xff]  ;;  %v6150_v11 = vld [vmem:[%s9710_s19 + $0x1b0] sm:$0xff] }
   0xf   :  { %7082 = vmatprep.subr.msk.mxu0 %vm145_vm0, %v6193_v7  ;;  %v8172_v12 = vld [vmem:[%s9710_s19 + $0x1c0] sm:$0xff]  ;;  %v8177_v13 = vld [vmem:[%s9710_s19 + $0x1d0] sm:$0xff] }
  0x10   :  { %v8186_v14 = vld [vmem:[%s9710_s19 + $0x1e0] sm:$0xff]  ;;  %v8191_v15 = vld [vmem:[%s9710_s19 + $0x1f0] sm:$0xff] }
  0x11   :  { %7036 = vmatmul.mubr.msk.f32.gmra.mrb[2].mxu0 %vm96_vm1, %v8129_v5  ;;  %v8200_v16 = vld [vmem:[%s9710_s19 + $0x200] sm:$0xff]  ;;  %v8205_v17 = vld [vmem:[%s9710_s19 + $0x210] sm:$0xff] }
  0x12   :  { %7038 = vmatprep.mubr.msk.f32.mxu0 %vm96_vm1, %v8134_v6  ;;  %v8214_v18 = vld [vmem:[%s9710_s19 + $0x220] sm:$0xff] }
  0x15   :  { %7039 = vmatmul.mubr.msk.f32.gmra.mrb[4].mxu0 %vm96_vm1, %v8147_v8 }
  0x16   :  { %7041 = vmatprep.mubr.msk.f32.mxu0 %vm96_vm1, %v8152_v9 }
  0x19   :  { %7042 = vmatmul.mubr.msk.f32.gmra.mrb[6].mxu0 %vm96_vm1, %v8161_v10 }
  0x1a   :  { %7044 = vmatprep.mubr.msk.f32.mxu0 %vm96_vm1, %v6150_v11 }
  0x1d   :  { %7045 = vmatmul.mubr.msk.f32.gmra.mrb[8].mxu0 %vm96_vm1, %v8172_v12 }
  0x1e   :  { %7047 = vmatprep.mubr.msk.f32.mxu0 %vm96_vm1, %v8177_v13 }
  0x21   :  { %7048 = vmatmul.mubr.msk.f32.gmra.mrb[10].mxu0 %vm96_vm1, %v8186_v14 }
  0x22   :  { %7050 = vmatprep.mubr.msk.f32.mxu0 %vm96_vm1, %v8191_v15 }
  0x25   :  { %7051 = vmatmul.mubr.msk.f32.gmra.mrb[12].mxu0 %vm96_vm1, %v8200_v16 }
  0x26   :  { %7053 = vmatprep.mubr.msk.f32.mxu0 %vm96_vm1, %v8205_v17 }
  0x27   :  { %23 = vsyncpa [#allocation4], 0  ;;  %v60_v19 = vld [vmem:[%s9710_s19] sm:$0xff]  ;;  %v8225_v20 = vld [vmem:[%s9710_s19 + $0x10] sm:$0xff]  ;;  %vm2143_vm2 = vcmask 64512   ;;  %vm2145_vm3 = vcmask 58368  }
  0x28   :  { %v8230_v21 = vld [vmem:[%s9710_s19 + $0x20] sm:$0xff]  ;;  %v6227_v22 = vld [vmem:[%s9709_s29 + $0xc] sm:$0xf]  ;;  %v8243_v23 = vld [vmem:[%s9710_s19 + $0x30] sm:$0xff]  ;;  %s9711_s1 = sld [smem:[#allocation8_spill]]  ;;  %vm7999_vm4 = vmmov 0  }
  0x29   :  { %7054 = vmatmul.mubr.msk.f32.gmra.mrb[14].mxu0 %vm96_vm1, %v8214_v18  ;;  %v8248_v24 = vld [vmem:[%s9710_s19 + $0x40] sm:$0xff]  ;;  %v8258_v25 = vld [vmem:[%s9710_s19 + $0x50] sm:$0xff]  ;;  %vm4117_vm5 = vcmask 1041409   ;;  %vm4119_vm6 = vcmask 130048   ;;  %vm5470_vm7 = vcmask 261120   ;;  %vm5963_vm8 = vcmask 523264  }
  0x2a   :  { %7058 = vmatprep.mubr.msk.f32.mxu0 %vm96_vm1, %v60_v19  ;;  %v8263_v26 = vld [vmem:[%s9710_s19 + $0x60] sm:$0xff]  ;;  %v8272_v27 = vld [vmem:[%s9710_s19 + $0x70] sm:$0xff]  ;;  %s8002_s0 = smov [#allocation3]   ;;  %vm6126_vm9 = vcmask 9216  }
  0x2b   :  { %v68_v28 = vld [vmem:[%s9710_s19 + $0x90] sm:$0xff]  ;;  %v8283_v29 = vld [vmem:[%s9710_s19 + $0xa0] sm:$0xff] }
  0x2c   :  { %v8288_v30 = vld [vmem:[%s9710_s19 + $0xb0] sm:$0xff]  ;;  %v8297_v31 = vld [vmem:[%s9710_s19 + $0xc0] sm:$0xff] }
  0x2d   :  { %7059 = vmatmul.mubr.msk.f32.vlgmr.msra.gmra.mrb[0].mxu0 %vm96_vm1, %v8225_v20  ;;  %v8302_v32 = vld [vmem:[%s9710_s19 + $0xd0] sm:$0xff]  ;;  %v8311_v33 = vld [vmem:[%s9710_s19 + $0xe0] sm:$0xff] }
  0x2e   :  { %7083 = vmatpush3.msk.msra.mxu0 %vm145_vm0, %v6193_v7  ;;  %7061 = vmatprep.mubr.msk.f32.mxu0 %vm96_vm1, %v8230_v21  ;;  %v8316_v34 = vld [vmem:[%s9710_s19 + $0xf0] sm:$0xff]  ;;  %v8325_v35 = vld [vmem:[%s9710_s19 + $0x100] sm:$0xff] }
  0x2f   :  { %7108 = vmatprep.subr.msk.mxu0 %vm145_vm0, %v6227_v22  ;;  %v490_v36 = vld [vmem:[%s9710_s19 + $0x1] sm:$0xff]  ;;  %v8336_v37 = vld [vmem:[%s9710_s19 + $0x11] sm:$0xff] }
  0x30   :  { %v8341_v38 = vld [vmem:[%s9710_s19 + $0x21] sm:$0xff]  ;;  %v6261_v39 = vld [vmem:[%s9709_s29 + $0x10] sm:$0xf]  ;;  %v6295_v56 = vld [vmem:[%s9709_s29 + $0x14] sm:$0xf] }
  0x31   :  { %7062 = vmatmul.mubr.msk.f32.gmra.mrb[2].mxu0 %vm96_vm1, %v8243_v23  ;;  %v8354_v40 = vld [vmem:[%s9710_s19 + $0x31] sm:$0xff]  ;;  %v8359_v41 = vld [vmem:[%s9710_s19 + $0x41] sm:$0xff] }
  0x32   :  { %7064 = vmatprep.mubr.msk.f32.mxu0 %vm96_vm1, %v8248_v24  ;;  %v8369_v42 = vld [vmem:[%s9710_s19 + $0x51] sm:$0xff]  ;;  %v8374_v43 = vld [vmem:[%s9710_s19 + $0x61] sm:$0xff] }
  0x33   :  { %v8383_v44 = vld [vmem:[%s9710_s19 + $0x71] sm:$0xff]  ;;  %v8394_v46 = vld [vmem:[%s9710_s19 + $0xa1] sm:$0xff] }
  0x34   :  { %v498_v45 = vld [vmem:[%s9710_s19 + $0x91] sm:$0xff]  ;;  %v8408_v48 = vld [vmem:[%s9710_s19 + $0xc1] sm:$0xff] }
  0x35   :  { %7065 = vmatmul.mubr.msk.f32.gmra.mrb[4].mxu0 %vm96_vm1, %v8258_v25  ;;  %v8399_v47 = vld [vmem:[%s9710_s19 + $0xb1] sm:$0xff]  ;;  %v8422_v50 = vld [vmem:[%s9710_s19 + $0xe1] sm:$0xff] }
  0x36   :  { %7067 = vmatprep.mubr.msk.f32.mxu0 %vm96_vm1, %v8263_v26  ;;  %v8413_v49 = vld [vmem:[%s9710_s19 + $0xd1] sm:$0xff]  ;;  %v8436_v52 = vld [vmem:[%s9710_s19 + $0x101] sm:$0xff] }
  0x37   :  { %v8427_v51 = vld [vmem:[%s9710_s19 + $0xf1] sm:$0xff]  ;;  %v6211_v53 = vld [vmem:[%s9710_s19 + $0x240] sm:$0xff] }
  0x38   :  { %v6212_v54 = vld [vmem:[%s9710_s19 + $0x250] sm:$0xff]  ;;  %v6213_v55 = vld [vmem:[%s9710_s19 + $0x260] sm:$0xff] }
  0x39   :  { %7068 = vmatmul.mubr.msk.f32.gmra.mrb[6].mxu0 %vm96_vm1, %v8272_v27  ;;  %v6214_v57 = vld [vmem:[%s9710_s19 + $0x270] sm:$0xff]  ;;  %v6215_v58 = vld [vmem:[%s9710_s19 + $0x280] sm:$0xff] }
  0x3a   :  { %7070 = vmatprep.mubr.msk.f32.mxu0 %vm96_vm1, %v68_v28  ;;  %v6216_v59 = vld [vmem:[%s9710_s19 + $0x290] sm:$0xff]  ;;  %v6217_v60 = vld [vmem:[%s9710_s19 + $0x2a0] sm:$0xff] }
  0x3b   :  { %v6218_v61 = vld [vmem:[%s9710_s19 + $0x2b0] sm:$0xff]  ;;  %v6220_v63 = vld [vmem:[%s9710_s19 + $0x2e0] sm:$0xff] }
  0x3c   :  { %v6219_v62 = vld [vmem:[%s9710_s19 + $0x2d0] sm:$0xff]  ;;  %v6222_v1 = vld [vmem:[%s9710_s19 + $0x300] sm:$0xff] }
  0x3d   :  { %7071 = vmatmul.mubr.msk.f32.gmra.mrb[8].mxu0 %vm96_vm1, %v8283_v29  ;;  %v6221_v0 = vld [vmem:[%s9710_s19 + $0x2f0] sm:$0xff]  ;;  %v6224_v7 = vld [vmem:[%s9710_s19 + $0x320] sm:$0xff] }
  0x3e   :  { %7073 = vmatprep.mubr.msk.f32.mxu0 %vm96_vm1, %v8288_v30  ;;  %v6223_v3 = vld [vmem:[%s9710_s19 + $0x310] sm:$0xff]  ;;  %v6226_v19 = vld [vmem:[%s9710_s19 + $0x340] sm:$0xff] }
  0x3f   :  { %v6225_v11 = vld [vmem:[%s9710_s19 + $0x330] sm:$0xff] }
  0x40   :  { %v6246_v28 = vld [vmem:[%s9710_s19 + $0x370] sm:$0xff] }
  0x41   :  { %7074 = vmatmul.mubr.msk.f32.gmra.mrb[10].mxu0 %vm96_vm1, %v8297_v31 }
  0x42   :  { %7076 = vmatprep.mubr.msk.f32.mxu0 %vm96_vm1, %v8302_v32 }
  0x45   :  { %7077 = vmatmul.mubr.msk.f32.gmra.mrb[12].mxu0 %vm96_vm1, %v8311_v33 }
  0x46   :  { %7079 = vmatprep.mubr.msk.f32.mxu0 %vm96_vm1, %v8316_v34 }
  0x49   :  { %7080 = vmatmul.mubr.msk.f32.gmra.mrb[14].mxu0 %vm96_vm1, %v8325_v35 }
  0x4a   :  { %7084 = vmatprep.mubr.msk.f32.mxu0 %vm96_vm1, %v490_v36  ;;  %v6247_v36 = vld [vmem:[%s9710_s19 + $0x380] sm:$0xff] }
  0x4d   :  { %7085 = vmatmul.mubr.msk.f32.vlgmr.msra.gmra.mrb[0].mxu0 %vm96_vm1, %v8336_v37 }
  0x4e   :  { %7109 = vmatpush3.msk.msra.mxu0 %vm145_vm0, %v6227_v22  ;;  %7087 = vmatprep.mubr.msk.f32.mxu0 %vm96_vm1, %v8341_v38  ;;  %v6245_v22 = vld [vmem:[%s9710_s19 + $0x360] sm:$0xff] }
  0x4f   :  { %7134 = vmatprep.subr.msk.mxu0 %vm145_vm0, %v6261_v39 }
  0x51   :  { %7088 = vmatmul.mubr.msk.f32.gmra.mrb[2].mxu0 %vm96_vm1, %v8354_v40 }
  0x52   :  { %7090 = vmatprep.mubr.msk.f32.mxu0 %vm96_vm1, %v8359_v41 }
  0x55   :  { %7091 = vmatmul.mubr.msk.f32.gmra.mrb[4].mxu0 %vm96_vm1, %v8369_v42 }
  0x56   :  { %7093 = vmatprep.mubr.msk.f32.mxu0 %vm96_vm1, %v8374_v43 }
  0x59   :  { %7094 = vmatmul.mubr.msk.f32.gmra.mrb[6].mxu0 %vm96_vm1, %v8383_v44 }
  0x5a   :  { %7096 = vmatprep.mubr.msk.f32.mxu0 %vm96_vm1, %v498_v45  ;;  %v6248_v45 = vld [vmem:[%s9710_s19 + $0x390] sm:$0xff] }
  0x5d   :  { %7097 = vmatmul.mubr.msk.f32.gmra.mrb[8].mxu0 %vm96_vm1, %v8394_v46 }
  0x5e   :  { %7099 = vmatprep.mubr.msk.f32.mxu0 %vm96_vm1, %v8399_v47 }
  0x61   :  { %7100 = vmatmul.mubr.msk.f32.gmra.mrb[10].mxu0 %vm96_vm1, %v8408_v48 }
  0x62   :  { %7102 = vmatprep.mubr.msk.f32.mxu0 %vm96_vm1, %v8413_v49 }
  0x65   :  { %7103 = vmatmul.mubr.msk.f32.gmra.mrb[12].mxu0 %vm96_vm1, %v8422_v50 }
  0x66   :  { %7105 = vmatprep.mubr.msk.f32.mxu0 %vm96_vm1, %v8427_v51 }
  0x69   :  { %7106 = vmatmul.mubr.msk.f32.gmra.mrb[14].mxu0 %vm96_vm1, %v8436_v52 }
  0x6a   :  { %7110 = vmatprep.mubr.msk.f32.mxu0 %vm96_vm1, %v6211_v53  ;;  %v6249_v53 = vld [vmem:[%s9710_s19 + $0x3a0] sm:$0xff] }
  0x6d   :  { %7111 = vmatmul.mubr.msk.f32.vlgmr.msra.gmra.mrb[0].mxu0 %vm96_vm1, %v6212_v54  ;;  %v6250_v54 = vld [vmem:[%s9710_s19 + $0x3b0] sm:$0xff] }
  0x6e   :  { %7135 = vmatpush3.msk.msra.mxu0 %vm145_vm0, %v6261_v39  ;;  %7113 = vmatprep.mubr.msk.f32.mxu0 %vm96_vm1, %v6213_v55  ;;  %v6329_v39 = vld [vmem:[%s9709_s29 + $0x18] sm:$0xf]  ;;  %v6251_v55 = vld [vmem:[%s9710_s19 + $0x3c0] sm:$0xff] }
  0x6f   :  { %7160 = vmatprep.subr.msk.mxu0 %vm145_vm0, %v6295_v56 }
  0x71   :  { %7114 = vmatmul.mubr.msk.f32.gmra.mrb[2].mxu0 %vm96_vm1, %v6214_v57  ;;  %v6253_v57 = vld [vmem:[%s9710_s19 + $0x3f0] sm:$0xff] }
  0x72   :  { %7116 = vmatprep.mubr.msk.f32.mxu0 %vm96_vm1, %v6215_v58  ;;  %v6254_v58 = vld [vmem:[%s9710_s19 + $0x400] sm:$0xff] }
  0x75   :  { %7117 = vmatmul.mubr.msk.f32.gmra.mrb[4].mxu0 %vm96_vm1, %v6216_v59  ;;  %v6255_v59 = vld [vmem:[%s9710_s19 + $0x410] sm:$0xff] }
  0x76   :  { %7119 = vmatprep.mubr.msk.f32.mxu0 %vm96_vm1, %v6217_v60  ;;  %v6256_v60 = vld [vmem:[%s9710_s19 + $0x420] sm:$0xff] }
  0x79   :  { %7120 = vmatmul.mubr.msk.f32.gmra.mrb[6].mxu0 %vm96_vm1, %v6218_v61  ;;  %v6257_v61 = vld [vmem:[%s9710_s19 + $0x430] sm:$0xff] }
  0x7a   :  { %7122 = vmatprep.mubr.msk.f32.mxu0 %vm96_vm1, %v6219_v62  ;;  %v6258_v62 = vld [vmem:[%s9710_s19 + $0x440] sm:$0xff] }
  0x7d   :  { %7123 = vmatmul.mubr.msk.f32.gmra.mrb[8].mxu0 %vm96_vm1, %v6220_v63  ;;  %v6259_v63 = vld [vmem:[%s9710_s19 + $0x450] sm:$0xff] }
  0x7e   :  { %7125 = vmatprep.mubr.msk.f32.mxu0 %vm96_vm1, %v6221_v0  ;;  %v6260_v0 = vld [vmem:[%s9710_s19 + $0x460] sm:$0xff] }
  0x81   :  { %7126 = vmatmul.mubr.msk.f32.gmra.mrb[10].mxu0 %vm96_vm1, %v6222_v1  ;;  %v6279_v1 = vld [vmem:[%s9710_s19 + $0x241] sm:$0xff] }
  0x82   :  { %7128 = vmatprep.mubr.msk.f32.mxu0 %vm96_vm1, %v6223_v3  ;;  %v6280_v3 = vld [vmem:[%s9710_s19 + $0x251] sm:$0xff] }
  0x85   :  { %7129 = vmatmul.mubr.msk.f32.gmra.mrb[12].mxu0 %vm96_vm1, %v6224_v7  ;;  %v6281_v7 = vld [vmem:[%s9710_s19 + $0x261] sm:$0xff] }
  0x86   :  { %7131 = vmatprep.mubr.msk.f32.mxu0 %vm96_vm1, %v6225_v11  ;;  %v6363_v11 = vld [vmem:[%s9709_s29 + $0x1c] sm:$0xf] }
  0x89   :  { %7132 = vmatmul.mubr.msk.f32.gmra.mrb[14].mxu0 %vm96_vm1, %v6226_v19  ;;  %v6282_v19 = vld [vmem:[%s9710_s19 + $0x271] sm:$0xff] }
  0x8a   :  { %7136 = vmatprep.mubr.msk.f32.mxu0 %vm96_vm1, %v6245_v22  ;;  %v6283_v22 = vld [vmem:[%s9710_s19 + $0x281] sm:$0xff] }
  0x8d   :  { %7137 = vmatmul.mubr.msk.f32.vlgmr.msra.gmra.mrb[0].mxu0 %vm96_vm1, %v6246_v28  ;;  %v6284_v28 = vld [vmem:[%s9710_s19 + $0x291] sm:$0xff] }
  0x8e   :  { %7161 = vmatpush3.msk.msra.mxu0 %vm145_vm0, %v6295_v56  ;;  %7139 = vmatprep.mubr.msk.f32.mxu0 %vm96_vm1, %v6247_v36  ;;  %v6252_v56 = vld [vmem:[%s9710_s19 + $0x3d0] sm:$0xff]  ;;  %v6285_v36 = vld [vmem:[%s9710_s19 + $0x2a1] sm:$0xff] }
  0x8f   :  { %7186 = vmatprep.subr.msk.mxu0 %vm145_vm0, %v6329_v39 }
  0x91   :  { %7140 = vmatmul.mubr.msk.f32.gmra.mrb[2].mxu0 %vm96_vm1, %v6248_v45  ;;  %v6287_v45 = vld [vmem:[%s9710_s19 + $0x2d1] sm:$0xff] }
  0x92   :  { %7142 = vmatprep.mubr.msk.f32.mxu0 %vm96_vm1, %v6249_v53  ;;  %v6288_v53 = vld [vmem:[%s9710_s19 + $0x2e1] sm:$0xff] }
  0x95   :  { %7143 = vmatmul.mubr.msk.f32.gmra.mrb[4].mxu0 %vm96_vm1, %v6250_v54  ;;  %v6289_v54 = vld [vmem:[%s9710_s19 + $0x2f1] sm:$0xff] }
  0x96   :  { %7145 = vmatprep.mubr.msk.f32.mxu0 %vm96_vm1, %v6251_v55  ;;  %v6290_v55 = vld [vmem:[%s9710_s19 + $0x301] sm:$0xff] }
  0x99   :  { %7146 = vmatmul.mubr.msk.f32.gmra.mrb[6].mxu0 %vm96_vm1, %v6252_v56  ;;  %v6291_v56 = vld [vmem:[%s9710_s19 + $0x311] sm:$0xff] }
  0x9a   :  { %7148 = vmatprep.mubr.msk.f32.mxu0 %vm96_vm1, %v6253_v57  ;;  %v6292_v57 = vld [vmem:[%s9710_s19 + $0x321] sm:$0xff] }
  0x9d   :  { %7149 = vmatmul.mubr.msk.f32.gmra.mrb[8].mxu0 %vm96_vm1, %v6254_v58  ;;  %v6293_v58 = vld [vmem:[%s9710_s19 + $0x331] sm:$0xff] }
  0x9e   :  { %7151 = vmatprep.mubr.msk.f32.mxu0 %vm96_vm1, %v6255_v59  ;;  %v6294_v59 = vld [vmem:[%s9710_s19 + $0x341] sm:$0xff] }
  0xa1   :  { %7152 = vmatmul.mubr.msk.f32.gmra.mrb[10].mxu0 %vm96_vm1, %v6256_v60  ;;  %v6397_v60 = vld [vmem:[%s9709_s29 + $0x20] sm:$0xf] }
  0xa2   :  { %7154 = vmatprep.mubr.msk.f32.mxu0 %vm96_vm1, %v6257_v61 }
  0xa5   :  { %7155 = vmatmul.mubr.msk.f32.gmra.mrb[12].mxu0 %vm96_vm1, %v6258_v62 }
  0xa6   :  { %7157 = vmatprep.mubr.msk.f32.mxu0 %vm96_vm1, %v6259_v63 }
  0xa9   :  { %7158 = vmatmul.mubr.msk.f32.gmra.mrb[14].mxu0 %vm96_vm1, %v6260_v0 }
  0xaa   :  { %7162 = vmatprep.mubr.msk.f32.mxu0 %vm96_vm1, %v6279_v1 }
  0xad   :  { %7163 = vmatmul.mubr.msk.f32.vlgmr.msra.gmra.mrb[0].mxu0 %vm96_vm1, %v6280_v3 }
  0xae   :  { %7187 = vmatpush3.msk.msra.mxu0 %vm145_vm0, %v6329_v39  ;;  %7165 = vmatprep.mubr.msk.f32.mxu0 %vm96_vm1, %v6281_v7  ;;  %v6286_v39 = vld [vmem:[%s9710_s19 + $0x2b1] sm:$0xff] }
  0xaf   :  { %7212 = vmatprep.subr.msk.mxu0 %vm145_vm0, %v6363_v11 }
  0xb1   :  { %7166 = vmatmul.mubr.msk.f32.gmra.mrb[2].mxu0 %vm96_vm1, %v6282_v19 }
  0xb2   :  { %7168 = vmatprep.mubr.msk.f32.mxu0 %vm96_vm1, %v6283_v22 }
  0xb5   :  { %7169 = vmatmul.mubr.msk.f32.gmra.mrb[4].mxu0 %vm96_vm1, %v6284_v28 }
  0xb6   :  { %7171 = vmatprep.mubr.msk.f32.mxu0 %vm96_vm1, %v6285_v36 }
  0xb9   :  { %7172 = vmatmul.mubr.msk.f32.gmra.mrb[6].mxu0 %vm96_vm1, %v6286_v39 }
  0xba   :  { %7174 = vmatprep.mubr.msk.f32.mxu0 %vm96_vm1, %v6287_v45 }
  0xbd   :  { %7175 = vmatmul.mubr.msk.f32.gmra.mrb[8].mxu0 %vm96_vm1, %v6288_v53 }
  0xbe   :  { %7177 = vmatprep.mubr.msk.f32.mxu0 %vm96_vm1, %v6289_v54 }
  0xc1   :  { %7178 = vmatmul.mubr.msk.f32.gmra.mrb[10].mxu0 %vm96_vm1, %v6290_v55 }
  0xc2   :  { %7180 = vmatprep.mubr.msk.f32.mxu0 %vm96_vm1, %v6291_v56 }
  0xc5   :  { %7181 = vmatmul.mubr.msk.f32.gmra.mrb[12].mxu0 %vm96_vm1, %v6292_v57 }
  0xc6   :  { %7183 = vmatprep.mubr.msk.f32.mxu0 %vm96_vm1, %v6293_v58 }
  0xc9   :  { %7184 = vmatmul.mubr.msk.f32.gmra.mrb[14].mxu0 %vm96_vm1, %v6294_v59 }
  0xca   :  { %7188 = vmatprep.mubr.msk.f32.mxu0 %vm96_vm1, %v8225_v20  ;;  %v6320_v20 = vld [vmem:[%s9710_s19 + $0x80] sm:$0xff] }
  0xcd   :  { %7189 = vmatmul.mubr.msk.f32.vlgmr.msra.gmra.mrb[0].mxu0 %vm96_vm1, %v8230_v21  ;;  %v6328_v21 = vld [vmem:[%s9710_s19 + $0x110] sm:$0xff] }
  0xce   :  { %7213 = vmatpush3.msk.msra.mxu0 %vm145_vm0, %v6363_v11  ;;  %7191 = vmatprep.mubr.msk.f32.mxu0 %vm96_vm1, %v8243_v23 }
  0xcf   :  { %7238 = vmatprep.subr.msk.mxu0 %vm145_vm0, %v6397_v60 }
  0xd1   :  { %7192 = vmatmul.mubr.msk.f32.gmra.mrb[2].mxu0 %vm96_vm1, %v8248_v24 }
  0xd2   :  { %7194 = vmatprep.mubr.msk.f32.mxu0 %vm96_vm1, %v8258_v25 }
  0xd5   :  { %7195 = vmatmul.mubr.msk.f32.gmra.mrb[4].mxu0 %vm96_vm1, %v8263_v26 }
  0xd6   :  { %7197 = vmatprep.mubr.msk.f32.mxu0 %vm96_vm1, %v8272_v27 }
  0xd9   :  { %7198 = vmatmul.mubr.msk.f32.gmra.mrb[6].mxu0 %vm96_vm1, %v6320_v20 }
  0xda   :  { %7200 = vmatprep.mubr.msk.f32.mxu0 %vm96_vm1, %v8283_v29 }
  0xdd   :  { %7201 = vmatmul.mubr.msk.f32.gmra.mrb[8].mxu0 %vm96_vm1, %v8288_v30 }
  0xde   :  { %7203 = vmatprep.mubr.msk.f32.mxu0 %vm96_vm1, %v8297_v31 }
  0xe1   :  { %7204 = vmatmul.mubr.msk.f32.gmra.mrb[10].mxu0 %vm96_vm1, %v8302_v32 }
  0xe2   :  { %7206 = vmatprep.mubr.msk.f32.mxu0 %vm96_vm1, %v8311_v33 }
  0xe5   :  { %7207 = vmatmul.mubr.msk.f32.gmra.mrb[12].mxu0 %vm96_vm1, %v8316_v34 }
  0xe6   :  { %7209 = vmatprep.mubr.msk.f32.mxu0 %vm96_vm1, %v8325_v35 }
  0xe9   :  { %7210 = vmatmul.mubr.msk.f32.gmra.mrb[14].mxu0 %vm96_vm1, %v6328_v21 }
  0xea   :  { %7214 = vmatprep.mubr.msk.f32.mxu0 %vm96_vm1, %v8107_v2  ;;  %v6354_v2 = vld [vmem:[%s9710_s19 + $0x1a0] sm:$0xff] }
  0xed   :  { %7215 = vmatmul.mubr.msk.f32.vlgmr.msra.gmra.mrb[0].mxu0 %vm96_vm1, %v8117_v4  ;;  %v6362_v4 = vld [vmem:[%s9710_s19 + $0x230] sm:$0xff] }
  0xee   :  { %7239 = vmatpush3.msk.msra.mxu0 %vm145_vm0, %v6397_v60  ;;  %7217 = vmatprep.mubr.msk.f32.mxu0 %vm96_vm1, %v8129_v5  ;;  %v6388_v5 = vld [vmem:[%s9710_s19 + $0x81] sm:$0xff] }
  0xf1   :  { %7218 = vmatmul.mubr.msk.f32.gmra.mrb[2].mxu0 %vm96_vm1, %v8134_v6  ;;  %v6396_v6 = vld [vmem:[%s9710_s19 + $0x111] sm:$0xff]  ;;  %s8000_s19 = smov 64  }
  0xf2   :  { %7220 = vmatprep.mubr.msk.f32.mxu0 %vm96_vm1, %v8147_v8  ;;  %v7997_v8 = vmov 0.0  }
  0xf3   :  { %2149 = vst.msk [vmem:[#allocation2 + $0x20] sm:$0xff] %vm2143_vm2, %v7997_v8  ;;  %2144 = vst.msk [vmem:[#allocation2] sm:$0xff] %vm2143_vm2, %v7997_v8 }
  0xf4   :  { %2150 = vst.msk [vmem:[#allocation2 + $0x28] sm:$0x3] %vm2145_vm3, %v7997_v8  ;;  %2146 = vst.msk [vmem:[#allocation2 + $0x8] sm:$0x3] %vm2145_vm3, %v7997_v8 }
  0xf5   :  { %7221 = vmatmul.mubr.msk.f32.gmra.mrb[4].mxu0 %vm96_vm1, %v8152_v9  ;;  %2147 = vst.msk [vmem:[#allocation2 + $0x10] sm:$0xff] %vm2143_vm2, %v7997_v8  ;;  %2151 = vst.msk [vmem:[#allocation2 + $0x30] sm:$0xff] %vm2143_vm2, %v7997_v8  ;;  %v6416_v9 = vld [vmem:[%s9688_s3 + $0x8] sm:$0xff] }
  0xf6   :  { %7223 = vmatprep.mubr.msk.f32.mxu0 %vm96_vm1, %v8161_v10  ;;  %2148 = vst.msk [vmem:[#allocation2 + $0x18] sm:$0x3] %vm2145_vm3, %v7997_v8  ;;  %2152 = vst.msk [vmem:[#allocation2 + $0x38] sm:$0x3] %vm2145_vm3, %v7997_v8  ;;  %7264 = vmatprep.subr.mxu1 %v6416_v9 }
  0xf7   :  { %2153 = vst.msk [vmem:[#allocation2 + $0x40] sm:$0xff] %vm2143_vm2, %v7997_v8  ;;  %2155 = vst.msk [vmem:[#allocation2 + $0x50] sm:$0xff] %vm2143_vm2, %v7997_v8  ;;  %7265 = vmatpush3.msra.mxu1 %v6416_v9 }
  0xf8   :  { %2154 = vst.msk [vmem:[#allocation2 + $0x48] sm:$0x3] %vm2145_vm3, %v7997_v8  ;;  %2156 = vst.msk [vmem:[#allocation2 + $0x58] sm:$0x3] %vm2145_vm3, %v7997_v8 }
  0xf9   :  { %7224 = vmatmul.mubr.msk.f32.gmra.mrb[6].mxu0 %vm96_vm1, %v6354_v2  ;;  %2157 = vst.msk [vmem:[#allocation2 + $0x60] sm:$0xff] %vm2143_vm2, %v7997_v8  ;;  %2159 = vst.msk [vmem:[#allocation2 + $0x70] sm:$0xff] %vm2143_vm2, %v7997_v8 }
  0xfa   :  { %7226 = vmatprep.mubr.msk.f32.mxu0 %vm96_vm1, %v8172_v12  ;;  %2158 = vst.msk [vmem:[#allocation2 + $0x68] sm:$0x3] %vm2145_vm3, %v7997_v8  ;;  %2160 = vst.msk [vmem:[#allocation2 + $0x78] sm:$0x3] %vm2145_vm3, %v7997_v8  ;;  %v2218_v12 = vld [vmem:[%s9688_s3] sm:$0xff] }
  0xfb   :  { %2161 = vst.msk [vmem:[#allocation2 + $0x80] sm:$0xff] %vm2143_vm2, %v7997_v8  ;;  %2163 = vst.msk [vmem:[#allocation2 + $0x90] sm:$0xff] %vm2143_vm2, %v7997_v8  ;;  %v2219_v10 = vld [vmem:[#allocation2 + $0x1] sm:$0xff]  ;;  %7290 = vmatprep.subr.mxu1 %v2218_v12 }
  0xfc   :  { %2162 = vst.msk [vmem:[#allocation2 + $0x88] sm:$0x3] %vm2145_vm3, %v7997_v8  ;;  %2164 = vst.msk [vmem:[#allocation2 + $0x98] sm:$0x3] %vm2145_vm3, %v7997_v8  ;;  %7266 = vmatprep.mubr.msk.f32.mxu1 %vm2143_vm2, %v2219_v10 }
  0xfd   :  { %7227 = vmatmul.mubr.msk.f32.gmra.mrb[8].mxu0 %vm96_vm1, %v8177_v13  ;;  %2165 = vst.msk [vmem:[#allocation2 + $0xa0] sm:$0xff] %vm2143_vm2, %v7997_v8  ;;  %2167 = vst.msk [vmem:[#allocation2 + $0xb0] sm:$0xff] %vm2143_vm2, %v7997_v8  ;;  %v8851_v13 = vld [vmem:[%s9711_s1] ss:$0 sm:$0xff] }
  0xfe   :  { %7229 = vmatprep.mubr.msk.f32.mxu0 %vm96_vm1, %v8186_v14  ;;  %2166 = vst.msk [vmem:[#allocation2 + $0xa8] sm:$0x3] %vm2145_vm3, %v7997_v8  ;;  %2168 = vst.msk [vmem:[#allocation2 + $0xb8] sm:$0x3] %vm2145_vm3, %v7997_v8 }
  0xff   :  { %2169 = vst.msk [vmem:[#allocation2 + $0xc0] sm:$0xff] %vm2143_vm2, %v7997_v8  ;;  %2171 = vst.msk [vmem:[#allocation2 + $0xd0] sm:$0xff] %vm2143_vm2, %v7997_v8 }
 0x100   :  { %2170 = vst.msk [vmem:[#allocation2 + $0xc8] sm:$0x3] %vm2145_vm3, %v7997_v8  ;;  %2172 = vst.msk [vmem:[#allocation2 + $0xd8] sm:$0x3] %vm2145_vm3, %v7997_v8 }
 0x101   :  { %7230 = vmatmul.mubr.msk.f32.gmra.mrb[10].mxu0 %vm96_vm1, %v8191_v15  ;;  %2173 = vst.msk [vmem:[#allocation2 + $0xe0] sm:$0xff] %vm2143_vm2, %v7997_v8  ;;  %2175 = vst.msk [vmem:[#allocation2 + $0xf0] sm:$0xff] %vm2143_vm2, %v7997_v8 }
 0x102   :  { %7232 = vmatprep.mubr.msk.f32.mxu0 %vm96_vm1, %v8200_v16  ;;  %2174 = vst.msk [vmem:[#allocation2 + $0xe8] sm:$0x3] %vm2145_vm3, %v7997_v8  ;;  %2176 = vst.msk [vmem:[#allocation2 + $0xf8] sm:$0x3] %vm2145_vm3, %v7997_v8 }
 0x103   :  { %2177 = vst.msk [vmem:[#allocation2 + $0x100] sm:$0xff] %vm2143_vm2, %v7997_v8  ;;  %2179 = vst.msk [vmem:[#allocation2 + $0x110] sm:$0xff] %vm2143_vm2, %v7997_v8 }
 0x104   :  { %2178 = vst.msk [vmem:[#allocation2 + $0x108] sm:$0x3] %vm2145_vm3, %v7997_v8  ;;  %2180 = vst.msk [vmem:[#allocation2 + $0x118] sm:$0x3] %vm2145_vm3, %v7997_v8 }
 0x105   :  { %7233 = vmatmul.mubr.msk.f32.gmra.mrb[12].mxu0 %vm96_vm1, %v8205_v17  ;;  %2181 = vst.msk [vmem:[#allocation2 + $0x120] sm:$0xff] %vm2143_vm2, %v7997_v8  ;;  %2183 = vst.msk [vmem:[#allocation2 + $0x130] sm:$0xff] %vm2143_vm2, %v7997_v8  ;;  %v2227_v45 = vld [vmem:[#allocation2 + $0xa1] sm:$0xff] }
 0x106   :  { %7235 = vmatprep.mubr.msk.f32.mxu0 %vm96_vm1, %v8214_v18  ;;  %2182 = vst.msk [vmem:[#allocation2 + $0x128] sm:$0x3] %vm2145_vm3, %v7997_v8  ;;  %2184 = vst.msk [vmem:[#allocation2 + $0x138] sm:$0x3] %vm2145_vm3, %v7997_v8 }
 0x109   :  { %7236 = vmatmul.mubr.msk.f32.gmra.mrb[14].mxu0 %vm96_vm1, %v6362_v4 }
 0x10a   :  { %7240 = vmatprep.mubr.msk.f32.mxu0 %vm96_vm1, %v8336_v37 }
 0x10d   :  { %7241 = vmatmul.mubr.msk.f32.vlgmr.msra.gmra.mrb[0].mxu0 %vm96_vm1, %v8341_v38 }
 0x10e   :  { %7243 = vmatprep.mubr.msk.f32.mxu0 %vm96_vm1, %v8354_v40 }
 0x111   :  { %7244 = vmatmul.mubr.msk.f32.gmra.mrb[2].mxu0 %vm96_vm1, %v8359_v41 }
 0x112   :  { %7246 = vmatprep.mubr.msk.f32.mxu0 %vm96_vm1, %v8369_v42 }
 0x115   :  { %7247 = vmatmul.mubr.msk.f32.gmra.mrb[4].mxu0 %vm96_vm1, %v8374_v43  ;;  %v8870_v43 = vld [vmem:[%s9688_s3 + $0x10] sm:$0xff] }
 0x116   :  { %7249 = vmatprep.mubr.msk.f32.mxu0 %vm96_vm1, %v8383_v44 }
 0x119   :  { %7250 = vmatmul.mubr.msk.f32.gmra.mrb[6].mxu0 %vm96_vm1, %v6388_v5 }
 0x11a   :  { %7252 = vmatprep.mubr.msk.f32.mxu0 %vm96_vm1, %v8394_v46 }
 0x11d   :  { %7253 = vmatmul.mubr.msk.f32.gmra.mrb[8].mxu0 %vm96_vm1, %v8399_v47 }
 0x11e   :  { %7255 = vmatprep.mubr.msk.f32.mxu0 %vm96_vm1, %v8408_v48 }
 0x121   :  { %7256 = vmatmul.mubr.msk.f32.gmra.mrb[10].mxu0 %vm96_vm1, %v8413_v49 }
 0x122   :  { %7258 = vmatprep.mubr.msk.f32.mxu0 %vm96_vm1, %v8422_v50 }
 0x125   :  { %7259 = vmatmul.mubr.msk.f32.gmra.mrb[12].mxu0 %vm96_vm1, %v8427_v51 }
 0x126   :  { %7261 = vmatprep.mubr.msk.f32.mxu0 %vm96_vm1, %v8436_v52 }
 0x129   :  { %7262 = vmatmul.mubr.msk.f32.gmra.mrb[14].mxu0 %vm96_vm1, %v6396_v6 }
 0x12a   :  { %7502 = vmatprep.mubr.msk.f32.mxu0 %vm7999_vm4, %v7997_v8 }
 0x1e0   :  { %v7242_v14 = vpop.f32.mrb[0].mxu0 }
 0x1e1   :  { %v2112_v15 = vadd.f32 %v7242_v14, %v8851_v13  ;;  %v2009_v16 = vpop.f32.mrb[1].mxu0  ;;  %v2202_v14 = vld [vmem:[#allocation2] sm:$0xff] }
 0x1e2   :  { %v2111_v17 = vadd.f32 %v8851_v13, %v2009_v16 }
 0x1e3   :  { %v2128_v18 = vmax.f32 %v2112_v15, 0.0 }
 0x1e4   :  { %v2127_v23 = vmax.f32 %v2111_v17, 0.0  ;;  %v7245_v24 = vpop.f32.mrb[2].mxu0  ;;  %v6466_v17 = vld [vmem:[%s9688_s3 + $0x18] sm:$0xff] }
 0x1e5   :  { %2187 = vst.msk [vmem:[#allocation2 + $0x21] sm:$0xff] %vm2143_vm2, %v2128_v18  ;;  %v2114_v25 = vadd.f32 %v7245_v24, %v8851_v13  ;;  %v2019_v26 = vpop.f32.mrb[3].mxu0 }
 0x1e6   :  { %2186 = vst.msk [vmem:[#allocation2 + $0x11] sm:$0xff] %vm2143_vm2, %v2127_v23  ;;  %v2113_v27 = vadd.f32 %v8851_v13, %v2019_v26 }
 0x1e7   :  { %v2130_v29 = vmax.f32 %v2114_v25, 0.0 }
 0x1e8   :  { %v2129_v30 = vmax.f32 %v2113_v27, 0.0  ;;  %v7248_v31 = vpop.f32.mrb[4].mxu0  ;;  %v2210_v27 = vld [vmem:[#allocation2 + $0xa0] sm:$0xff] }
 0x1e9   :  { %2189 = vst.msk [vmem:[#allocation2 + $0x41] sm:$0xff] %vm2143_vm2, %v2130_v29  ;;  %v2116_v32 = vadd.f32 %v7248_v31, %v8851_v13  ;;  %v2029_v33 = vpop.f32.mrb[5].mxu0 }
 0x1ea   :  { %2188 = vst.msk [vmem:[#allocation2 + $0x31] sm:$0xff] %vm2143_vm2, %v2129_v30  ;;  %v2115_v34 = vadd.f32 %v8851_v13, %v2029_v33 }
 0x1eb   :  { %v2132_v35 = vmax.f32 %v2116_v32, 0.0 }
 0x1ec   :  { %v2131_v37 = vmax.f32 %v2115_v34, 0.0  ;;  %v7251_v38 = vpop.f32.mrb[6].mxu0  ;;  %v8876_v46 = vld [vmem:[#allocation2 + $0x21] sm:$0xff] }
 0x1ed   :  { %2191 = vst.msk [vmem:[#allocation2 + $0x61] sm:$0xff] %vm2143_vm2, %v2132_v35  ;;  %v2118_v40 = vadd.f32 %v7251_v38, %v8851_v13  ;;  %v2039_v41 = vpop.f32.mrb[7].mxu0  ;;  %v8865_v42 = vld [vmem:[#allocation2 + $0x11] sm:$0xff]  ;;  %v8956_v18 = vld [vmem:[#allocation2 + $0x20] sm:$0xff] }
 0x1ee   :  { %2190 = vst.msk [vmem:[#allocation2 + $0x51] sm:$0xff] %vm2143_vm2, %v2131_v37  ;;  %v2117_v44 = vadd.f32 %v8851_v13, %v2039_v41  ;;  %7267 = vmatmul.mubr.msk.f32.vlgmr.msra.gmra.mrb[0].mxu1 %vm2143_vm2, %v8865_v42  ;;  %v8949_v16 = vld [vmem:[#allocation2 + $0x10] sm:$0xff]  ;;  %v2607_v37 = vld [vmem:[#allocation2 + $0x2] sm:$0xff] }
 0x1ef   :  { %v2134_v47 = vmax.f32 %v2118_v40, 0.0  ;;  %7269 = vmatprep.mubr.msk.f32.mxu1 %vm2143_vm2, %v8876_v46  ;;  %7291 = vmatpush3.msra.mxu1 %v2218_v12  ;;  %v9008_v40 = vld [vmem:[#allocation2 + $0x12] sm:$0xff]  ;;  %v6483_v41 = vld [vmem:[%s9688_s3 + $0x20] sm:$0xff] }
 0x1f0   :  { %v2133_v48 = vmax.f32 %v2117_v44, 0.0  ;;  %v7254_v49 = vpop.f32.mrb[8].mxu0  ;;  %7316 = vmatprep.subr.mxu1 %v8870_v43  ;;  %v8889_v62 = vld [vmem:[#allocation2 + $0x41] sm:$0xff] }
 0x1f1   :  { %2193 = vst.msk [vmem:[#allocation2 + $0x81] sm:$0xff] %vm2143_vm2, %v2134_v47  ;;  %v2120_v50 = vadd.f32 %v7254_v49, %v8851_v13  ;;  %v2049_v51 = vpop.f32.mrb[9].mxu0  ;;  %v8883_v52 = vld [vmem:[#allocation2 + $0x31] sm:$0xff]  ;;  %v8965_v24 = vld [vmem:[#allocation2 + $0x40] sm:$0xff] }
 0x1f2   :  { %2192 = vst.msk [vmem:[#allocation2 + $0x71] sm:$0xff] %vm2143_vm2, %v2133_v48  ;;  %v2119_v61 = vadd.f32 %v8851_v13, %v2049_v51  ;;  %7270 = vmatmul.mubr.msk.f32.gmra.mrb[2].mxu1 %vm2143_vm2, %v8883_v52  ;;  %v8961_v23 = vld [vmem:[#allocation2 + $0x30] sm:$0xff]  ;;  %v9023_v47 = vld [vmem:[#allocation2 + $0x42] sm:$0xff] }
 0x1f3   :  { %v2136_v63 = vmax.f32 %v2120_v50, 0.0  ;;  %7272 = vmatprep.mubr.msk.f32.mxu1 %vm2143_vm2, %v8889_v62  ;;  %v9019_v44 = vld [vmem:[#allocation2 + $0x32] sm:$0xff]  ;;  %v2615_v50 = vld [vmem:[#allocation2 + $0xa2] sm:$0xff] }
 0x1f4   :  { %v2135_v0 = vmax.f32 %v2119_v61, 0.0  ;;  %v7257_v1 = vpop.f32.mrb[10].mxu0  ;;  %v8901_v22 = vld [vmem:[#allocation2 + $0x61] sm:$0xff] }
 0x1f5   :  { %2195 = vst.msk [vmem:[#allocation2 + $0xc1] sm:$0xff] %vm2143_vm2, %v2136_v63  ;;  %v2122_v3 = vadd.f32 %v7257_v1, %v8851_v13  ;;  %v2059_v7 = vpop.f32.mrb[11].mxu0  ;;  %v8895_v11 = vld [vmem:[#allocation2 + $0x51] sm:$0xff]  ;;  %v8973_v26 = vld [vmem:[#allocation2 + $0x60] sm:$0xff] }
 0x1f6   :  { %2194 = vst.msk [vmem:[#allocation2 + $0xb1] sm:$0xff] %vm2143_vm2, %v2135_v0  ;;  %v2121_v19 = vadd.f32 %v8851_v13, %v2059_v7  ;;  %7273 = vmatmul.mubr.msk.f32.gmra.mrb[4].mxu1 %vm2143_vm2, %v8895_v11  ;;  %v8969_v25 = vld [vmem:[#allocation2 + $0x50] sm:$0xff]  ;;  %v9031_v49 = vld [vmem:[#allocation2 + $0x62] sm:$0xff] }
 0x1f7   :  { %v2138_v28 = vmax.f32 %v2122_v3, 0.0  ;;  %7275 = vmatprep.mubr.msk.f32.mxu1 %vm2143_vm2, %v8901_v22  ;;  %v9027_v48 = vld [vmem:[#allocation2 + $0x52] sm:$0xff] }
 0x1f8   :  { %v2137_v36 = vmax.f32 %v2121_v19, 0.0  ;;  %v7260_v39 = vpop.f32.mrb[12].mxu0 }
 0x1f9   :  { %2197 = vst.msk [vmem:[#allocation2 + $0xe1] sm:$0xff] %vm2143_vm2, %v2138_v28  ;;  %v2124_v53 = vadd.f32 %v7260_v39, %v8851_v13  ;;  %v2069_v54 = vpop.f32.mrb[13].mxu0  ;;  %v8907_v55 = vld [vmem:[#allocation2 + $0x71] sm:$0xff]  ;;  %v6500_v28 = vld [vmem:[%s9688_s3 + $0x28] sm:$0xff] }
 0x1fa   :  { %2196 = vst.msk [vmem:[#allocation2 + $0xd1] sm:$0xff] %vm2143_vm2, %v2137_v36  ;;  %v2123_v56 = vadd.f32 %v8851_v13, %v2069_v54  ;;  %7276 = vmatmul.mubr.msk.f32.gmra.mrb[6].mxu1 %vm2143_vm2, %v8907_v55  ;;  %v8977_v29 = vld [vmem:[#allocation2 + $0x70] sm:$0xff]  ;;  %v2825_v36 = vld [vmem:[#allocation2 + $0x80] sm:$0xff]  ;;  %v6534_v54 = vld [vmem:[%s9688_s3 + $0x38] sm:$0xff] }
 0x1fb   :  { %v2140_v57 = vmax.f32 %v2124_v53, 0.0  ;;  %7278 = vmatprep.mubr.msk.f32.mxu1 %vm2143_vm2, %v2227_v45  ;;  %v9035_v51 = vld [vmem:[#allocation2 + $0x72] sm:$0xff] }
 0x1fc   :  { %v2139_v58 = vmax.f32 %v2123_v56, 0.0  ;;  %v7263_v59 = vpop.f32.mrb[14].mxu0  ;;  %v8922_v4 = vld [vmem:[#allocation2 + $0xc1] sm:$0xff]  ;;  %v6517_v45 = vld [vmem:[%s9688_s3 + $0x30] sm:$0xff] }
 0x1fd   :  { %2199 = vst.msk [vmem:[#allocation2 + $0x101] sm:$0xff] %vm2143_vm2, %v2140_v57  ;;  %v2126_v60 = vadd.f32 %v7263_v59, %v8851_v13  ;;  %v2079_v20 = vpop.f32.mrb[15].mxu0  ;;  %v8916_v21 = vld [vmem:[#allocation2 + $0xb1] sm:$0xff]  ;;  %v8983_v31 = vld [vmem:[#allocation2 + $0xc0] sm:$0xff] }
 0x1fe   :  { %2198 = vst.msk [vmem:[#allocation2 + $0xf1] sm:$0xff] %vm2143_vm2, %v2139_v58  ;;  %v2125_v2 = vadd.f32 %v8851_v13, %v2079_v20  ;;  %7279 = vmatmul.mubr.msk.f32.gmra.mrb[8].mxu1 %vm2143_vm2, %v8916_v21  ;;  %v2211_v30 = vld [vmem:[#allocation2 + $0xb0] sm:$0xff]  ;;  %v9044_v63 = vld [vmem:[#allocation2 + $0xc2] sm:$0xff] }
 0x1ff   :  { %v2142_v5 = vmax.f32 %v2126_v60, 0.0  ;;  %7281 = vmatprep.mubr.msk.f32.mxu1 %vm2143_vm2, %v8922_v4  ;;  %v9040_v61 = vld [vmem:[#allocation2 + $0xb2] sm:$0xff]  ;;  %v9159_v56 = vld [vmem:[#allocation2 + $0x82] sm:$0xff] }
 0x200   :  { %v2141_v6 = vmax.f32 %v2125_v2, 0.0  ;;  %v8932_v10 = vld [vmem:[#allocation2 + $0xe1] sm:$0xff]  ;;  %v3459_v59 = vld [vmem:[#allocation2 + $0x90] sm:$0xff] }
 0x201   :  { %2201 = vst.msk [vmem:[#allocation2 + $0x121] sm:$0xff] %vm2143_vm2, %v2142_v5  ;;  %v8927_v9 = vld [vmem:[#allocation2 + $0xd1] sm:$0xff]  ;;  %v8991_v33 = vld [vmem:[#allocation2 + $0xe0] sm:$0xff] }
 0x202   :  { %2200 = vst.msk [vmem:[#allocation2 + $0x111] sm:$0xff] %vm2143_vm2, %v2141_v6  ;;  %7282 = vmatmul.mubr.msk.f32.gmra.mrb[10].mxu1 %vm2143_vm2, %v8927_v9  ;;  %v8987_v32 = vld [vmem:[#allocation2 + $0xd0] sm:$0xff]  ;;  %v9052_v1 = vld [vmem:[#allocation2 + $0xe2] sm:$0xff] }
 0x203   :  { %7284 = vmatprep.mubr.msk.f32.mxu1 %vm2143_vm2, %v8932_v10  ;;  %v9048_v0 = vld [vmem:[#allocation2 + $0xd2] sm:$0xff]  ;;  %v6551_v58 = vld [vmem:[%s9688_s3 + $0x40] sm:$0xff] }
 0x204   :  { %v8940_v13 = vld [vmem:[#allocation2 + $0x101] sm:$0xff]  ;;  %v3467_v5 = vld [vmem:[#allocation2 + $0x130] sm:$0xff] }
 0x205   :  { %v8936_v12 = vld [vmem:[#allocation2 + $0xf1] sm:$0xff]  ;;  %v8999_v35 = vld [vmem:[#allocation2 + $0x100] sm:$0xff] }
 0x206   :  { %7285 = vmatmul.mubr.msk.f32.gmra.mrb[12].mxu1 %vm2143_vm2, %v8936_v12  ;;  %v8995_v34 = vld [vmem:[#allocation2 + $0xf0] sm:$0xff]  ;;  %v9060_v7 = vld [vmem:[#allocation2 + $0x102] sm:$0xff] }
 0x207   :  { %7287 = vmatprep.mubr.msk.f32.mxu1 %vm2143_vm2, %v8940_v13  ;;  %v9056_v3 = vld [vmem:[#allocation2 + $0xf2] sm:$0xff] }
 0x208   :  { %v9099_v39 = vld [vmem:[#allocation2 + $0x120] sm:$0xff] }
 0x209   :  { %v8944_v15 = vld [vmem:[#allocation2 + $0x111] sm:$0xff]  ;;  %v9138_v53 = vld [vmem:[#allocation2 + $0x121] sm:$0xff] }
 0x20a   :  { %7288 = vmatmul.mubr.msk.f32.gmra.mrb[14].mxu1 %vm2143_vm2, %v8944_v15  ;;  %v9003_v38 = vld [vmem:[#allocation2 + $0x110] sm:$0xff]  ;;  %v9177_v57 = vld [vmem:[#allocation2 + $0x122] sm:$0xff] }
 0x20b   :  { %7292 = vmatprep.mubr.msk.f32.mxu1 %vm2143_vm2, %v2202_v14  ;;  %v9064_v19 = vld [vmem:[#allocation2 + $0x112] sm:$0xff] }
 0x20e   :  { %7293 = vmatmul.mubr.msk.f32.vlgmr.msra.gmra.mrb[16].mxu1 %vm2143_vm2, %v8949_v16 }
 0x20f   :  { %7295 = vmatprep.mubr.msk.f32.mxu1 %vm2143_vm2, %v8956_v18  ;;  %7317 = vmatpush3.msra.mxu1 %v8870_v43  ;;  %v9015_v43 = vld [vmem:[#allocation2 + $0x22] sm:$0xff] }
 0x210   :  { %7342 = vmatprep.subr.mxu1 %v6466_v17 }
 0x212   :  { %7296 = vmatmul.mubr.msk.f32.gmra.mrb[18].mxu1 %vm2143_vm2, %v8961_v23 }
 0x213   :  { %7298 = vmatprep.mubr.msk.f32.mxu1 %vm2143_vm2, %v8965_v24 }
 0x216   :  { %7299 = vmatmul.mubr.msk.f32.gmra.mrb[20].mxu1 %vm2143_vm2, %v8969_v25 }
 0x217   :  { %7301 = vmatprep.mubr.msk.f32.mxu1 %vm2143_vm2, %v8973_v26 }
 0x21a   :  { %7302 = vmatmul.mubr.msk.f32.gmra.mrb[22].mxu1 %vm2143_vm2, %v8977_v29 }
 0x21b   :  { %7304 = vmatprep.mubr.msk.f32.mxu1 %vm2143_vm2, %v2210_v27 }
 0x21e   :  { %7305 = vmatmul.mubr.msk.f32.gmra.mrb[24].mxu1 %vm2143_vm2, %v2211_v30 }
 0x21f   :  { %7307 = vmatprep.mubr.msk.f32.mxu1 %vm2143_vm2, %v8983_v31 }
 0x222   :  { %7308 = vmatmul.mubr.msk.f32.gmra.mrb[26].mxu1 %vm2143_vm2, %v8987_v32 }
 0x223   :  { %7310 = vmatprep.mubr.msk.f32.mxu1 %vm2143_vm2, %v8991_v33 }
 0x226   :  { %7311 = vmatmul.mubr.msk.f32.gmra.mrb[28].mxu1 %vm2143_vm2, %v8995_v34 }
 0x227   :  { %7313 = vmatprep.mubr.msk.f32.mxu1 %vm2143_vm2, %v8999_v35 }
 0x22a   :  { %7314 = vmatmul.mubr.msk.f32.gmra.mrb[30].mxu1 %vm2143_vm2, %v9003_v38 }
 0x22b   :  { %7318 = vmatprep.mubr.msk.f32.mxu1 %vm2143_vm2, %v2607_v37 }
 0x22e   :  { %7319 = vmatmul.mubr.msk.f32.vlgmr.msra.gmra.mrb[32].mxu1 %vm2143_vm2, %v9008_v40 }
 0x22f   :  { %7321 = vmatprep.mubr.msk.f32.mxu1 %vm2143_vm2, %v9015_v43  ;;  %7343 = vmatpush3.msra.mxu1 %v6466_v17 }
 0x230   :  { %7368 = vmatprep.subr.mxu1 %v6483_v41 }
 0x232   :  { %7322 = vmatmul.mubr.msk.f32.gmra.mrb[34].mxu1 %vm2143_vm2, %v9019_v44 }
 0x233   :  { %7324 = vmatprep.mubr.msk.f32.mxu1 %vm2143_vm2, %v9023_v47 }
 0x236   :  { %7325 = vmatmul.mubr.msk.f32.gmra.mrb[36].mxu1 %vm2143_vm2, %v9027_v48 }
 0x237   :  { %7327 = vmatprep.mubr.msk.f32.mxu1 %vm2143_vm2, %v9031_v49 }
 0x23a   :  { %7328 = vmatmul.mubr.msk.f32.gmra.mrb[38].mxu1 %vm2143_vm2, %v9035_v51 }
 0x23b   :  { %7330 = vmatprep.mubr.msk.f32.mxu1 %vm2143_vm2, %v2615_v50 }
 0x23e   :  { %7331 = vmatmul.mubr.msk.f32.gmra.mrb[40].mxu1 %vm2143_vm2, %v9040_v61 }
 0x23f   :  { %7333 = vmatprep.mubr.msk.f32.mxu1 %vm2143_vm2, %v9044_v63 }
 0x242   :  { %7334 = vmatmul.mubr.msk.f32.gmra.mrb[42].mxu1 %vm2143_vm2, %v9048_v0 }
 0x243   :  { %7336 = vmatprep.mubr.msk.f32.mxu1 %vm2143_vm2, %v9052_v1 }
 0x246   :  { %7337 = vmatmul.mubr.msk.f32.gmra.mrb[44].mxu1 %vm2143_vm2, %v9056_v3 }
 0x247   :  { %7339 = vmatprep.mubr.msk.f32.mxu1 %vm2143_vm2, %v9060_v7 }
 0x24a   :  { %7340 = vmatmul.mubr.msk.f32.gmra.mrb[46].mxu1 %vm2143_vm2, %v9064_v19 }
 0x24b   :  { %7344 = vmatprep.mubr.msk.f32.mxu1 %vm2143_vm2, %v8949_v16 }
 0x24e   :  { %7345 = vmatmul.mubr.msk.f32.vlgmr.msra.gmra.mrb[48].mxu1 %vm2143_vm2, %v8956_v18 }
 0x24f   :  { %7347 = vmatprep.mubr.msk.f32.mxu1 %vm2143_vm2, %v8961_v23  ;;  %7369 = vmatpush3.msra.mxu1 %v6483_v41  ;;  %v3881_v41 = vld [vmem:[#allocation2 + $0x92] sm:$0xff] }
 0x250   :  { %7394 = vmatprep.subr.mxu1 %v6500_v28 }
 0x252   :  { %7348 = vmatmul.mubr.msk.f32.gmra.mrb[50].mxu1 %vm2143_vm2, %v8965_v24 }
 0x253   :  { %7350 = vmatprep.mubr.msk.f32.mxu1 %vm2143_vm2, %v8969_v25 }
 0x256   :  { %7351 = vmatmul.mubr.msk.f32.gmra.mrb[52].mxu1 %vm2143_vm2, %v8973_v26 }
 0x257   :  { %7353 = vmatprep.mubr.msk.f32.mxu1 %vm2143_vm2, %v8977_v29 }
 0x25a   :  { %7354 = vmatmul.mubr.msk.f32.gmra.mrb[54].mxu1 %vm2143_vm2, %v2825_v36 }
 0x25b   :  { %7356 = vmatprep.mubr.msk.f32.mxu1 %vm2143_vm2, %v2211_v30 }
 0x25e   :  { %7357 = vmatmul.mubr.msk.f32.gmra.mrb[56].mxu1 %vm2143_vm2, %v8983_v31 }
 0x25f   :  { %7359 = vmatprep.mubr.msk.f32.mxu1 %vm2143_vm2, %v8987_v32 }
 0x262   :  { %7360 = vmatmul.mubr.msk.f32.gmra.mrb[58].mxu1 %vm2143_vm2, %v8991_v33 }
 0x263   :  { %7362 = vmatprep.mubr.msk.f32.mxu1 %vm2143_vm2, %v8995_v34 }
 0x266   :  { %7363 = vmatmul.mubr.msk.f32.gmra.mrb[60].mxu1 %vm2143_vm2, %v8999_v35 }
 0x267   :  { %7365 = vmatprep.mubr.msk.f32.mxu1 %vm2143_vm2, %v9003_v38 }
 0x26a   :  { %7366 = vmatmul.mubr.msk.f32.gmra.mrb[62].mxu1 %vm2143_vm2, %v9099_v39 }
 0x26b   :  { %7370 = vmatprep.mubr.msk.f32.mxu1 %vm2143_vm2, %v8865_v42  ;;  %v9120_v42 = vld [vmem:[#allocation2 + $0x81] sm:$0xff] }
 0x26e   :  { %7371 = vmatmul.mubr.msk.f32.vlgmr.msra.gmra.mrb[64].mxu1 %vm2143_vm2, %v8876_v46 }
 0x26f   :  { %7373 = vmatprep.mubr.msk.f32.mxu1 %vm2143_vm2, %v8883_v52  ;;  %7395 = vmatpush3.msra.mxu1 %v6500_v28 }
 0x270   :  { %7420 = vmatprep.subr.mxu1 %v6517_v45 }
 0x272   :  { %7374 = vmatmul.mubr.msk.f32.gmra.mrb[66].mxu1 %vm2143_vm2, %v8889_v62 }
 0x273   :  { %7376 = vmatprep.mubr.msk.f32.mxu1 %vm2143_vm2, %v8895_v11 }
 0x276   :  { %7377 = vmatmul.mubr.msk.f32.gmra.mrb[68].mxu1 %vm2143_vm2, %v8901_v22 }
 0x277   :  { %7379 = vmatprep.mubr.msk.f32.mxu1 %vm2143_vm2, %v8907_v55 }
 0x27a   :  { %7380 = vmatmul.mubr.msk.f32.gmra.mrb[70].mxu1 %vm2143_vm2, %v9120_v42 }
 0x27b   :  { %7382 = vmatprep.mubr.msk.f32.mxu1 %vm2143_vm2, %v8916_v21 }
 0x27e   :  { %7383 = vmatmul.mubr.msk.f32.gmra.mrb[72].mxu1 %vm2143_vm2, %v8922_v4 }
 0x27f   :  { %7385 = vmatprep.mubr.msk.f32.mxu1 %vm2143_vm2, %v8927_v9 }
 0x282   :  { %7386 = vmatmul.mubr.msk.f32.gmra.mrb[74].mxu1 %vm2143_vm2, %v8932_v10 }
 0x283   :  { %7388 = vmatprep.mubr.msk.f32.mxu1 %vm2143_vm2, %v8936_v12 }
 0x286   :  { %7389 = vmatmul.mubr.msk.f32.gmra.mrb[76].mxu1 %vm2143_vm2, %v8940_v13 }
 0x287   :  { %7391 = vmatprep.mubr.msk.f32.mxu1 %vm2143_vm2, %v8944_v15 }
 0x28a   :  { %7392 = vmatmul.mubr.msk.f32.gmra.mrb[78].mxu1 %vm2143_vm2, %v9138_v53 }
 0x28b   :  { %7396 = vmatprep.mubr.msk.f32.mxu1 %vm2143_vm2, %v9008_v40 }
 0x28e   :  { %7397 = vmatmul.mubr.msk.f32.vlgmr.msra.gmra.mrb[80].mxu1 %vm2143_vm2, %v9015_v43 }
 0x28f   :  { %7399 = vmatprep.mubr.msk.f32.mxu1 %vm2143_vm2, %v9019_v44  ;;  %7421 = vmatpush3.msra.mxu1 %v6517_v45 }
 0x290   :  { %7446 = vmatprep.subr.mxu1 %v6534_v54 }
 0x292   :  { %7400 = vmatmul.mubr.msk.f32.gmra.mrb[82].mxu1 %vm2143_vm2, %v9023_v47 }
 0x293   :  { %7402 = vmatprep.mubr.msk.f32.mxu1 %vm2143_vm2, %v9027_v48 }
 0x296   :  { %7403 = vmatmul.mubr.msk.f32.gmra.mrb[84].mxu1 %vm2143_vm2, %v9031_v49 }
 0x297   :  { %7405 = vmatprep.mubr.msk.f32.mxu1 %vm2143_vm2, %v9035_v51 }
 0x29a   :  { %7406 = vmatmul.mubr.msk.f32.gmra.mrb[86].mxu1 %vm2143_vm2, %v9159_v56 }
 0x29b   :  { %7408 = vmatprep.mubr.msk.f32.mxu1 %vm2143_vm2, %v9040_v61 }
 0x29e   :  { %7409 = vmatmul.mubr.msk.f32.gmra.mrb[88].mxu1 %vm2143_vm2, %v9044_v63 }
 0x29f   :  { %7411 = vmatprep.mubr.msk.f32.mxu1 %vm2143_vm2, %v9048_v0 }
 0x2a2   :  { %7412 = vmatmul.mubr.msk.f32.gmra.mrb[90].mxu1 %vm2143_vm2, %v9052_v1 }
 0x2a3   :  { %7414 = vmatprep.mubr.msk.f32.mxu1 %vm2143_vm2, %v9056_v3 }
 0x2a6   :  { %7415 = vmatmul.mubr.msk.f32.gmra.mrb[92].mxu1 %vm2143_vm2, %v9060_v7 }
 0x2a7   :  { %7417 = vmatprep.mubr.msk.f32.mxu1 %vm2143_vm2, %v9064_v19 }
 0x2aa   :  { %7418 = vmatmul.mubr.msk.f32.gmra.mrb[94].mxu1 %vm2143_vm2, %v9177_v57 }
 0x2ab   :  { %7422 = vmatprep.mubr.msk.f32.mxu1 %vm2143_vm2, %v8956_v18 }
 0x2ae   :  { %7423 = vmatmul.mubr.msk.f32.vlgmr.msra.gmra.mrb[96].mxu1 %vm2143_vm2, %v8961_v23 }
 0x2af   :  { %7425 = vmatprep.mubr.msk.f32.mxu1 %vm2143_vm2, %v8965_v24  ;;  %7447 = vmatpush3.msra.mxu1 %v6534_v54 }
 0x2b0   :  { %7472 = vmatprep.subr.mxu1 %v6551_v58 }
 0x2b2   :  { %7426 = vmatmul.mubr.msk.f32.gmra.mrb[98].mxu1 %vm2143_vm2, %v8969_v25 }
 0x2b3   :  { %7428 = vmatprep.mubr.msk.f32.mxu1 %vm2143_vm2, %v8973_v26 }
 0x2b6   :  { %7429 = vmatmul.mubr.msk.f32.gmra.mrb[100].mxu1 %vm2143_vm2, %v8977_v29 }
 0x2b7   :  { %7431 = vmatprep.mubr.msk.f32.mxu1 %vm2143_vm2, %v2825_v36 }
 0x2ba   :  { %7432 = vmatmul.mubr.msk.f32.gmra.mrb[102].mxu1 %vm2143_vm2, %v3459_v59 }
 0x2bb   :  { %7434 = vmatprep.mubr.msk.f32.mxu1 %vm2143_vm2, %v8983_v31 }
 0x2be   :  { %7435 = vmatmul.mubr.msk.f32.gmra.mrb[104].mxu1 %vm2143_vm2, %v8987_v32 }
 0x2bf   :  { %7437 = vmatprep.mubr.msk.f32.mxu1 %vm2143_vm2, %v8991_v33 }
 0x2c1   :  { %v7268_v60 = vpop.f32.mrb[0].mxu1 }
 0x2c2   :  { %v2351_v20 = vpop.f32.mrb[1].mxu1  ;;  %7438 = vmatmul.mubr.msk.f32.gmra.mrb[106].mxu1 %vm2143_vm2, %v8995_v34 }
 0x2c3   :  { %7440 = vmatprep.mubr.msk.f32.mxu1 %vm2143_vm2, %v8999_v35 }
 0x2c5   :  { %v7271_v21 = vpop.f32.mrb[2].mxu1 }
 0x2c6   :  { %v2360_v2 = vpop.f32.mrb[3].mxu1  ;;  %7441 = vmatmul.mubr.msk.f32.gmra.mrb[108].mxu1 %vm2143_vm2, %v9003_v38 }
 0x2c7   :  { %7443 = vmatprep.mubr.msk.f32.mxu1 %vm2143_vm2, %v9099_v39 }
 0x2c9   :  { %v7274_v6 = vpop.f32.mrb[4].mxu1 }
 0x2ca   :  { %v2369_v14 = vpop.f32.mrb[5].mxu1  ;;  %7444 = vmatmul.mubr.msk.f32.gmra.mrb[110].mxu1 %vm2143_vm2, %v3467_v5 }
 0x2cb   :  { %7448 = vmatprep.mubr.msk.f32.mxu1 %vm2143_vm2, %v8876_v46  ;;  %v3670_v46 = vld [vmem:[#allocation2 + $0x91] sm:$0xff] }
 0x2cd   :  { %v7277_v16 = vpop.f32.mrb[6].mxu1 }
 0x2ce   :  { %v2378_v17 = vpop.f32.mrb[7].mxu1  ;;  %7449 = vmatmul.mubr.msk.f32.vlgmr.msra.gmra.mrb[112].mxu1 %vm2143_vm2, %v8883_v52 }
 0x2cf   :  { %7451 = vmatprep.mubr.msk.f32.mxu1 %vm2143_vm2, %v8889_v62  ;;  %7473 = vmatpush3.msra.mxu1 %v6551_v58 }
 0x2d1   :  { %v7280_v18 = vpop.f32.mrb[8].mxu1 }
 0x2d2   :  { %v2387_v23 = vpop.f32.mrb[9].mxu1  ;;  %7452 = vmatmul.mubr.msk.f32.gmra.mrb[114].mxu1 %vm2143_vm2, %v8895_v11 }
 0x2d3   :  { %7454 = vmatprep.mubr.msk.f32.mxu1 %vm2143_vm2, %v8901_v22 }
 0x2d5   :  { %v7283_v24 = vpop.f32.mrb[10].mxu1 }
 0x2d6   :  { %v2396_v25 = vpop.f32.mrb[11].mxu1  ;;  %7455 = vmatmul.mubr.msk.f32.gmra.mrb[116].mxu1 %vm2143_vm2, %v8907_v55 }
 0x2d7   :  { %7457 = vmatprep.mubr.msk.f32.mxu1 %vm2143_vm2, %v9120_v42 }
 0x2d9   :  { %v7286_v52 = vpop.f32.mrb[12].mxu1 }
 0x2da   :  { %v2405_v62 = vpop.f32.mrb[13].mxu1  ;;  %7458 = vmatmul.mubr.msk.f32.gmra.mrb[118].mxu1 %vm2143_vm2, %v3670_v46 }
 0x2db   :  { %7460 = vmatprep.mubr.msk.f32.mxu1 %vm2143_vm2, %v8922_v4 }
 0x2dd   :  { %v7289_v11 = vpop.f32.mrb[14].mxu1 }
 0x2de   :  { %v2414_v26 = vpop.f32.mrb[15].mxu1  ;;  %7461 = vmatmul.mubr.msk.f32.gmra.mrb[120].mxu1 %vm2143_vm2, %v8927_v9  ;;  %v3678_v9 = vld [vmem:[#allocation2 + $0x131] sm:$0xff] }
 0x2df   :  { %7463 = vmatprep.mubr.msk.f32.mxu1 %vm2143_vm2, %v8932_v10 }
 0x2e1   :  { %v7294_v22 = vpop.f32.mrb[16].mxu1 }
 0x2e2   :  { %v2536_v55 = vpop.f32.mrb[17].mxu1  ;;  %7464 = vmatmul.mubr.msk.f32.gmra.mrb[122].mxu1 %vm2143_vm2, %v8936_v12 }
 0x2e3   :  { %v2537_v27 = vadd.f32 %v2536_v55, %v2351_v20  ;;  %7466 = vmatprep.mubr.msk.f32.mxu1 %vm2143_vm2, %v8940_v13 }
 0x2e5   :  { %v7297_v29 = vpop.f32.mrb[18].mxu1 }
 0x2e6   :  { %v2545_v30 = vpop.f32.mrb[19].mxu1  ;;  %7467 = vmatmul.mubr.msk.f32.gmra.mrb[124].mxu1 %vm2143_vm2, %v8944_v15 }
 0x2e7   :  { %v2546_v4 = vadd.f32 %v2545_v30, %v2360_v2  ;;  %7469 = vmatprep.mubr.msk.f32.mxu1 %vm2143_vm2, %v9138_v53 }
 0x2e9   :  { %v7300_v10 = vpop.f32.mrb[20].mxu1 }
 0x2ea   :  { %v2554_v31 = vpop.f32.mrb[21].mxu1  ;;  %7470 = vmatmul.mubr.msk.f32.gmra.mrb[126].mxu1 %vm2143_vm2, %v3678_v9 }
 0x2eb   :  { %v2555_v32 = vadd.f32 %v2554_v31, %v2369_v14  ;;  %7474 = vmatprep.mubr.msk.f32.mxu1 %vm2143_vm2, %v9015_v43 }
 0x2ed   :  { %v7303_v12 = vpop.f32.mrb[22].mxu1 }
 0x2ee   :  { %v2563_v13 = vpop.f32.mrb[23].mxu1  ;;  %7475 = vmatmul.mubr.msk.f32.vlgmr.msra.gmra.mrb[128].mxu1 %vm2143_vm2, %v9019_v44 }
 0x2ef   :  { %v2564_v33 = vadd.f32 %v2563_v13, %v2378_v17  ;;  %7477 = vmatprep.mubr.msk.f32.mxu1 %vm2143_vm2, %v9023_v47  ;;  %v4108_v13 = vld [vmem:[%s9690_s5] sm:$0xff] }
 0x2f1   :  { %v7306_v15 = vpop.f32.mrb[24].mxu1 }
 0x2f2   :  { %v2572_v34 = vpop.f32.mrb[25].mxu1  ;;  %7478 = vmatmul.mubr.msk.f32.gmra.mrb[130].mxu1 %vm2143_vm2, %v9027_v48 }
 0x2f3   :  { %v2573_v35 = vadd.f32 %v2572_v34, %v2387_v23  ;;  %7480 = vmatprep.mubr.msk.f32.mxu1 %vm2143_vm2, %v9031_v49 }
 0x2f5   :  { %v7309_v37 = vpop.f32.mrb[26].mxu1 }
 0x2f6   :  { %v2581_v38 = vpop.f32.mrb[27].mxu1  ;;  %7481 = vmatmul.mubr.msk.f32.gmra.mrb[132].mxu1 %vm2143_vm2, %v9035_v51  ;;  %v6569_v37 = vld [vmem:[%s9690_s5 + $0x10] sm:$0xff] }
 0x2f7   :  { %v2582_v40 = vadd.f32 %v2581_v38, %v2396_v25  ;;  %7483 = vmatprep.mubr.msk.f32.mxu1 %vm2143_vm2, %v9159_v56  ;;  %v6570_v38 = vld [vmem:[%s9690_s5 + $0x18] sm:$0xff] }
 0x2f9   :  { %v7312_v43 = vpop.f32.mrb[28].mxu1 }
 0x2fa   :  { %v2590_v44 = vpop.f32.mrb[29].mxu1  ;;  %7484 = vmatmul.mubr.msk.f32.gmra.mrb[134].mxu1 %vm2143_vm2, %v3881_v41 }
 0x2fb   :  { %v2591_v47 = vadd.f32 %v2590_v44, %v2405_v62  ;;  %7486 = vmatprep.mubr.msk.f32.mxu1 %vm2143_vm2, %v9044_v63 }
 0x2fd   :  { %v7315_v48 = vpop.f32.mrb[30].mxu1 }
 0x2fe   :  { %v2599_v49 = vpop.f32.mrb[31].mxu1  ;;  %7487 = vmatmul.mubr.msk.f32.gmra.mrb[136].mxu1 %vm2143_vm2, %v9048_v0  ;;  %v3889_v0 = vld [vmem:[#allocation2 + $0x132] sm:$0xff] }
 0x2ff   :  { %v2600_v50 = vadd.f32 %v2599_v49, %v2414_v26  ;;  %7489 = vmatprep.mubr.msk.f32.mxu1 %vm2143_vm2, %v9052_v1 }
 0x301   :  { %v7320_v51 = vpop.f32.mrb[32].mxu1 }
 0x302   :  { %v2739_v61 = vpop.f32.mrb[33].mxu1  ;;  %7490 = vmatmul.mubr.msk.f32.gmra.mrb[138].mxu1 %vm2143_vm2, %v9056_v3 }
 0x303   :  { %v2810_v28 = vadd.f32 %v2739_v61, %v2537_v27  ;;  %7492 = vmatprep.mubr.msk.f32.mxu1 %vm2143_vm2, %v9060_v7 }
 0x305   :  { %v7323_v36 = vpop.f32.mrb[34].mxu1 }
 0x306   :  { %v2748_v63 = vpop.f32.mrb[35].mxu1  ;;  %7493 = vmatmul.mubr.msk.f32.gmra.mrb[140].mxu1 %vm2143_vm2, %v9064_v19 }
 0x307   :  { %v2811_v39 = vadd.f32 %v2748_v63, %v2546_v4  ;;  %7495 = vmatprep.mubr.msk.f32.mxu1 %vm2143_vm2, %v9177_v57 }
 0x309   :  { %v7326_v1 = vpop.f32.mrb[36].mxu1 }
 0x30a   :  { %v2757_v45 = vpop.f32.mrb[37].mxu1  ;;  %7496 = vmatmul.mubr.msk.f32.gmra.mrb[142].mxu1 %vm2143_vm2, %v3889_v0 }
 0x30b   :  { %v2812_v42 = vadd.f32 %v2757_v45, %v2555_v32  ;;  %v7998_v32 = vmov 0.0|0.0   ;;  %7509 = vmatprep.mubr.msk.f32.mxu1 %vm7999_vm4, %v7997_v8 }
 0x30c   :  { %7713 = vmatprep.subr.bf16.mxu1 %v7998_v32  ;;  %7710 = vmatprep.subr.bf16.mxu0 %v7998_v32 }
 0x30d   :  { %v7329_v3 = vpop.f32.mrb[38].mxu1 }
 0x30e   :  { %v2766_v53 = vpop.f32.mrb[39].mxu1 }
 0x30f   :  { %v2813_v54 = vadd.f32 %v2766_v53, %v2564_v33  ;;  %v4109_v33 = vld [vmem:[%s9690_s5 + $0x8] sm:$0xff] }
 0x310   :  { %v7714_v34 = vpack.c.bf16 %v4109_v33, %v4108_v13 }
 0x311   :  { %v7332_v56 = vpop.f32.mrb[40].mxu1 }
 0x312   :  { %v2775_v7 = vpop.f32.mrb[41].mxu1  ;;  %7715 = vmatpush3.bf16.msra.mxu1 %v7714_v34 }
 0x313   :  { %v2814_v58 = vadd.f32 %v2775_v7, %v2573_v35  ;;  %7719 = vmatprep.subr.bf16.mxu1 %v7998_v32 }
 0x315   :  { %v7335_v59 = vpop.f32.mrb[42].mxu1 }
 0x316   :  { %v2784_v60 = vpop.f32.mrb[43].mxu1 }
 0x317   :  { %v2815_v20 = vadd.f32 %v2784_v60, %v2582_v40  ;;  %v7711_v40 = vpack.c.bf16 %v6570_v38, %v6569_v37 }
 0x319   :  { %v7338_v19 = vpop.f32.mrb[44].mxu1  ;;  %7712 = vmatpush3.bf16.msra.mxu0 %v7711_v40 }
 0x31a   :  { %v2793_v21 = vpop.f32.mrb[45].mxu1  ;;  %7716 = vmatprep.subr.bf16.mxu0 %v7998_v32 }
 0x31b   :  { %v2816_v2 = vadd.f32 %v2793_v21, %v2591_v47 }
 0x31d   :  { %v7341_v5 = vpop.f32.mrb[46].mxu1 }
 0x31e   :  { %v2802_v57 = vpop.f32.mrb[47].mxu1 }
 0x31f   :  { %v2817_v6 = vadd.f32 %v2802_v57, %v2600_v50 }
 0x321   :  { %v7346_v14 = vpop.f32.mrb[48].mxu1 }
 0x322   :  { %v2950_v16 = vpop.f32.mrb[49].mxu1 }
 0x323   :  { %v3021_v17 = vadd.f32 %v2950_v16, %v2810_v28 }
 0x325   :  { %v7349_v18 = vpop.f32.mrb[50].mxu1 }
 0x326   :  { %v2959_v23 = vpop.f32.mrb[51].mxu1 }
 0x327   :  { %v3022_v24 = vadd.f32 %v2959_v23, %v2811_v39 }
 0x329   :  { %v7352_v25 = vpop.f32.mrb[52].mxu1 }
 0x32a   :  { %v2968_v46 = vpop.f32.mrb[53].mxu1 }
 0x32b   :  { %v3023_v52 = vadd.f32 %v2968_v46, %v2812_v42 }
 0x32d   :  { %v7355_v62 = vpop.f32.mrb[54].mxu1 }
 0x32e   :  { %v2977_v11 = vpop.f32.mrb[55].mxu1 }
 0x32f   :  { %v3024_v26 = vadd.f32 %v2977_v11, %v2813_v54 }
 0x331   :  { %v7358_v22 = vpop.f32.mrb[56].mxu1 }
 0x332   :  { %v2986_v55 = vpop.f32.mrb[57].mxu1 }
 0x333   :  { %v3025_v27 = vadd.f32 %v2986_v55, %v2814_v58 }
 0x335   :  { %v7361_v29 = vpop.f32.mrb[58].mxu1 }
 0x336   :  { %v2995_v30 = vpop.f32.mrb[59].mxu1 }
 0x337   :  { %v3026_v4 = vadd.f32 %v2995_v30, %v2815_v20 }
 0x339   :  { %v7364_v9 = vpop.f32.mrb[60].mxu1 }
 0x33a   :  { %v3004_v10 = vpop.f32.mrb[61].mxu1 }
 0x33b   :  { %v3027_v31 = vadd.f32 %v3004_v10, %v2816_v2 }
 0x33d   :  { %v7367_v12 = vpop.f32.mrb[62].mxu1 }
 0x33e   :  { %v3013_v15 = vpop.f32.mrb[63].mxu1 }
 0x33f   :  { %v3028_v35 = vadd.f32 %v3013_v15, %v2817_v6 }
 0x341   :  { %v7372_v41 = vpop.f32.mrb[64].mxu1 }
 0x342   :  { %v3161_v43 = vpop.f32.mrb[65].mxu1 }
 0x343   :  { %v3232_v44 = vadd.f32 %v3161_v43, %v3021_v17 }
 0x345   :  { %v7375_v47 = vpop.f32.mrb[66].mxu1 }
 0x346   :  { %v3170_v48 = vpop.f32.mrb[67].mxu1 }
 0x347   :  { %v3233_v49 = vadd.f32 %v3170_v48, %v3022_v24 }
 0x349   :  { %v7378_v50 = vpop.f32.mrb[68].mxu1 }
 0x34a   :  { %v3179_v51 = vpop.f32.mrb[69].mxu1 }
 0x34b   :  { %v3234_v61 = vadd.f32 %v3179_v51, %v3023_v52 }
 0x34d   :  { %v7381_v28 = vpop.f32.mrb[70].mxu1 }
 0x34e   :  { %v3188_v36 = vpop.f32.mrb[71].mxu1 }
 0x34f   :  { %v3235_v63 = vadd.f32 %v3188_v36, %v3024_v26 }
 0x351   :  { %v7384_v39 = vpop.f32.mrb[72].mxu1 }
 0x352   :  { %v3197_v0 = vpop.f32.mrb[73].mxu1 }
 0x353   :  { %v3236_v1 = vadd.f32 %v3197_v0, %v3025_v27 }
 0x355   :  { %v7387_v45 = vpop.f32.mrb[74].mxu1 }
 0x356   :  { %v3206_v42 = vpop.f32.mrb[75].mxu1 }
 0x357   :  { %v3237_v3 = vadd.f32 %v3206_v42, %v3026_v4 }
 0x359   :  { %v7390_v53 = vpop.f32.mrb[76].mxu1 }
 0x35a   :  { %v3215_v54 = vpop.f32.mrb[77].mxu1 }
 0x35b   :  { %v3238_v56 = vadd.f32 %v3215_v54, %v3027_v31 }
 0x35d   :  { %v7393_v7 = vpop.f32.mrb[78].mxu1 }
 0x35e   :  { %v3224_v58 = vpop.f32.mrb[79].mxu1 }
 0x35f   :  { %v3239_v59 = vadd.f32 %v3224_v58, %v3028_v35 }
 0x361   :  { %v7398_v60 = vpop.f32.mrb[80].mxu1 }
 0x362   :  { %v3372_v20 = vpop.f32.mrb[81].mxu1 }
 0x363   :  { %v3443_v19 = vadd.f32 %v3372_v20, %v3232_v44 }
 0x365   :  { %v7401_v21 = vpop.f32.mrb[82].mxu1 }
 0x366   :  { %v3381_v2 = vpop.f32.mrb[83].mxu1 }
 0x367   :  { %v3444_v5 = vadd.f32 %v3381_v2, %v3233_v49 }
 0x369   :  { %v7404_v57 = vpop.f32.mrb[84].mxu1 }
 0x36a   :  { %v3390_v6 = vpop.f32.mrb[85].mxu1 }
 0x36b   :  { %v3445_v14 = vadd.f32 %v3390_v6, %v3234_v61 }
 0x36d   :  { %v7407_v16 = vpop.f32.mrb[86].mxu1 }
 0x36e   :  { %v3399_v17 = vpop.f32.mrb[87].mxu1 }
 0x36f   :  { %v3446_v18 = vadd.f32 %v3399_v17, %v3235_v63 }
 0x371   :  { %v7410_v23 = vpop.f32.mrb[88].mxu1 }
 0x372   :  { %v3408_v24 = vpop.f32.mrb[89].mxu1 }
 0x373   :  { %v3447_v25 = vadd.f32 %v3408_v24, %v3236_v1 }
 0x375   :  { %v7413_v46 = vpop.f32.mrb[90].mxu1 }
 0x376   :  { %v3417_v52 = vpop.f32.mrb[91].mxu1 }
 0x377   :  { %v3448_v62 = vadd.f32 %v3417_v52, %v3237_v3 }
 0x379   :  { %v7416_v11 = vpop.f32.mrb[92].mxu1 }
 0x37a   :  { %v3426_v26 = vpop.f32.mrb[93].mxu1 }
 0x37b   :  { %v3449_v22 = vadd.f32 %v3426_v26, %v3238_v56  ;;  %v9298_v26 = vld [vmem:[%s9689_s4] ss:$0 sm:$0xff]  ;;  %s6134_s4 = sshll.u32 %s8002_s0, 4  ;;  %s6135_s4 = int_to_ptr.vmem [resolvable:$true] %s6134_s4 }
 0x37c   :  { %p7978_p1 = scmp.lt.s32.totalorder %s6135_s4, %s6135_s4 }
 0x37d   :  { %v7419_v55 = vpop.f32.mrb[94].mxu1 }
 0x37e   :  { %v3435_v27 = vpop.f32.mrb[95].mxu1 }
 0x37f   :  { %v3450_v29 = vadd.f32 %v3435_v27, %v3239_v59 }
 0x381   :  { %v7424_v30 = vpop.f32.mrb[96].mxu1 }
 0x382   :  { %v3584_v4 = vpop.f32.mrb[97].mxu1 }
 0x383   :  { %v3655_v9 = vadd.f32 %v3584_v4, %v3443_v19 }
 0x385   :  { %v7427_v10 = vpop.f32.mrb[98].mxu1 }
 0x386   :  { %v3593_v31 = vpop.f32.mrb[99].mxu1  ;;  %v6577_v10 = vld [vmem:[%s9690_s5 + $0x38] sm:$0xff] }
 0x387   :  { %v3656_v12 = vadd.f32 %v3593_v31, %v3444_v5  ;;  %v6573_v31 = vld [vmem:[%s9690_s5 + $0x20] sm:$0xff] }
 0x389   :  { %v7430_v13 = vpop.f32.mrb[100].mxu1 }
 0x38a   :  { %v3602_v33 = vpop.f32.mrb[101].mxu1  ;;  %v6574_v13 = vld [vmem:[%s9690_s5 + $0x28] sm:$0xff] }
 0x38b   :  { %v3657_v15 = vadd.f32 %v3602_v33, %v3445_v14  ;;  %v9316_v33 = vld [vmem:[%s9690_s5 + $0x50] sm:$0xff] }
 0x38d   :  { %v7433_v34 = vpop.f32.mrb[102].mxu1 }
 0x38e   :  { %v3611_v35 = vpop.f32.mrb[103].mxu1 }
 0x38f   :  { %v3658_v37 = vadd.f32 %v3611_v35, %v3446_v18 }
 0x391   :  { %v7436_v38 = vpop.f32.mrb[104].mxu1 }
 0x392   :  { %v3620_v40 = vpop.f32.mrb[105].mxu1  ;;  %v9332_v38 = vld [vmem:[%s9690_s5 + $0x48] sm:$0xff] }
 0x393   :  { %v3659_v41 = vadd.f32 %v3620_v40, %v3447_v25  ;;  %v9337_v40 = vld [vmem:[%s9690_s5 + $0x70] sm:$0xff] }
 0x395   :  { %v7439_v43 = vpop.f32.mrb[106].mxu1 }
 0x396   :  { %v3629_v44 = vpop.f32.mrb[107].mxu1 }
 0x397   :  { %v3660_v47 = vadd.f32 %v3629_v44, %v3448_v62  ;;  %v9343_v44 = vld [vmem:[%s9690_s5 + $0x78] sm:$0xff] }
 0x399   :  { %v7442_v48 = vpop.f32.mrb[108].mxu1 }
 0x39a   :  { %v3638_v49 = vpop.f32.mrb[109].mxu1  ;;  %v9353_v48 = vld [vmem:[%s9690_s5 + $0x68] sm:$0xff] }
 0x39b   :  { %v3661_v50 = vadd.f32 %v3638_v49, %v3449_v22 }
 0x39d   :  { %v7445_v51 = vpop.f32.mrb[110].mxu1 }
 0x39e   :  { %v3647_v61 = vpop.f32.mrb[111].mxu1 }
 0x39f   :  { %v3662_v28 = vadd.f32 %v3647_v61, %v3450_v29  ;;  %v7717_v61 = vpack.c.bf16 %v6574_v13, %v6573_v31  ;;  %v6595_v31 = vld [vmem:[%s9690_s5 + $0x98] sm:$0xff] }
 0x3a1   :  { %v7450_v36 = vpop.f32.mrb[112].mxu1 }
 0x3a2   :  { %v3795_v63 = vpop.f32.mrb[113].mxu1 }
 0x3a3   :  { %v3866_v39 = vadd.f32 %v3795_v63, %v3655_v9  ;;  %v6576_v9 = vld [vmem:[%s9690_s5 + $0x30] sm:$0xff] }
 0x3a4   :  { %v7720_v51 = vpack.c.bf16 %v6577_v10, %v6576_v9  ;;  %v6594_v10 = vld [vmem:[%s9690_s5 + $0x90] sm:$0xff] }
 0x3a5   :  { %v7453_v0 = vpop.f32.mrb[114].mxu1 }
 0x3a6   :  { %v3804_v1 = vpop.f32.mrb[115].mxu1 }
 0x3a7   :  { %v3867_v45 = vadd.f32 %v3804_v1, %v3656_v12 }
 0x3a9   :  { %v7456_v42 = vpop.f32.mrb[116].mxu1 }
 0x3aa   :  { %v3813_v3 = vpop.f32.mrb[117].mxu1 }
 0x3ab   :  { %v3868_v53 = vadd.f32 %v3813_v3, %v3657_v15  ;;  %v9321_v15 = vld [vmem:[%s9690_s5 + $0x58] sm:$0xff] }
 0x3ac   :  { %v7726_v63 = vpack.c.bf16 %v9321_v15, %v9316_v33 }
 0x3ad   :  { %v7459_v54 = vpop.f32.mrb[118].mxu1 }
 0x3ae   :  { %v3822_v56 = vpop.f32.mrb[119].mxu1 }
 0x3af   :  { %v3869_v7 = vadd.f32 %v3822_v56, %v3658_v37  ;;  %v9327_v37 = vld [vmem:[%s9690_s5 + $0x40] sm:$0xff] }
 0x3b1   :  { %v7462_v58 = vpop.f32.mrb[120].mxu1 }
 0x3b2   :  { %v3831_v59 = vpop.f32.mrb[121].mxu1 }
 0x3b3   :  { %v3870_v60 = vadd.f32 %v3831_v59, %v3659_v41 }
 0x3b5   :  { %v7465_v20 = vpop.f32.mrb[122].mxu1 }
 0x3b6   :  { %v3840_v19 = vpop.f32.mrb[123].mxu1 }
 0x3b7   :  { %v3871_v21 = vadd.f32 %v3840_v19, %v3660_v47  ;;  %v9348_v47 = vld [vmem:[%s9690_s5 + $0x60] sm:$0xff] }
 0x3b8   :  { %v7729_v42 = vpack.c.bf16 %v9353_v48, %v9348_v47  ;;  %v6598_v47 = vld [vmem:[%s9690_s5 + $0xa8] sm:$0xff] }
 0x3b9   :  { %v7468_v2 = vpop.f32.mrb[124].mxu1 }
 0x3ba   :  { %v3849_v5 = vpop.f32.mrb[125].mxu1 }
 0x3bb   :  { %v3872_v57 = vadd.f32 %v3849_v5, %v3661_v50 }
 0x3bd   :  { %v7471_v6 = vpop.f32.mrb[126].mxu1 }
 0x3be   :  { %v3858_v14 = vpop.f32.mrb[127].mxu1 }
 0x3bf   :  { %v9293_v16 = vadd.f32 %v3858_v14, %v3662_v28 }
 0x3c1   :  { %v7476_v17 = vpop.f32.mrb[128].mxu1 }
 0x3c2   :  { %v4006_v18 = vpop.f32.mrb[129].mxu1 }
 0x3c3   :  { %v4077_v23 = vadd.f32 %v4006_v18, %v3866_v39  ;;  %v7723_v39 = vpack.c.bf16 %v9332_v38, %v9327_v37 }
 0x3c5   :  { %v7479_v24 = vpop.f32.mrb[130].mxu1  ;;  %v4092_v29 = vadd.f32 %v9298_v26, %v4077_v23 }
 0x3c6   :  { %v4015_v25 = vpop.f32.mrb[131].mxu1 }
 0x3c7   :  { %v4078_v46 = vadd.f32 %v4015_v25, %v3867_v45  ;;  %v4100_v34 = vmax.f32 %v4092_v29, 0.0  ;;  %v7732_v45 = vpack.c.bf16 %v9343_v44, %v9337_v40  ;;  %v6601_v40 = vld [vmem:[%s9690_s5 + $0xb8] sm:$0xff]  ;;  %v6597_v44 = vld [vmem:[%s9690_s5 + $0xa0] sm:$0xff] }
 0x3c9   :  { %v7482_v52 = vpop.f32.mrb[132].mxu1  ;;  %v4093_v35 = vadd.f32 %v9298_v26, %v4078_v46  ;;  %v4115_v0 = vrot.slane %v4100_v34, 2  ;;  %v4348_v20 = vrot.slane %v4100_v34, 6 }
 0x3ca   :  { %v4024_v62 = vpop.f32.mrb[133].mxu1 }
 0x3cb   :  { %v4079_v11 = vadd.f32 %v4024_v62, %v3868_v53  ;;  %v4101_v1 = vmax.f32 %v4093_v35, 0.0  ;;  %v6592_v35 = vld [vmem:[%s9690_s5 + $0x88] sm:$0xff] }
 0x3cd   :  { %v7485_v22 = vpop.f32.mrb[134].mxu1  ;;  %v4094_v49 = vadd.f32 %v9298_v26, %v4079_v11  ;;  %v4507_v23 = vrot.slane %v4101_v1, 2  ;;  %v4586_v11 = vrot.slane %v4101_v1, 4 }
 0x3ce   :  { %v4033_v55 = vpop.f32.mrb[135].mxu1  ;;  %v4665_v22 = vrot.slane %v4101_v1, 6 }
 0x3cf   :  { %v4080_v27 = vadd.f32 %v4033_v55, %v3869_v7  ;;  %v9365_v58 = vmax.f32 %v4094_v49, 0.0 }
 0x3d1   :  { %v7488_v30 = vpop.f32.mrb[136].mxu1  ;;  %v4095_v14 = vadd.f32 %v9298_v26, %v4080_v27  ;;  %v4824_v27 = vrot.slane %v9365_v58, 2  ;;  %v4903_v33 = vrot.slane %v9365_v58, 4 }
 0x3d2   :  { %v4042_v4 = vpop.f32.mrb[137].mxu1 }
 0x3d3   :  { %v4081_v12 = vadd.f32 %v4042_v4, %v3870_v60  ;;  %v4269_v60 = vrot.slane %v4100_v34, 4 }
 0x3d5   :  { %v4096_v41 = vadd.f32 %v9298_v26, %v4081_v12  ;;  %v7491_v43 = vpop.f32.mrb[138].mxu1  ;;  %v4103_v12 = vmax.f32 %v4095_v14, 0.0  ;;  %v6612_v14 = vld [vmem:[%s9690_s5 + $0xf0] sm:$0xff] }
 0x3d6   :  { %v4051_v50 = vpop.f32.mrb[139].mxu1  ;;  %v4982_v43 = vrot.slane %v9365_v58, 6 }
 0x3d7   :  { %v4104_v28 = vmax.f32 %v4096_v41, 0.0  ;;  %v4082_v36 = vadd.f32 %v4051_v50, %v3871_v21  ;;  %v5299_v48 = vrot.slane %v4103_v12, 6 }
 0x3d9   :  { %v4116_v3 = vrot.slane %v4104_v28, 1  ;;  %v4192_v53 = vrot.slane %v4104_v28, 7  ;;  %v4097_v54 = vadd.f32 %v9298_v26, %v4082_v36  ;;  %v7494_v56 = vpop.f32.mrb[140].mxu1  ;;  %v4270_v7 = vrot.slane %v4104_v28, 3 }
 0x3da   :  { %v4060_v59 = vpop.f32.mrb[141].mxu1  ;;  %v4349_v19 = vrot.slane %v4104_v28, 5 }
 0x3db   :  { %v4105_v21 = vmax.f32 %v4097_v54, 0.0  ;;  %v4083_v2 = vadd.f32 %v4060_v59, %v3872_v57  ;;  %v4118_v5 = vsel %vm4117_vm5, %v4116_v3, %v4115_v0  ;;  %v4193_v6 = vsel %vm4117_vm5, %v4192_v53, %v4100_v34  ;;  %v6591_v34 = vld [vmem:[%s9690_s5 + $0x80] sm:$0xff] }
 0x3dc   :  { %7503 = vmatmul.mubr.msk.f32.vlgmr.msra.gmra.mrb[16].mxu0 %vm4119_vm6, %v4118_v5  ;;  %7510 = vmatmul.mubr.msk.f32.vlgmr.msra.gmra.mrb[144].mxu1 %vm4119_vm6, %v4193_v6  ;;  %v4271_v17 = vsel %vm4117_vm5, %v4270_v7, %v4269_v60  ;;  %v4350_v18 = vsel %vm4117_vm5, %v4349_v19, %v4348_v20  ;;  %v7735_v36 = vpack.c.bf16 %v6592_v35, %v6591_v34  ;;  %v5220_v0 = vrot.slane %v4103_v12, 4  ;;  %v6606_v20 = vld [vmem:[%s9690_s5 + $0xd0] sm:$0xff]  ;;  %v6607_v19 = vld [vmem:[%s9690_s5 + $0xd8] sm:$0xff] }
 0x3dd   :  { %v4098_v24 = vadd.f32 %v9298_v26, %v4083_v2  ;;  %7721 = vmatpush3.bf16.msra.mxu1 %v7720_v51  ;;  %v7497_v25 = vpop.f32.mrb[142].mxu1  ;;  %7718 = vmatpush3.bf16.msra.mxu0 %v7717_v61  ;;  %v4429_v57 = vrot.slane %v4105_v21, 7  ;;  %v4508_v46 = vrot.slane %v4105_v21, 1  ;;  %v4587_v52 = vrot.slane %v4105_v21, 3  ;;  %v6604_v2 = vld [vmem:[%s9690_s5 + $0xc8] sm:$0xff] }
 0x3de   :  { %v4069_v62 = vpop.f32.mrb[143].mxu1  ;;  %7516 = vmatprep.mubr.msk.f32.mxu0 %vm7999_vm4, %v7997_v8  ;;  %7523 = vmatprep.mubr.msk.f32.mxu1 %vm7999_vm4, %v7997_v8  ;;  %v4666_v55 = vrot.slane %v4105_v21, 5  ;;  %v7741_v60 = vpack.c.bf16 %v6598_v47, %v6597_v44  ;;  %v6603_v21 = vld [vmem:[%s9690_s5 + $0xc0] sm:$0xff]  ;;  %v7750_v5 = vpack.c.bf16 %v6607_v19, %v6606_v20 }
 0x3df   :  { %v4106_v29 = vmax.f32 %v4098_v24, 0.0  ;;  %v4084_v30 = vadd.f32 %v4069_v62, %v9293_v16  ;;  %7725 = vmatprep.subr.bf16.mxu1 %v7998_v32  ;;  %7722 = vmatprep.subr.bf16.mxu0 %v7998_v32  ;;  %v4430_v4 = vsel %vm4117_vm5, %v4429_v57, %v4101_v1  ;;  %v4509_v9 = vsel %vm4117_vm5, %v4508_v46, %v4507_v23  ;;  %v6600_v1 = vld [vmem:[%s9690_s5 + $0xb0] sm:$0xff]  ;;  %v6610_v23 = vld [vmem:[%s9690_s5 + $0xe8] sm:$0xff]  ;;  %v5466_v57 = vld [vmem:[%s9694_s9] sm:$0xff] }
 0x3e0   :  { %7517 = vmatmul.mubr.msk.f32.vlgmr.msra.gmra.mrb[18].mxu0 %vm4119_vm6, %v4271_v17  ;;  %7524 = vmatmul.mubr.msk.f32.vlgmr.msra.gmra.mrb[146].mxu1 %vm4119_vm6, %v4350_v18  ;;  %v4588_v16 = vsel %vm4117_vm5, %v4587_v52, %v4586_v11  ;;  %v4667_v13 = vsel %vm4117_vm5, %v4666_v55, %v4665_v22  ;;  %v7744_v59 = vpack.c.bf16 %v6601_v40, %v6600_v1  ;;  %v6613_v17 = vld [vmem:[%s9690_s5 + $0xf8] sm:$0xff]  ;;  %v6609_v18 = vld [vmem:[%s9690_s5 + $0xe0] sm:$0xff]  ;;  %v5467_v46 = vld [vmem:[%s9694_s9 + $0x8] sm:$0xff] }
 0x3e1   :  { %v4099_v15 = vadd.f32 %v9298_v26, %v4084_v30  ;;  %7727 = vmatpush3.bf16.msra.mxu1 %v7726_v63  ;;  %7724 = vmatpush3.bf16.msra.mxu0 %v7723_v39  ;;  %v4746_v37 = vrot.slane %v4106_v29, 7  ;;  %v4825_v38 = vrot.slane %v4106_v29, 1  ;;  %v4904_v41 = vrot.slane %v4106_v29, 3  ;;  %v5384_v52 = vld [vmem:[%s9693_s8] sm:$0xff]  ;;  %v5385_v62 = vld [vmem:[%s9693_s8 + $0x8] sm:$0xff]  ;;  %v5468_v55 = vld [vmem:[%s9694_s9 + $0x10] sm:$0xff] }
 0x3e2   :  { %7530 = vmatprep.mubr.msk.f32.mxu0 %vm7999_vm4, %v7997_v8  ;;  %7537 = vmatprep.mubr.msk.f32.mxu1 %vm7999_vm4, %v7997_v8  ;;  %v7738_v26 = vpack.c.bf16 %v6595_v31, %v6594_v10  ;;  %v4983_v49 = vrot.slane %v4106_v29, 5  ;;  %v5141_v39 = vrot.slane %v4103_v12, 2  ;;  %v7747_v6 = vpack.c.bf16 %v6604_v2, %v6603_v21  ;;  %v5383_v30 = vld [vmem:[%s9692_s7] sm:$0x3f] }
 0x3e3   :  { %v4107_v50 = vmax.f32 %v4099_v15, 0.0  ;;  %7731 = vmatprep.subr.bf16.mxu1 %v7998_v32  ;;  %7728 = vmatprep.subr.bf16.mxu0 %v7998_v32  ;;  %v4747_v51 = vsel %vm4117_vm5, %v4746_v37, %v9365_v58  ;;  %v4826_v61 = vsel %vm4117_vm5, %v4825_v38, %v4824_v27  ;;  %v4905_v28 = vsel %vm4117_vm5, %v4904_v41, %v4903_v33  ;;  %v5469_v27 = vld [vmem:[%s9694_s9 + $0x18] sm:$0xff] }
 0x3e4   :  { %7531 = vmatmul.mubr.msk.f32.vlgmr.msra.gmra.mrb[20].mxu0 %vm4119_vm6, %v4430_v4  ;;  %7538 = vmatmul.mubr.msk.f32.vlgmr.msra.gmra.mrb[148].mxu1 %vm4119_vm6, %v4509_v9  ;;  %v4984_v63 = vsel %vm4117_vm5, %v4983_v49, %v4982_v43  ;;  %v7756_v24 = vpack.c.bf16 %v6613_v17, %v6612_v14  ;;  %v7753_v25 = vpack.c.bf16 %v6610_v23, %v6609_v18  ;;  %v6616_v14 = vld [vmem:[%s9695_s10] ss:$0 sm:$0xff]  ;;  %s8001_s10 = smov 32  }
 0x3e5   :  { %7733 = vmatpush3.bf16.msra.mxu1 %v7732_v45  ;;  %7730 = vmatpush3.bf16.msra.mxu0 %v7729_v42  ;;  %v5063_v3 = vrot.slane %v4107_v50, 7  ;;  %v5142_v53 = vrot.slane %v4107_v50, 1  ;;  %v5221_v54 = vrot.slane %v4107_v50, 3  ;;  %v5300_v56 = vrot.slane %v4107_v50, 5 }
 0x3e6   :  { %7544 = vmatprep.mubr.msk.f32.mxu0 %vm7999_vm4, %v7997_v8  ;;  %7551 = vmatprep.mubr.msk.f32.mxu1 %vm7999_vm4, %v7997_v8  ;;  %v7762_v11 = vpack.c.bf16 %v5467_v46, %v5466_v57  ;;  %v7759_v22 = vpack.c.bf16 %v5385_v62, %v5384_v52  ;;  %v7765_v29 = vpack.c.bf16 %v5469_v27, %v5468_v55 }
 0x3e7   :  { %7737 = vmatprep.subr.bf16.mxu1 %v7998_v32  ;;  %7734 = vmatprep.subr.bf16.mxu0 %v7998_v32  ;;  %v5064_v45 = vsel %vm4117_vm5, %v5063_v3, %v4103_v12  ;;  %v5143_v42 = vsel %vm4117_vm5, %v5142_v53, %v5141_v39  ;;  %v5222_v7 = vsel %vm4117_vm5, %v5221_v54, %v5220_v0 }
 0x3e8   :  { %7545 = vmatmul.mubr.msk.f32.vlgmr.msra.gmra.mrb[22].mxu0 %vm4119_vm6, %v4588_v16  ;;  %7552 = vmatmul.mubr.msk.f32.vlgmr.msra.gmra.mrb[150].mxu1 %vm4119_vm6, %v4667_v13  ;;  %v5301_v58 = vsel %vm4117_vm5, %v5300_v56, %v5299_v48 }
 0x3e9   :  { %7739 = vmatpush3.bf16.msra.mxu1 %v7738_v26  ;;  %7736 = vmatpush3.bf16.msra.mxu0 %v7735_v36 }
 0x3ea   :  { %7558 = vmatprep.mubr.msk.f32.mxu0 %vm7999_vm4, %v7997_v8  ;;  %7565 = vmatprep.mubr.msk.f32.mxu1 %vm7999_vm4, %v7997_v8 }
 0x3eb   :  { %7743 = vmatprep.subr.bf16.mxu1 %v7998_v32  ;;  %7740 = vmatprep.subr.bf16.mxu0 %v7998_v32 }
 0x3ec   :  { %7559 = vmatmul.mubr.msk.f32.vlgmr.msra.gmra.mrb[24].mxu0 %vm4119_vm6, %v4747_v51  ;;  %7566 = vmatmul.mubr.msk.f32.vlgmr.msra.gmra.mrb[152].mxu1 %vm4119_vm6, %v4826_v61 }
 0x3ed   :  { %7745 = vmatpush3.bf16.msra.mxu1 %v7744_v59  ;;  %7742 = vmatpush3.bf16.msra.mxu0 %v7741_v60 }
 0x3ee   :  { %7572 = vmatprep.mubr.msk.f32.mxu0 %vm7999_vm4, %v7997_v8  ;;  %7579 = vmatprep.mubr.msk.f32.mxu1 %vm7999_vm4, %v7997_v8 }
 0x3ef   :  { %7749 = vmatprep.subr.bf16.mxu1 %v7998_v32  ;;  %7746 = vmatprep.subr.bf16.mxu0 %v7998_v32 }
 0x3f0   :  { %7573 = vmatmul.mubr.msk.f32.vlgmr.msra.gmra.mrb[26].mxu0 %vm4119_vm6, %v4905_v28  ;;  %7580 = vmatmul.mubr.msk.f32.vlgmr.msra.gmra.mrb[154].mxu1 %vm4119_vm6, %v4984_v63 }
 0x3f1   :  { %7751 = vmatpush3.bf16.msra.mxu1 %v7750_v5  ;;  %7748 = vmatpush3.bf16.msra.mxu0 %v7747_v6 }
 0x3f2   :  { %7586 = vmatprep.mubr.msk.f32.mxu0 %vm7999_vm4, %v7997_v8  ;;  %7593 = vmatprep.mubr.msk.f32.mxu1 %vm7999_vm4, %v7997_v8 }
 0x3f3   :  { %7755 = vmatprep.subr.bf16.mxu1 %v7998_v32  ;;  %7752 = vmatprep.subr.bf16.mxu0 %v7998_v32 }
 0x3f4   :  { %7587 = vmatmul.mubr.msk.f32.vlgmr.msra.gmra.mrb[28].mxu0 %vm4119_vm6, %v5064_v45  ;;  %7594 = vmatmul.mubr.msk.f32.vlgmr.msra.gmra.mrb[156].mxu1 %vm4119_vm6, %v5143_v42 }
 0x3f5   :  { %7757 = vmatpush3.bf16.msra.mxu1 %v7756_v24  ;;  %7754 = vmatpush3.bf16.msra.mxu0 %v7753_v25 }
 0x3f6   :  { %7600 = vmatprep.mubr.msk.f32.mxu0 %vm7999_vm4, %v7997_v8  ;;  %7607 = vmatprep.mubr.msk.f32.mxu1 %vm7999_vm4, %v7997_v8 }
 0x3f7   :  { %7761 = vmatprep.subr.bf16.mxu1 %v7998_v32  ;;  %7758 = vmatprep.subr.bf16.mxu0 %v7998_v32 }
 0x3f8   :  { %7601 = vmatmul.mubr.msk.f32.vlgmr.msra.gmra.mrb[30].mxu0 %vm4119_vm6, %v5222_v7  ;;  %7608 = vmatmul.mubr.msk.f32.vlgmr.msra.gmra.mrb[158].mxu1 %vm4119_vm6, %v5301_v58 }
 0x3f9   :  { %7763 = vmatpush3.bf16.msra.mxu1 %v7762_v11  ;;  %7760 = vmatpush3.bf16.msra.mxu0 %v7759_v22 }
 0x3fa   :  { %7764 = vmatprep.subr.bf16.mxu1 %v7998_v32  ;;  %7614 = vmatprep.mubr.msk.f32.mxu0 %vm7999_vm4, %v7997_v8 }
 0x3fb   :  { %7625 = vmatprep.mubr.msk.f32.mxu1 %vm7999_vm4, %v7997_v8  ;;  %7767 = vmatprep.subr.bf16.mxu0 %v7998_v32 }
 0x3fc   :  { %7615 = vmatmul.mubr.msk.f32.vlgmr.msra.gmra.mrb[32].mxu0 %vm4119_vm6, %v5383_v30 }
 0x3fd   :  { %7766 = vmatpush3.bf16.msra.mxu1 %v7765_v29  ;;  %7769 = vmatpush3.bf16.msra.mxu0 %v7762_v11 }
 0x3fe   :  { %7770 = vmatprep.subr.bf16.mxu0 %v7998_v32  ;;  %7636 = vmatprep.mubr.msk.f32.mxu0 %vm7999_vm4, %v7997_v8 }
 0x3ff   :  { %7773 = vmatprep.subr.bf16.mxu1 %v7998_v32 }
 0x400   :  { %7626 = vmatmul.mubr.f32.vlgmr.msra.gmra.mrb[160].mxu1 %v7997_v8 }
 0x401   :  { %7772 = vmatpush3.bf16.msra.mxu0 %v7765_v29  ;;  %7775 = vmatpush3.bf16.msra.mxu1 %v7762_v11 }
 0x402   :  { %7776 = vmatprep.subr.bf16.mxu1 %v7998_v32  ;;  %7647 = vmatprep.mubr.msk.f32.mxu1 %vm7999_vm4, %v7997_v8 }
 0x403   :  { %7779 = vmatprep.subr.bf16.mxu0 %v7998_v32 }
 0x405   :  { %7778 = vmatpush3.bf16.msra.mxu1 %v7765_v29 }
 0x406   :  { %7785 = vmatprep.subr.bf16.mxu1 %v7998_v32 }
 0x4af   :  { %v4188_v4 = vpop.f32.mrb[16].mxu0  ;;  %v4262_v9 = vpop.f32.mrb[144].mxu1 }
 0x4b0   :  { %v4263_v10 = vadd.f32 %v4262_v9, %v4188_v4  ;;  %v7504_v31 = vpop.f32.mrb[17].mxu0  ;;  %v7511_v12 = vpop.f32.mrb[145].mxu1 }
 0x4b3   :  { %v4340_v16 = vpop.f32.mrb[18].mxu0  ;;  %v4419_v13 = vpop.f32.mrb[146].mxu1 }
 0x4b4   :  { %v4344_v33 = vadd.f32 %v4340_v16, %v4263_v10  ;;  %v7518_v15 = vpop.f32.mrb[19].mxu0  ;;  %v7525_v34 = vpop.f32.mrb[147].mxu1 }
 0x4b6   :  { %v4423_v35 = vadd.f32 %v4419_v13, %v4344_v33 }
 0x4b7   :  { %v4499_v37 = vpop.f32.mrb[20].mxu0  ;;  %v4578_v38 = vpop.f32.mrb[148].mxu1 }
 0x4b8   :  { %v4503_v41 = vadd.f32 %v4499_v37, %v4423_v35  ;;  %v7532_v26 = vpop.f32.mrb[21].mxu0  ;;  %v7539_v43 = vpop.f32.mrb[149].mxu1 }
 0x4ba   :  { %v4582_v49 = vadd.f32 %v4578_v38, %v4503_v41 }
 0x4bb   :  { %v4657_v50 = vpop.f32.mrb[22].mxu0  ;;  %v4736_v51 = vpop.f32.mrb[150].mxu1 }
 0x4bc   :  { %v4661_v61 = vadd.f32 %v4657_v50, %v4582_v49  ;;  %v7546_v28 = vpop.f32.mrb[23].mxu0  ;;  %v7553_v36 = vpop.f32.mrb[151].mxu1 }
 0x4be   :  { %v4740_v63 = vadd.f32 %v4736_v51, %v4661_v61 }
 0x4bf   :  { %v4816_v39 = vpop.f32.mrb[24].mxu0  ;;  %v4895_v0 = vpop.f32.mrb[152].mxu1 }
 0x4c0   :  { %v4820_v1 = vadd.f32 %v4816_v39, %v4740_v63  ;;  %v7560_v3 = vpop.f32.mrb[25].mxu0  ;;  %v7567_v53 = vpop.f32.mrb[153].mxu1 }
 0x4c1   :  { %v5783_v3 = vld [vmem:[%s9696_s11 + $0x8] sm:$0xff] }
 0x4c2   :  { %v4899_v54 = vadd.f32 %v4895_v0, %v4820_v1  ;;  %v5782_v1 = vld [vmem:[%s9696_s11] sm:$0xff] }
 0x4c3   :  { %v4974_v56 = vpop.f32.mrb[26].mxu0  ;;  %v5053_v40 = vpop.f32.mrb[154].mxu1  ;;  %v7786_v53 = vpack.c.bf16 %v5783_v3, %v5782_v1  ;;  %v6044_v3 = vld [vmem:[%s9701_s16 + $0x30] sm:$0xff] }
 0x4c4   :  { %v4978_v44 = vadd.f32 %v4974_v56, %v4899_v54  ;;  %v7574_v47 = vpop.f32.mrb[27].mxu0  ;;  %v7581_v48 = vpop.f32.mrb[155].mxu1  ;;  %v5784_v54 = vld [vmem:[%s9696_s11 + $0x10] sm:$0xff]  ;;  %v5785_v56 = vld [vmem:[%s9696_s11 + $0x18] sm:$0xff] }
 0x4c5   :  { %v6615_v47 = vld [vmem:[%s9691_s6] ss:$0 sm:$0xff] }
 0x4c6   :  { %v5057_v45 = vadd.f32 %v5053_v40, %v4978_v44  ;;  %v7789_v44 = vpack.c.bf16 %v5785_v56, %v5784_v54  ;;  %v6626_v54 = vld [vmem:[%s9700_s15] ss:$0 sm:$0xff] }
 0x4c7   :  { %v5133_v42 = vpop.f32.mrb[28].mxu0  ;;  %v5212_v7 = vpop.f32.mrb[156].mxu1 }
 0x4c8   :  { %v5137_v58 = vadd.f32 %v5133_v42, %v5057_v45  ;;  %v7588_v59 = vpop.f32.mrb[29].mxu0  ;;  %v7595_v60 = vpop.f32.mrb[157].mxu1 }
 0x4ca   :  { %v5216_v20 = vadd.f32 %v5212_v7, %v5137_v58 }
 0x4cb   :  { %v5291_v19 = vpop.f32.mrb[30].mxu0  ;;  %v5370_v21 = vpop.f32.mrb[158].mxu1 }
 0x4cc   :  { %v5295_v2 = vadd.f32 %v5291_v19, %v5216_v20  ;;  %v7602_v5 = vpop.f32.mrb[31].mxu0  ;;  %v7609_v6 = vpop.f32.mrb[159].mxu1 }
 0x4ce   :  { %v9544_v17 = vadd.f32 %v5370_v21, %v5295_v2 }
 0x4cf   :  { %v5462_v18 = vpop.f32.mrb[32].mxu0 }
 0x4d0   :  { %v9546_v23 = vadd.f32 %v6616_v14, %v5462_v18  ;;  %v7616_v24 = vpop.f32.mrb[33].mxu0  ;;  %v5382_v48 = vadd.f32 %v6615_v47, %v9544_v17 }
 0x4d3   :  { %v5540_v25 = vpop.f32.mrb[160].mxu1 }
 0x4d4   :  { %v5544_v57 = vadd.f32 %v5540_v25, %v9546_v23  ;;  %v7627_v46 = vpop.f32.mrb[161].mxu1  ;;  %v5786_v25 = vld [vmem:[%s9697_s12] sm:$0xff] }
 0x4d5   :  { %v5788_v46 = vld [vmem:[%s9697_s12 + $0x10] sm:$0xff] }
 0x4d6   :  { %7949 = vtanh.f32 %v5544_v57  ;;  %v6618_v62 = vmul.f32 -1.442695, %v5544_v57  ;;  %v5787_v57 = vld [vmem:[%s9697_s12 + $0x8] sm:$0xff] }
 0x4d8   :  { %7951 = vpow2.f32 %v6618_v62  ;;  %v5789_v62 = vld [vmem:[%s9697_s12 + $0x18] sm:$0xff] }
 0x4e0   :  { %v7950_v52 = vpop.eup %7949 }
 0x4e1   :  { %5554 = vrot.lane.b32.xlu0 %v7950_v52, %s8000_s19  ;;  %v7780_v52 = vpack.c.bf16 %v5787_v57, %v5786_v25 }
 0x4e2   :  { %v7952_v11 = vpop.eup %7951 }
 0x4e3   :  { %v5548_v22 = vadd.f32 1.0, %v7952_v11  ;;  %v7783_v11 = vpack.c.bf16 %v5789_v62, %v5788_v46 }
 0x4e5   :  { %7953 = vrcp.f32 %v5548_v22 }
 0x4ef   :  { %v7954_v55 = vpop.eup %7953 }
 0x4f0   :  { %v5552_v30 = vmul.f32 0.0, %v7954_v55 }
 0x553   :  { %v5555_v27 = vpop.permute.xlu0 %5554 }
 0x554   :  { %v5557_v29 = vmul.f32 %v7954_v55, %v5555_v27 }
 0x556   :  { %5559 = vrot.lane.b32.xlu0 %v5557_v29, %s8001_s10 }
 0x5c8   :  { %v5560_v4 = vpop.permute.xlu0 %5559 }
 0x5c9   :  { %v5562_v9 = vadd.f32 %v5560_v4, %v5552_v30  ;;  %v5948_v30 = vld [vmem:[%s9699_s14] sm:$0xff]  ;;  %v5949_v4 = vld [vmem:[%s9699_s14 + $0x8] sm:$0xff] }
 0x5cb   :  { %7955 = vtanh.f32 %v5562_v9  ;;  %v5656_v50 = vrot.slane %v5562_v9, 6  ;;  %v7792_v9 = vpack.c.bf16 %v5949_v4, %v5948_v30 }
 0x5d5   :  { %v7956_v10 = vpop.eup %7955 }
 0x5d6   :  { %5565 = vrot.lane.b32.xlu1 %v7956_v10, %s8000_s19  ;;  %v5950_v10 = vld [vmem:[%s9699_s14 + $0x10] sm:$0xff] }
 0x648   :  { %v5566_v31 = vpop.permute.xlu1 %5565 }
 0x649   :  { %v5568_v12 = vmul.f32 %v7954_v55, %v5566_v31  ;;  %v5951_v31 = vld [vmem:[%s9699_s14 + $0x18] sm:$0xff] }
 0x64b   :  { %5570 = vrot.lane.b32.xlu1 %v5568_v12, %s8001_s10 }
 0x6bd   :  { %v5571_v16 = vpop.permute.xlu1 %5570 }
 0x6be   :  { %7637 = vmatmul.mubr.msk.f32.vlgmr.msra.gmra.mrb[34].mxu0 %vm5470_vm7, %v5571_v16  ;;  %v7795_v16 = vpack.c.bf16 %v5951_v31, %v5950_v10 }
 0x6bf   :  { %7658 = vmatprep.mubr.msk.f32.mxu0 %vm7999_vm4, %v7997_v8  ;;  %7781 = vmatpush3.bf16.msra.mxu0 %v7780_v52 }
 0x6c0   :  { %7782 = vmatprep.subr.bf16.mxu0 %v7998_v32 }
 0x6c3   :  { %7784 = vmatpush3.bf16.msra.mxu0 %v7783_v11 }
 0x6c4   :  { %7791 = vmatprep.subr.bf16.mxu0 %v7998_v32 }
 0x791   :  { %v5640_v13 = vpop.f32.mrb[34].mxu0 }
 0x792   :  { %v5645_v33 = vrot.slane %v5640_v13, 6  ;;  %v7638_v15 = vpop.f32.mrb[35].mxu0  ;;  %v5952_v13 = vld [vmem:[%s9699_s14 + $0x20] sm:$0xff] }
 0x794   :  { %v5647_v34 = vadd.f32 %v5645_v33, %v9546_v23  ;;  %v5953_v33 = vld [vmem:[%s9699_s14 + $0x28] sm:$0xff] }
 0x795   :  { %v7798_v15 = vpack.c.bf16 %v5953_v33, %v5952_v13 }
 0x796   :  { %7957 = vtanh.f32 %v5647_v34  ;;  %v6620_v37 = vmul.f32 -1.442695, %v5647_v34  ;;  %v5955_v34 = vld [vmem:[%s9699_s14 + $0x38] sm:$0xff] }
 0x798   :  { %7959 = vpow2.f32 %v6620_v37  ;;  %v6038_v37 = vld [vmem:[%s9701_s16] sm:$0xff] }
 0x7a0   :  { %v7958_v35 = vpop.eup %7957 }
 0x7a1   :  { %5660 = vrot.lane.b32.xlu0 %v7958_v35, %s8000_s19 }
 0x7a2   :  { %v7960_v38 = vpop.eup %7959 }
 0x7a3   :  { %v5651_v41 = vadd.f32 1.0, %v7960_v38  ;;  %v6039_v38 = vld [vmem:[%s9701_s16 + $0x8] sm:$0xff] }
 0x7a5   :  { %7961 = vrcp.f32 %v5651_v41  ;;  %v6040_v41 = vld [vmem:[%s9701_s16 + $0x10] sm:$0xff] }
 0x7af   :  { %v7962_v26 = vpop.eup %7961 }
 0x7b0   :  { %v5658_v51 = vmul.f32 %v7962_v26, %v5656_v50  ;;  %v6042_v50 = vld [vmem:[%s9701_s16 + $0x20] sm:$0xff] }
 0x813   :  { %v5661_v43 = vpop.permute.xlu0 %5660 }
 0x814   :  { %v5663_v49 = vmul.f32 %v7962_v26, %v5661_v43  ;;  %v6041_v43 = vld [vmem:[%s9701_s16 + $0x18] sm:$0xff] }
 0x816   :  { %5665 = vrot.lane.b32.xlu1 %v5663_v49, %s8001_s10  ;;  %v7807_v49 = vpack.c.bf16 %v6041_v43, %v6040_v41 }
 0x888   :  { %v5666_v61 = vpop.permute.xlu1 %5665 }
 0x889   :  { %v5668_v28 = vadd.f32 %v5666_v61, %v5658_v51  ;;  %v6043_v51 = vld [vmem:[%s9701_s16 + $0x28] sm:$0xff] }
 0x88a   :  { %v7810_v61 = vpack.c.bf16 %v6043_v51, %v6042_v50 }
 0x88b   :  { %7963 = vtanh.f32 %v5668_v28  ;;  %v5763_v17 = vrot.slane %v5668_v28, 6 }
 0x895   :  { %v7964_v36 = vpop.eup %7963 }
 0x896   :  { %5671 = vrot.lane.b32.xlu0 %v7964_v36, %s8000_s19  ;;  %v6625_v36 = vld [vmem:[%s9698_s13] ss:$0 sm:$0xff] }
 0x908   :  { %v5672_v63 = vpop.permute.xlu0 %5671 }
 0x909   :  { %v5674_v39 = vmul.f32 %v7962_v26, %v5672_v63  ;;  %v7804_v26 = vpack.c.bf16 %v6039_v38, %v6038_v37 }
 0x90b   :  { %v5676_v0 = vrot.slane %v5674_v39, 2 }
 0x90d   :  { %5677 = vrot.lane.b32.xlu1 %v5676_v0, %s8001_s10 }
 0x97f   :  { %v5678_v40 = vpop.permute.xlu1 %5677 }
 0x980   :  { %7648 = vmatmul.mubr.msk.f32.vlgmr.msra.gmra.mrb[162].mxu1 %vm5470_vm7, %v5678_v40 }
 0x981   :  { %7787 = vmatpush3.bf16.msra.mxu1 %v7786_v53  ;;  %7669 = vmatprep.mubr.msk.f32.mxu1 %vm7999_vm4, %v7997_v8 }
 0x982   :  { %7788 = vmatprep.subr.bf16.mxu1 %v7998_v32 }
 0x985   :  { %7790 = vmatpush3.bf16.msra.mxu1 %v7789_v44 }
 0x986   :  { %7803 = vmatprep.subr.bf16.mxu1 %v7998_v32 }
 0x988   :  { %7670 = vmatmul.mubr.msk.f32.vlgmr.msra.gmra.mrb[164].mxu1 %vm5470_vm7, %v5382_v48  ;;  %v6628_v48 = vld [vmem:[%s9702_s17] ss:$0 sm:$0xff] }
 0x989   :  { %7707 = vmatprep.mubr.msk.f32.mxu1 %vm7999_vm4, %v7997_v8  ;;  %7805 = vmatpush3.bf16.msra.mxu1 %v7804_v26 }
 0x98a   :  { %7806 = vmatprep.subr.bf16.mxu1 %v7998_v32 }
 0x98d   :  { %7808 = vmatpush3.bf16.msra.mxu1 %v7807_v49 }
 0x98e   :  { %7809 = vmatprep.subr.bf16.mxu1 %v7998_v32 }
 0x991   :  { %7811 = vmatpush3.bf16.msra.mxu1 %v7810_v61 }
 0x992   :  { %7812 = vmatprep.subr.bf16.mxu1 %v7998_v32 }
 0xa53   :  { %v5747_v45 = vpop.f32.mrb[162].mxu1 }
 0xa54   :  { %v5752_v42 = vrot.slane %v5747_v45, 4  ;;  %v7649_v7 = vpop.f32.mrb[163].mxu1 }
 0xa56   :  { %v5754_v58 = vadd.f32 %v5752_v42, %v9546_v23 }
 0xa58   :  { %7965 = vtanh.f32 %v5754_v58  ;;  %v6622_v19 = vmul.f32 -1.442695, %v5754_v58 }
 0xa5a   :  { %7967 = vpow2.f32 %v6622_v19 }
 0xa5b   :  { %v9586_v59 = vpop.f32.mrb[164].mxu1 }
 0xa5c   :  { %v7671_v60 = vpop.f32.mrb[165].mxu1 }
 0xa62   :  { %v7966_v20 = vpop.eup %7965 }
 0xa63   :  { %5767 = vrot.lane.b32.xlu0 %v7966_v20, %s8000_s19 }
 0xa64   :  { %v7968_v21 = vpop.eup %7967 }
 0xa65   :  { %v5758_v2 = vadd.f32 1.0, %v7968_v21 }
 0xa67   :  { %7969 = vrcp.f32 %v5758_v2 }
 0xa71   :  { %v7970_v5 = vpop.eup %7969 }
 0xa72   :  { %v5765_v18 = vmul.f32 %v7970_v5, %v5763_v17 }
 0xad5   :  { %v5768_v6 = vpop.permute.xlu0 %5767 }
 0xad6   :  { %v5770_v14 = vmul.f32 %v7970_v5, %v5768_v6 }
 0xad8   :  { %5772 = vrot.lane.b32.xlu1 %v5770_v14, %s8001_s10 }
 0xb4a   :  { %v5773_v23 = vpop.permute.xlu1 %5772 }
 0xb4b   :  { %v5775_v24 = vadd.f32 %v5773_v23, %v5765_v18 }
 0xb4d   :  { %7971 = vtanh.f32 %v5775_v24 }
 0xb57   :  { %v7972_v22 = vpop.eup %7971 }
 0xb58   :  { %5778 = vrot.lane.b32.xlu0 %v7972_v22, %s8000_s19 }
 0xbca   :  { %v5779_v55 = vpop.permute.xlu0 %5778 }
 0xbcb   :  { %v5781_v27 = vmul.f32 %v7970_v5, %v5779_v55 }
 0xbcd   :  { %v5791_v29 = vrot.slane %v5781_v27, 4 }
 0xbcf   :  { %5792 = vrot.lane.b32.xlu1 %v5791_v29, %s8001_s10 }
 0xc41   :  { %v5793_v12 = vpop.permute.xlu1 %5792 }
 0xc42   :  { %7659 = vmatmul.mubr.msk.f32.vlgmr.msra.gmra.mrb[36].mxu0 %vm5470_vm7, %v5793_v12 }
 0xc43   :  { %7793 = vmatpush3.bf16.msra.mxu0 %v7792_v9  ;;  %7688 = vmatprep.mubr.msk.f32.mxu0 %vm7999_vm4, %v7997_v8  ;;  %v5954_v8 = vld [vmem:[%s9699_s14 + $0x30] sm:$0xff] }
 0xc44   :  { %7794 = vmatprep.subr.bf16.mxu0 %v7998_v32  ;;  %v7801_v35 = vpack.c.bf16 %v5955_v34, %v5954_v8 }
 0xc47   :  { %7796 = vmatpush3.bf16.msra.mxu0 %v7795_v16 }
 0xc48   :  { %7797 = vmatprep.subr.bf16.mxu0 %v7998_v32 }
 0xc4b   :  { %7799 = vmatpush3.bf16.msra.mxu0 %v7798_v15 }
 0xc4c   :  { %7800 = vmatprep.subr.bf16.mxu0 %v7998_v32  ;;  %v6045_v32 = vld [vmem:[%s9701_s16 + $0x38] sm:$0xff]  ;;  %s7973_s16 = scalar_lea.vmem %s6135_s4, 32 }
 0xc4d   :  { %v7813_v53 = vpack.c.bf16 %v6045_v32, %v6044_v3  ;;  %p7974_p0 = scmp.ne.s32.totalorder %s6135_s4, %s7973_s16  ;;  %p7979_p2 = scmp.lt.s32.totalorder %s7973_s16, %s7973_s16 }
 0xc4f   :  { %7802 = vmatpush3.bf16.msra.mxu0 %v7801_v35  ;;  %7814 = vmatpush3.bf16.msra.mxu1 %v7813_v53  ;;  %p7980_p3 = por %p7979_p2, %p7978_p1 }
 0xc51   :  { %p7981_p4 = pnand %p7980_p3, %p7974_p0 }
 0xd15   :  { %v5862_v28 = vpop.f32.mrb[36].mxu0 }
 0xd16   :  { %v5936_v63 = vadd.f32 %v9586_v59, %v5862_v28  ;;  %v7660_v39 = vpop.f32.mrb[37].mxu0 }
 0xd18   :  { %v5946_v0 = vadd.f32 %v6625_v36, %v5936_v63 }
 0xd1a   :  { %v5947_v1 = vmax.f32 %v5946_v0, 0.0 }
 0xd1c   :  { %7689 = vmatmul.mubr.msk.f32.vlgmr.msra.gmra.mrb[38].mxu0 %vm5963_vm8, %v5947_v1 }
 0xdef   :  { %v6033_v56 = vpop.f32.mrb[38].mxu0 }
 0xdf0   :  { %v6034_v40 = vadd.f32 %v6626_v54, %v6033_v56  ;;  %v7690_v44 = vpop.f32.mrb[39].mxu0 }
 0xdf2   :  { %v6037_v47 = vmax.f32 %v6034_v40, 0.0 }
 0xdf4   :  { %7708 = vmatmul.mubr.msk.f32.vlgmr.msra.gmra.mrb[166].mxu1 %vm5963_vm8, %v6037_v47 }
 0xec7   :  { %v6122_v45 = vpop.f32.mrb[166].mxu1 }
 0xec8   :  { %v6123_v42 = vadd.f32 %v6628_v48, %v6122_v45  ;;  %v7709_v7 = vpop.f32.mrb[167].mxu1 }
 0xeca   :  { %6127 = vst.msk [vmem:[#allocation3] sm:$0x3] %vm6126_vm9, %v6123_v42 }
 0xecb   :  { %7984 = shalt.err (!%p7981_p4)
}
 0xecc   :  { %s7985_s3 = scalar_lea.hbm %s9703_s18, 32 }
 0xecd   :  { %p7986_p5 = scmp.ne.s32.totalorder %s9703_s18, %s7985_s3  ;;  %p7989_p6 = scmp.lt.u32.totalorder %s7985_s3, %s9703_s18 }
 0xecf   :  { %p7991_p7 = pnand %p7989_p6, %p7986_p5 }
 0xed1   :  { %7994 = shalt.err (!%p7991_p7)
}
 0xed2   :  { %6137 = dma.vmem_to_hbm [thread:$0]  %s6135_s4, 32, %s9703_s18, [#allocation4]  }
 0xed3   :  { %7995 = dma.done.wait [#allocation4], 32  }
 0xed4   :  { %7996 = vsyncadd [#allocation4], 4294967264 }
 0xed5   :  { %6141 = vsyncpa [#allocation4], 1 }

</bundles_post_ra>
